<compile_context>
chip_gen: v7x
topology: tpu7x:2x2x1
jax: 0.10.0
libtpu: 0.0.40
codegen_flags: <defaults>
</compile_context>

<pallas_src>
import math

import jax
import jax.numpy as jnp
from jax import lax
from jax.experimental import pallas as pl
from jax.experimental.pallas import tpu as pltpu

# ----------------------- small, module-consistent config -----------------------
B = 2                        # params.batch_size
L = 8                        # padded sequence length (== max(lens))
N = B * L                    # flattened token count
VOCAB = 20
WORD_DIM = 16                # raw word-embedding dim
POS_DIM = 8                  # params.pos_emb_dim
EMB_DIM = WORD_DIM + 2 * POS_DIM   # concat dim == params.word_emb_dim (32)
HIDDEN = 32                  # params.hidden_dim
HEADS = 4                    # params.head
DH = HIDDEN // HEADS         # per-head size (8)
MAX_LEN = 16                 # params.max_len (relative position table half-width)
ABS_MAX_LEN = 51             # Absolute_Position_Embedding default
POS_DIS_LIMIT = 10           # params.pos_dis_limit
NUM_LABELS = 5               # len(data_loader.label2idx)

NEG_MASK = -1e15             # matches masked_fill(~mask, -1000000000000000.0)


# ------------------------------ sinusoidal tables -------------------------------
def get_embedding(max_seq_len, embedding_dim, rel_pos_init=0):
    """Port of get_embedding() (tensor2tensor-style sinusoidal table)."""
    num_embeddings = 2 * max_seq_len + 1
    half_dim = embedding_dim // 2
    scale = math.log(10000.0) / (half_dim - 1)
    freqs = jnp.exp(jnp.arange(half_dim, dtype=jnp.float32) * -scale)
    if rel_pos_init == 0:
        pos = jnp.arange(num_embeddings, dtype=jnp.float32)
    else:
        pos = jnp.arange(-max_seq_len, max_seq_len + 1, dtype=jnp.float32)
    ang = pos[:, None] * freqs[None, :]
    pe = jnp.concatenate([jnp.sin(ang), jnp.cos(ang)], axis=1)
    if embedding_dim % 2 == 1:
        pe = jnp.concatenate([pe, jnp.zeros((num_embeddings, 1), jnp.float32)], axis=1)
    return pe.astype(jnp.float32)


# --------------------------- in-kernel exact-GELU helper -------------------------
def _erf_approx(x):
    # Abramowitz & Stegun 7.1.26, |err| <= 1.5e-7 — uses only exp/mul/add/where/div,
    # all of which have proven Mosaic lowerings (no erf primitive needed in-kernel).
    a1, a2, a3, a4, a5 = 0.254829592, -0.284496736, 1.421413741, -1.453152027, 1.061405429
    p = 0.3275911
    sgn = jnp.where(x >= 0.0, 1.0, -1.0)
    ax = jnp.abs(x)
    t = 1.0 / (1.0 + p * ax)
    poly = ((((a5 * t + a4) * t + a3) * t + a2) * t + a1) * t
    return sgn * (1.0 - poly * jnp.exp(-ax * ax))


def _gelu_exact(x):
    # nn.GELU() default = exact (erf-based) GELU; error from the erf approx ~1e-7.
    return 0.5 * x * (1.0 + _erf_approx(x * (1.0 / math.sqrt(2.0))))


# ------------------------------- fused forward kernel ----------------------------
def fused_forward_kernel(emb_ref, relh_ref, kmask_ref, gmask_ref,
                         mapw_ref, mapb_ref, wh_ref, bh_ref, u_ref, v_ref,
                         gamma_ref, beta_ref, attw_ref, dw_ref, db_ref,
                         o_ref):
    """Whole forward for all B*L tokens in one invocation (everything stays in VMEM).

    emb_ref   : [N, EMB_DIM]           flattened (batch, seq) token embeddings
    relh_ref  : [HEADS, N, N, DH]      relative-position table, pre-split per head
    kmask_ref : [N, N]                 block-diagonal key mask (1 = attend)
    gmask_ref : [B, N]                 gate-attention selection mask per batch
    wh/bh     : [HEADS, EMB_DIM, DH] / [HEADS, 1, DH]   per-head columns of the map Linear
    u/v       : [HEADS, 1, DH]
    """
    f32 = jnp.float32
    inv_scale = 1.0 / math.sqrt(DH)                                # scaled=True

    emb = emb_ref[...]                                             # [N, EMB_DIM]
    kmask = kmask_ref[...]                                         # [N, N]

    # Encoder map Linear (residual path): one [N,EMB] x [EMB,HIDDEN] MXU matmul.
    src = jnp.dot(emb, mapw_ref[...], preferred_element_type=f32) + mapb_ref[...]   # [N, HIDDEN]

    # Relative-position multi-head self attention (q == k == v == src, no projections).
    head_ctx = []
    for h in range(HEADS):                                         # static unroll, leading-axis indexing only
        # per-head projection via pre-split weight columns (== src[:, h*DH:(h+1)*DH])
        q_h = jnp.dot(emb, wh_ref[h], preferred_element_type=f32) + bh_ref[h]        # [N, DH]
        u_h = u_ref[h]                                             # [1, DH]
        v_h = v_ref[h]
        rel_h = relh_ref[h]                                        # [N, N, DH]

        # A_ + C_ = (q_i + u) . k_j   (Transformer-XL identity) — one [N,DH] x [N,DH]^T matmul
        ac = lax.dot_general(q_h + u_h, q_h, (((1,), (1,)), ((), ())),
                             preferred_element_type=f32)           # [N, N]
        # B_ + D_ = (q_i + v) . rel_ij  (DH=8 contraction)
        bd = jnp.sum((q_h + v_h)[:, None, :] * rel_h, axis=-1)     # [N, N]

        score = (ac + bd) * inv_scale
        score = jnp.where(kmask > 0, score, NEG_MASK)              # key mask (batches isolated)
        m = jnp.max(score, axis=-1, keepdims=True)
        e = jnp.exp(score - m)
        p = e * pl.reciprocal(jnp.sum(e, axis=-1, keepdims=True), approx=True)
        head_ctx.append(jnp.dot(p, q_h, preferred_element_type=f32))               # [N, DH]

    res = jnp.concatenate(head_ctx, axis=-1)                       # [N, HIDDEN]
    result = src + res                                             # residual

    # LayerNorm (eps = 1e-5) then exact GELU  (== activate(layer_norm(result)))
    mu = jnp.mean(result, axis=-1, keepdims=True)
    var = jnp.mean((result - mu) ** 2, axis=-1, keepdims=True)
    ln = (result - mu) * lax.rsqrt(var + 1e-5) * gamma_ref[...] + beta_ref[...]
    enc = _gelu_exact(ln)                                          # [N, HIDDEN], stays in VMEM

    # Gate attention (lane-major logits) + tanh + dense classifier.
    gate = jnp.tanh(enc)                                           # [N, HIDDEN]
    logits = lax.dot_general(attw_ref[...], gate, (((1,), (1,)), ((), ())),
                             preferred_element_type=f32)           # [1, N]
    logits = jnp.where(gmask_ref[...] > 0, logits, -jnp.inf)       # [B, N] (per-batch selection)
    mg = jnp.max(logits, axis=-1, keepdims=True)
    eg = jnp.exp(logits - mg)
    pg = eg * pl.reciprocal(jnp.sum(eg, axis=-1, keepdims=True), approx=True)       # [B, N]
    pooled = jnp.dot(pg, enc, preferred_element_type=f32)          # [B, HIDDEN]
    att_out = jnp.tanh(pooled)
    o_ref[...] = jnp.dot(att_out, dw_ref[...], preferred_element_type=f32) + db_ref[...]   # [B, C]


# --------------------------------- full forward ----------------------------------
@jax.jit
def transformer_gate_attention_forward(sents, pos1s, pos2s, mask2d, params):
    # ----- plain-JAX glue: embedding gathers + absolute position encoding -----
    word_embs = params['word_table'][sents]                        # [B, L, WORD_DIM]
    pos1_embs = params['pos1_table'][pos1s]                        # [B, L, POS_DIM]
    pos2_embs = params['pos2_table'][pos2s]                        # [B, L, POS_DIM]
    emb = jnp.concatenate([word_embs, pos1_embs, pos2_embs], axis=-1)       # [B, L, EMB_DIM]
    pe_abs = get_embedding(ABS_MAX_LEN, EMB_DIM, rel_pos_init=0)
    emb = emb + pe_abs[None, :L, :]                                # 'nonlinear_add' fusion
    # dropout_emb / att_drop / res_drop / encoder_drop / dropout_att: identity (eval mode)
    emb2 = emb.reshape(N, EMB_DIM).astype(jnp.float32)             # fold batch into sequence

    # ----- relative position embedding gather -----
    # Reference: self.pe[rel_distance + max(seq_len)] with max(seq_len) == L (NOT params.max_len).
    pe_rel = get_embedding(MAX_LEN, HIDDEN, rel_pos_init=1)        # [2*MAX_LEN+1, HIDDEN]
    idx = (jnp.arange(L)[None, :] - jnp.arange(L)[:, None]) + L    # pe[(j - i) + L]
    rel_local = pe_rel[idx]                                        # [L, L, HIDDEN]
    rel_flat = jnp.tile(rel_local, (B, B, 1))                      # [N, N, HIDDEN] (cross-batch blocks masked)
    rel_heads = jnp.transpose(rel_flat.reshape(N, N, HEADS, DH), (2, 0, 1, 3))      # [HEADS, N, N, DH]

    # ----- block-diagonal key mask & per-batch gate-attention selection mask -----
    bid = jnp.arange(N, dtype=jnp.int32) // L                      # batch id of each flattened token
    key_valid = mask2d.reshape(N) > 0
    kmask = ((bid[:, None] == bid[None, :]) & key_valid[None, :]).astype(jnp.float32)            # [N, N]
    gmask = ((bid[None, :] == jnp.arange(B, dtype=jnp.int32)[:, None])
             & key_valid[None, :]).astype(jnp.float32)                                           # [B, N]

    # ----- per-head split of the map Linear / u / v (once, outside the kernel) -----
    wh = jnp.transpose(params['map_w'].reshape(EMB_DIM, HEADS, DH), (1, 0, 2))   # [HEADS, EMB_DIM, DH]
    bh = jnp.transpose(params['map_b'].reshape(1, HEADS, DH), (1, 0, 2))         # [HEADS, 1, DH]
    u3 = params['u'][:, None, :]                                   # [HEADS, 1, DH]
    v3 = params['v'][:, None, :]
    attw_row = params['att_w'].reshape(1, HIDDEN)                  # [1, HIDDEN]

    vmem = pl.BlockSpec(memory_space=pltpu.MemorySpace.VMEM)       # whole-array, VMEM-resident operands
    out = pl.pallas_call(
        fused_forward_kernel,
        out_shape=jax.ShapeDtypeStruct((B, NUM_LABELS), jnp.float32),
        in_specs=[vmem] * 15,
        out_specs=vmem,
    )(emb2, rel_heads, kmask, gmask,
      params['map_w'], params['map_b'], wh, bh, u3, v3,
      params['ln_gamma'], params['ln_beta'], attw_row,
      params['dense_w'], params['dense_b'])
    return out                                                     # [B, NUM_LABELS]


# ------------------------------ deterministic params ----------------------------
def init_params(key):
    ks = jax.random.split(key, 9)
    return dict(
        word_table=0.1 * jax.random.normal(ks[0], (VOCAB, WORD_DIM), jnp.float32),
        pos1_table=0.1 * jax.random.normal(ks[1], (2 * POS_DIS_LIMIT + 3, POS_DIM), jnp.float32),
        pos2_table=0.1 * jax.random.normal(ks[2], (2 * POS_DIS_LIMIT + 3, POS_DIM), jnp.float32),
        map_w=(1.0 / math.sqrt(EMB_DIM)) * jax.random.normal(ks[3], (EMB_DIM, HIDDEN), jnp.float32),
        map_b=0.01 * jax.random.normal(ks[4], (1, HIDDEN), jnp.float32),
        u=0.1 * jax.random.normal(ks[5], (HEADS, DH), jnp.float32),
        v=0.1 * jax.random.normal(ks[6], (HEADS, DH), jnp.float32),
        ln_gamma=jnp.ones((1, HIDDEN), jnp.float32),               # nn.LayerNorm defaults
        ln_beta=jnp.zeros((1, HIDDEN), jnp.float32),
        att_w=jax.random.normal(ks[7], (HIDDEN, 1), jnp.float32),
        dense_w=(1.0 / math.sqrt(HIDDEN)) * jax.random.normal(ks[8], (HIDDEN, NUM_LABELS), jnp.float32),
        dense_b=jnp.zeros((1, NUM_LABELS), jnp.float32),
    )


# ------------------------------------- main --------------------------------------
if __name__ == "__main__":
    key = jax.random.PRNGKey(0)
    ks = jax.random.split(key, 5)
    sents = jax.random.randint(ks[0], (B, L), 0, VOCAB)
    pos1s = jax.random.randint(ks[1], (B, L), 0, 2 * POS_DIS_LIMIT + 3)
    pos2s = jax.random.randint(ks[2], (B, L), 0, 2 * POS_DIS_LIMIT + 3)
    lens = jnp.array([L, 5], dtype=jnp.int32)                      # max(lens) == L
    mask2d = (jnp.arange(L)[None, :] < lens[:, None]).astype(jnp.float32)   # [B, L], 1 = valid

    params = init_params(ks[3])

    out = transformer_gate_attention_forward(sents, pos1s, pos2s, mask2d, params)
    out = jax.block_until_ready(out)
    assert out.shape == (B, NUM_LABELS)
    assert bool(jnp.all(jnp.isfinite(out)))
    print("KERNEL_OK")
</pallas_src>

<mosaic_0001>
module attributes {stable_mosaic.version = 11 : i64} {
  func.func @fused_forward_kernel(%arg0: memref<16x32xf32, #tpu.memory_space<vmem>>, %arg1: memref<4x16x16x8xf32, #tpu.memory_space<vmem>>, %arg2: memref<16x16xf32, #tpu.memory_space<vmem>>, %arg3: memref<2x16xf32, #tpu.memory_space<vmem>>, %arg4: memref<32x32xf32, #tpu.memory_space<vmem>>, %arg5: memref<1x32xf32, #tpu.memory_space<vmem>>, %arg6: memref<4x32x8xf32, #tpu.memory_space<vmem>>, %arg7: memref<4x1x8xf32, #tpu.memory_space<vmem>>, %arg8: memref<4x1x8xf32, #tpu.memory_space<vmem>>, %arg9: memref<4x1x8xf32, #tpu.memory_space<vmem>>, %arg10: memref<1x32xf32, #tpu.memory_space<vmem>>, %arg11: memref<1x32xf32, #tpu.memory_space<vmem>>, %arg12: memref<1x32xf32, #tpu.memory_space<vmem>>, %arg13: memref<32x5xf32, #tpu.memory_space<vmem>>, %arg14: memref<1x5xf32, #tpu.memory_space<vmem>>, %arg15: memref<2x5xf32, #tpu.memory_space<vmem>>) attributes {dimension_semantics = [], scalar_prefetch = 0 : i64, scratch_operands = 0 : i64, tpu.core_type = #tpu.core_type<tc>} {
    %c0 = arith.constant 0 : index
    %c0_0 = arith.constant 0 : index
    %0 = vector.load %arg0[%c0, %c0_0] : memref<16x32xf32, #tpu.memory_space<vmem>>, vector<16x32xf32>
    %c0_1 = arith.constant 0 : index
    %c0_2 = arith.constant 0 : index
    %1 = vector.load %arg2[%c0_1, %c0_2] : memref<16x16xf32, #tpu.memory_space<vmem>>, vector<16x16xf32>
    %c0_3 = arith.constant 0 : index
    %c0_4 = arith.constant 0 : index
    %2 = vector.load %arg4[%c0_3, %c0_4] : memref<32x32xf32, #tpu.memory_space<vmem>>, vector<32x32xf32>
    %cst = arith.constant dense<0.000000e+00> : vector<16x32xf32>
    %3 = tpu.matmul %0, %2, %cst {dimension_numbers = #tpu.dot_dimension_numbers<[1], [0], [0], [1], [0, 0, 1, 1], [], []>} : vector<16x32xf32>, vector<32x32xf32>, vector<16x32xf32> -> vector<16x32xf32>
    %c0_5 = arith.constant 0 : index
    %c0_6 = arith.constant 0 : index
    %4 = vector.load %arg5[%c0_5, %c0_6] : memref<1x32xf32, #tpu.memory_space<vmem>>, vector<1x32xf32>
    %5 = vector.broadcast %4 : vector<1x32xf32> to vector<16x32xf32>
    %6 = arith.addf %3, %5 : vector<16x32xf32>
    %c0_7 = arith.constant 0 : index
    %c0_8 = arith.constant 0 : index
    %c0_9 = arith.constant 0 : index
    %7 = vector.load %arg6[%c0_7, %c0_8, %c0_9] : memref<4x32x8xf32, #tpu.memory_space<vmem>>, vector<1x32x8xf32>
    %8 = vector.shape_cast %7 : vector<1x32x8xf32> to vector<32x8xf32>
    %cst_10 = arith.constant dense<0.000000e+00> : vector<16x8xf32>
    %9 = tpu.matmul %0, %8, %cst_10 {dimension_numbers = #tpu.dot_dimension_numbers<[1], [0], [0], [1], [0, 0, 1, 1], [], []>} : vector<16x32xf32>, vector<32x8xf32>, vector<16x8xf32> -> vector<16x8xf32>
    %c0_11 = arith.constant 0 : index
    %c0_12 = arith.constant 0 : index
    %c0_13 = arith.constant 0 : index
    %10 = vector.load %arg7[%c0_11, %c0_12, %c0_13] : memref<4x1x8xf32, #tpu.memory_space<vmem>>, vector<1x1x8xf32>
    %11 = vector.shape_cast %10 : vector<1x1x8xf32> to vector<1x8xf32>
    %12 = vector.broadcast %11 : vector<1x8xf32> to vector<16x8xf32>
    %13 = arith.addf %9, %12 : vector<16x8xf32>
    %c0_14 = arith.constant 0 : index
    %c0_15 = arith.constant 0 : index
    %c0_16 = arith.constant 0 : index
    %14 = vector.load %arg8[%c0_14, %c0_15, %c0_16] : memref<4x1x8xf32, #tpu.memory_space<vmem>>, vector<1x1x8xf32>
    %15 = vector.shape_cast %14 : vector<1x1x8xf32> to vector<1x8xf32>
    %c0_17 = arith.constant 0 : index
    %c0_18 = arith.constant 0 : index
    %c0_19 = arith.constant 0 : index
    %16 = vector.load %arg9[%c0_17, %c0_18, %c0_19] : memref<4x1x8xf32, #tpu.memory_space<vmem>>, vector<1x1x8xf32>
    %17 = vector.shape_cast %16 : vector<1x1x8xf32> to vector<1x8xf32>
    %c0_20 = arith.constant 0 : index
    %c0_21 = arith.constant 0 : index
    %c0_22 = arith.constant 0 : index
    %c0_23 = arith.constant 0 : index
    %18 = vector.load %arg1[%c0_20, %c0_21, %c0_22, %c0_23] : memref<4x16x16x8xf32, #tpu.memory_space<vmem>>, vector<1x16x16x8xf32>
    %19 = vector.shape_cast %18 : vector<1x16x16x8xf32> to vector<16x16x8xf32>
    %20 = vector.broadcast %15 : vector<1x8xf32> to vector<16x8xf32>
    %21 = arith.addf %13, %20 : vector<16x8xf32>
    %cst_24 = arith.constant dense<0.000000e+00> : vector<16x16xf32>
    %22 = tpu.matmul %21, %13, %cst_24 {dimension_numbers = #tpu.dot_dimension_numbers<[1], [1], [0], [0], [0, 0, 1, 0], [], []>} : vector<16x8xf32>, vector<16x8xf32>, vector<16x16xf32> -> vector<16x16xf32>
    %23 = vector.broadcast %17 : vector<1x8xf32> to vector<16x8xf32>
    %24 = arith.addf %13, %23 : vector<16x8xf32>
    %25 = vector.shape_cast %24 : vector<16x8xf32> to vector<16x1x8xf32>
    %26 = vector.broadcast %25 : vector<16x1x8xf32> to vector<16x16x8xf32>
    %27 = arith.mulf %26, %19 : vector<16x16x8xf32>
    %cst_25 = arith.constant dense<0.000000e+00> : vector<16x16xf32>
    %28 = vector.multi_reduction <add>, %27, %cst_25 [2] : vector<16x16x8xf32> to vector<16x16xf32>
    %29 = arith.addf %22, %28 : vector<16x16xf32>
    %cst_26 = arith.constant 0.353553385 : f32
    %30 = vector.broadcast %cst_26 : f32 to vector<16x16xf32>
    %31 = arith.mulf %29, %30 : vector<16x16xf32>
    %cst_27 = arith.constant 0.000000e+00 : f32
    %32 = vector.broadcast %cst_27 : f32 to vector<16x16xf32>
    %33 = arith.cmpf ogt, %1, %32 : vector<16x16xf32>
    %cst_28 = arith.constant -9.99999986E+14 : f32
    %34 = vector.broadcast %cst_28 : f32 to vector<16x16xf32>
    %35 = arith.select %33, %31, %34 : vector<16x16xi1>, vector<16x16xf32>
    %cst_29 = arith.constant dense<0xFF800000> : vector<16xf32>
    %36 = vector.multi_reduction <maximumf>, %35, %cst_29 [1] : vector<16x16xf32> to vector<16xf32>
    %37 = vector.shape_cast %36 : vector<16xf32> to vector<16x1xf32>
    %38 = vector.broadcast %37 : vector<16x1xf32> to vector<16x16xf32>
    %39 = arith.subf %35, %38 : vector<16x16xf32>
    %40 = math.exp %39 : vector<16x16xf32>
    %cst_30 = arith.constant dense<0.000000e+00> : vector<16xf32>
    %41 = vector.multi_reduction <add>, %40, %cst_30 [1] : vector<16x16xf32> to vector<16xf32>
    %42 = vector.shape_cast %41 : vector<16xf32> to vector<16x1xf32>
    %43 = tpu.reciprocal %42 {approx = true} : vector<16x1xf32> -> vector<16x1xf32>
    %44 = vector.broadcast %43 : vector<16x1xf32> to vector<16x16xf32>
    %45 = arith.mulf %40, %44 : vector<16x16xf32>
    %cst_31 = arith.constant dense<0.000000e+00> : vector<16x8xf32>
    %46 = tpu.matmul %45, %13, %cst_31 {dimension_numbers = #tpu.dot_dimension_numbers<[1], [0], [0], [1], [0, 0, 1, 1], [], []>} : vector<16x16xf32>, vector<16x8xf32>, vector<16x8xf32> -> vector<16x8xf32>
    %c1 = arith.constant 1 : index
    %c0_32 = arith.constant 0 : index
    %c0_33 = arith.constant 0 : index
    %47 = vector.load %arg6[%c1, %c0_32, %c0_33] : memref<4x32x8xf32, #tpu.memory_space<vmem>>, vector<1x32x8xf32>
    %48 = vector.shape_cast %47 : vector<1x32x8xf32> to vector<32x8xf32>
    %cst_34 = arith.constant dense<0.000000e+00> : vector<16x8xf32>
    %49 = tpu.matmul %0, %48, %cst_34 {dimension_numbers = #tpu.dot_dimension_numbers<[1], [0], [0], [1], [0, 0, 1, 1], [], []>} : vector<16x32xf32>, vector<32x8xf32>, vector<16x8xf32> -> vector<16x8xf32>
    %c1_35 = arith.constant 1 : index
    %c0_36 = arith.constant 0 : index
    %c0_37 = arith.constant 0 : index
    %50 = vector.load %arg7[%c1_35, %c0_36, %c0_37] : memref<4x1x8xf32, #tpu.memory_space<vmem>>, vector<1x1x8xf32>
    %51 = vector.shape_cast %50 : vector<1x1x8xf32> to vector<1x8xf32>
    %52 = vector.broadcast %51 : vector<1x8xf32> to vector<16x8xf32>
    %53 = arith.addf %49, %52 : vector<16x8xf32>
    %c1_38 = arith.constant 1 : index
    %c0_39 = arith.constant 0 : index
    %c0_40 = arith.constant 0 : index
    %54 = vector.load %arg8[%c1_38, %c0_39, %c0_40] : memref<4x1x8xf32, #tpu.memory_space<vmem>>, vector<1x1x8xf32>
    %55 = vector.shape_cast %54 : vector<1x1x8xf32> to vector<1x8xf32>
    %c1_41 = arith.constant 1 : index
    %c0_42 = arith.constant 0 : index
    %c0_43 = arith.constant 0 : index
    %56 = vector.load %arg9[%c1_41, %c0_42, %c0_43] : memref<4x1x8xf32, #tpu.memory_space<vmem>>, vector<1x1x8xf32>
    %57 = vector.shape_cast %56 : vector<1x1x8xf32> to vector<1x8xf32>
    %c1_44 = arith.constant 1 : index
    %c0_45 = arith.constant 0 : index
    %c0_46 = arith.constant 0 : index
    %c0_47 = arith.constant 0 : index
    %58 = vector.load %arg1[%c1_44, %c0_45, %c0_46, %c0_47] : memref<4x16x16x8xf32, #tpu.memory_space<vmem>>, vector<1x16x16x8xf32>
    %59 = vector.shape_cast %58 : vector<1x16x16x8xf32> to vector<16x16x8xf32>
    %60 = vector.broadcast %55 : vector<1x8xf32> to vector<16x8xf32>
    %61 = arith.addf %53, %60 : vector<16x8xf32>
    %cst_48 = arith.constant dense<0.000000e+00> : vector<16x16xf32>
    %62 = tpu.matmul %61, %53, %cst_48 {dimension_numbers = #tpu.dot_dimension_numbers<[1], [1], [0], [0], [0, 0, 1, 0], [], []>} : vector<16x8xf32>, vector<16x8xf32>, vector<16x16xf32> -> vector<16x16xf32>
    %63 = vector.broadcast %57 : vector<1x8xf32> to vector<16x8xf32>
    %64 = arith.addf %53, %63 : vector<16x8xf32>
    %65 = vector.shape_cast %64 : vector<16x8xf32> to vector<16x1x8xf32>
    %66 = vector.broadcast %65 : vector<16x1x8xf32> to vector<16x16x8xf32>
    %67 = arith.mulf %66, %59 : vector<16x16x8xf32>
    %cst_49 = arith.constant dense<0.000000e+00> : vector<16x16xf32>
    %68 = vector.multi_reduction <add>, %67, %cst_49 [2] : vector<16x16x8xf32> to vector<16x16xf32>
    %69 = arith.addf %62, %68 : vector<16x16xf32>
    %cst_50 = arith.constant 0.353553385 : f32
    %70 = vector.broadcast %cst_50 : f32 to vector<16x16xf32>
    %71 = arith.mulf %69, %70 : vector<16x16xf32>
    %cst_51 = arith.constant 0.000000e+00 : f32
    %72 = vector.broadcast %cst_51 : f32 to vector<16x16xf32>
    %73 = arith.cmpf ogt, %1, %72 : vector<16x16xf32>
    %cst_52 = arith.constant -9.99999986E+14 : f32
    %74 = vector.broadcast %cst_52 : f32 to vector<16x16xf32>
    %75 = arith.select %73, %71, %74 : vector<16x16xi1>, vector<16x16xf32>
    %cst_53 = arith.constant dense<0xFF800000> : vector<16xf32>
    %76 = vector.multi_reduction <maximumf>, %75, %cst_53 [1] : vector<16x16xf32> to vector<16xf32>
    %77 = vector.shape_cast %76 : vector<16xf32> to vector<16x1xf32>
    %78 = vector.broadcast %77 : vector<16x1xf32> to vector<16x16xf32>
    %79 = arith.subf %75, %78 : vector<16x16xf32>
    %80 = math.exp %79 : vector<16x16xf32>
    %cst_54 = arith.constant dense<0.000000e+00> : vector<16xf32>
    %81 = vector.multi_reduction <add>, %80, %cst_54 [1] : vector<16x16xf32> to vector<16xf32>
    %82 = vector.shape_cast %81 : vector<16xf32> to vector<16x1xf32>
    %83 = tpu.reciprocal %82 {approx = true} : vector<16x1xf32> -> vector<16x1xf32>
    %84 = vector.broadcast %83 : vector<16x1xf32> to vector<16x16xf32>
    %85 = arith.mulf %80, %84 : vector<16x16xf32>
    %cst_55 = arith.constant dense<0.000000e+00> : vector<16x8xf32>
    %86 = tpu.matmul %85, %53, %cst_55 {dimension_numbers = #tpu.dot_dimension_numbers<[1], [0], [0], [1], [0, 0, 1, 1], [], []>} : vector<16x16xf32>, vector<16x8xf32>, vector<16x8xf32> -> vector<16x8xf32>
    %c2 = arith.constant 2 : index
    %c0_56 = arith.constant 0 : index
    %c0_57 = arith.constant 0 : index
    %87 = vector.load %arg6[%c2, %c0_56, %c0_57] : memref<4x32x8xf32, #tpu.memory_space<vmem>>, vector<1x32x8xf32>
    %88 = vector.shape_cast %87 : vector<1x32x8xf32> to vector<32x8xf32>
    %cst_58 = arith.constant dense<0.000000e+00> : vector<16x8xf32>
    %89 = tpu.matmul %0, %88, %cst_58 {dimension_numbers = #tpu.dot_dimension_numbers<[1], [0], [0], [1], [0, 0, 1, 1], [], []>} : vector<16x32xf32>, vector<32x8xf32>, vector<16x8xf32> -> vector<16x8xf32>
    %c2_59 = arith.constant 2 : index
    %c0_60 = arith.constant 0 : index
    %c0_61 = arith.constant 0 : index
    %90 = vector.load %arg7[%c2_59, %c0_60, %c0_61] : memref<4x1x8xf32, #tpu.memory_space<vmem>>, vector<1x1x8xf32>
    %91 = vector.shape_cast %90 : vector<1x1x8xf32> to vector<1x8xf32>
    %92 = vector.broadcast %91 : vector<1x8xf32> to vector<16x8xf32>
    %93 = arith.addf %89, %92 : vector<16x8xf32>
    %c2_62 = arith.constant 2 : index
    %c0_63 = arith.constant 0 : index
    %c0_64 = arith.constant 0 : index
    %94 = vector.load %arg8[%c2_62, %c0_63, %c0_64] : memref<4x1x8xf32, #tpu.memory_space<vmem>>, vector<1x1x8xf32>
    %95 = vector.shape_cast %94 : vector<1x1x8xf32> to vector<1x8xf32>
    %c2_65 = arith.constant 2 : index
    %c0_66 = arith.constant 0 : index
    %c0_67 = arith.constant 0 : index
    %96 = vector.load %arg9[%c2_65, %c0_66, %c0_67] : memref<4x1x8xf32, #tpu.memory_space<vmem>>, vector<1x1x8xf32>
    %97 = vector.shape_cast %96 : vector<1x1x8xf32> to vector<1x8xf32>
    %c2_68 = arith.constant 2 : index
    %c0_69 = arith.constant 0 : index
    %c0_70 = arith.constant 0 : index
    %c0_71 = arith.constant 0 : index
    %98 = vector.load %arg1[%c2_68, %c0_69, %c0_70, %c0_71] : memref<4x16x16x8xf32, #tpu.memory_space<vmem>>, vector<1x16x16x8xf32>
    %99 = vector.shape_cast %98 : vector<1x16x16x8xf32> to vector<16x16x8xf32>
    %100 = vector.broadcast %95 : vector<1x8xf32> to vector<16x8xf32>
    %101 = arith.addf %93, %100 : vector<16x8xf32>
    %cst_72 = arith.constant dense<0.000000e+00> : vector<16x16xf32>
    %102 = tpu.matmul %101, %93, %cst_72 {dimension_numbers = #tpu.dot_dimension_numbers<[1], [1], [0], [0], [0, 0, 1, 0], [], []>} : vector<16x8xf32>, vector<16x8xf32>, vector<16x16xf32> -> vector<16x16xf32>
    %103 = vector.broadcast %97 : vector<1x8xf32> to vector<16x8xf32>
    %104 = arith.addf %93, %103 : vector<16x8xf32>
    %105 = vector.shape_cast %104 : vector<16x8xf32> to vector<16x1x8xf32>
    %106 = vector.broadcast %105 : vector<16x1x8xf32> to vector<16x16x8xf32>
    %107 = arith.mulf %106, %99 : vector<16x16x8xf32>
    %cst_73 = arith.constant dense<0.000000e+00> : vector<16x16xf32>
    %108 = vector.multi_reduction <add>, %107, %cst_73 [2] : vector<16x16x8xf32> to vector<16x16xf32>
    %109 = arith.addf %102, %108 : vector<16x16xf32>
    %cst_74 = arith.constant 0.353553385 : f32
    %110 = vector.broadcast %cst_74 : f32 to vector<16x16xf32>
    %111 = arith.mulf %109, %110 : vector<16x16xf32>
    %cst_75 = arith.constant 0.000000e+00 : f32
    %112 = vector.broadcast %cst_75 : f32 to vector<16x16xf32>
    %113 = arith.cmpf ogt, %1, %112 : vector<16x16xf32>
    %cst_76 = arith.constant -9.99999986E+14 : f32
    %114 = vector.broadcast %cst_76 : f32 to vector<16x16xf32>
    %115 = arith.select %113, %111, %114 : vector<16x16xi1>, vector<16x16xf32>
    %cst_77 = arith.constant dense<0xFF800000> : vector<16xf32>
    %116 = vector.multi_reduction <maximumf>, %115, %cst_77 [1] : vector<16x16xf32> to vector<16xf32>
    %117 = vector.shape_cast %116 : vector<16xf32> to vector<16x1xf32>
    %118 = vector.broadcast %117 : vector<16x1xf32> to vector<16x16xf32>
    %119 = arith.subf %115, %118 : vector<16x16xf32>
    %120 = math.exp %119 : vector<16x16xf32>
    %cst_78 = arith.constant dense<0.000000e+00> : vector<16xf32>
    %121 = vector.multi_reduction <add>, %120, %cst_78 [1] : vector<16x16xf32> to vector<16xf32>
    %122 = vector.shape_cast %121 : vector<16xf32> to vector<16x1xf32>
    %123 = tpu.reciprocal %122 {approx = true} : vector<16x1xf32> -> vector<16x1xf32>
    %124 = vector.broadcast %123 : vector<16x1xf32> to vector<16x16xf32>
    %125 = arith.mulf %120, %124 : vector<16x16xf32>
    %cst_79 = arith.constant dense<0.000000e+00> : vector<16x8xf32>
    %126 = tpu.matmul %125, %93, %cst_79 {dimension_numbers = #tpu.dot_dimension_numbers<[1], [0], [0], [1], [0, 0, 1, 1], [], []>} : vector<16x16xf32>, vector<16x8xf32>, vector<16x8xf32> -> vector<16x8xf32>
    %c3 = arith.constant 3 : index
    %c0_80 = arith.constant 0 : index
    %c0_81 = arith.constant 0 : index
    %127 = vector.load %arg6[%c3, %c0_80, %c0_81] : memref<4x32x8xf32, #tpu.memory_space<vmem>>, vector<1x32x8xf32>
    %128 = vector.shape_cast %127 : vector<1x32x8xf32> to vector<32x8xf32>
    %cst_82 = arith.constant dense<0.000000e+00> : vector<16x8xf32>
    %129 = tpu.matmul %0, %128, %cst_82 {dimension_numbers = #tpu.dot_dimension_numbers<[1], [0], [0], [1], [0, 0, 1, 1], [], []>} : vector<16x32xf32>, vector<32x8xf32>, vector<16x8xf32> -> vector<16x8xf32>
    %c3_83 = arith.constant 3 : index
    %c0_84 = arith.constant 0 : index
    %c0_85 = arith.constant 0 : index
    %130 = vector.load %arg7[%c3_83, %c0_84, %c0_85] : memref<4x1x8xf32, #tpu.memory_space<vmem>>, vector<1x1x8xf32>
    %131 = vector.shape_cast %130 : vector<1x1x8xf32> to vector<1x8xf32>
    %132 = vector.broadcast %131 : vector<1x8xf32> to vector<16x8xf32>
    %133 = arith.addf %129, %132 : vector<16x8xf32>
    %c3_86 = arith.constant 3 : index
    %c0_87 = arith.constant 0 : index
    %c0_88 = arith.constant 0 : index
    %134 = vector.load %arg8[%c3_86, %c0_87, %c0_88] : memref<4x1x8xf32, #tpu.memory_space<vmem>>, vector<1x1x8xf32>
    %135 = vector.shape_cast %134 : vector<1x1x8xf32> to vector<1x8xf32>
    %c3_89 = arith.constant 3 : index
    %c0_90 = arith.constant 0 : index
    %c0_91 = arith.constant 0 : index
    %136 = vector.load %arg9[%c3_89, %c0_90, %c0_91] : memref<4x1x8xf32, #tpu.memory_space<vmem>>, vector<1x1x8xf32>
    %137 = vector.shape_cast %136 : vector<1x1x8xf32> to vector<1x8xf32>
    %c3_92 = arith.constant 3 : index
    %c0_93 = arith.constant 0 : index
    %c0_94 = arith.constant 0 : index
    %c0_95 = arith.constant 0 : index
    %138 = vector.load %arg1[%c3_92, %c0_93, %c0_94, %c0_95] : memref<4x16x16x8xf32, #tpu.memory_space<vmem>>, vector<1x16x16x8xf32>
    %139 = vector.shape_cast %138 : vector<1x16x16x8xf32> to vector<16x16x8xf32>
    %140 = vector.broadcast %135 : vector<1x8xf32> to vector<16x8xf32>
    %141 = arith.addf %133, %140 : vector<16x8xf32>
    %cst_96 = arith.constant dense<0.000000e+00> : vector<16x16xf32>
    %142 = tpu.matmul %141, %133, %cst_96 {dimension_numbers = #tpu.dot_dimension_numbers<[1], [1], [0], [0], [0, 0, 1, 0], [], []>} : vector<16x8xf32>, vector<16x8xf32>, vector<16x16xf32> -> vector<16x16xf32>
    %143 = vector.broadcast %137 : vector<1x8xf32> to vector<16x8xf32>
    %144 = arith.addf %133, %143 : vector<16x8xf32>
    %145 = vector.shape_cast %144 : vector<16x8xf32> to vector<16x1x8xf32>
    %146 = vector.broadcast %145 : vector<16x1x8xf32> to vector<16x16x8xf32>
    %147 = arith.mulf %146, %139 : vector<16x16x8xf32>
    %cst_97 = arith.constant dense<0.000000e+00> : vector<16x16xf32>
    %148 = vector.multi_reduction <add>, %147, %cst_97 [2] : vector<16x16x8xf32> to vector<16x16xf32>
    %149 = arith.addf %142, %148 : vector<16x16xf32>
    %cst_98 = arith.constant 0.353553385 : f32
    %150 = vector.broadcast %cst_98 : f32 to vector<16x16xf32>
    %151 = arith.mulf %149, %150 : vector<16x16xf32>
    %cst_99 = arith.constant 0.000000e+00 : f32
    %152 = vector.broadcast %cst_99 : f32 to vector<16x16xf32>
    %153 = arith.cmpf ogt, %1, %152 : vector<16x16xf32>
    %cst_100 = arith.constant -9.99999986E+14 : f32
    %154 = vector.broadcast %cst_100 : f32 to vector<16x16xf32>
    %155 = arith.select %153, %151, %154 : vector<16x16xi1>, vector<16x16xf32>
    %cst_101 = arith.constant dense<0xFF800000> : vector<16xf32>
    %156 = vector.multi_reduction <maximumf>, %155, %cst_101 [1] : vector<16x16xf32> to vector<16xf32>
    %157 = vector.shape_cast %156 : vector<16xf32> to vector<16x1xf32>
    %158 = vector.broadcast %157 : vector<16x1xf32> to vector<16x16xf32>
    %159 = arith.subf %155, %158 : vector<16x16xf32>
    %160 = math.exp %159 : vector<16x16xf32>
    %cst_102 = arith.constant dense<0.000000e+00> : vector<16xf32>
    %161 = vector.multi_reduction <add>, %160, %cst_102 [1] : vector<16x16xf32> to vector<16xf32>
    %162 = vector.shape_cast %161 : vector<16xf32> to vector<16x1xf32>
    %163 = tpu.reciprocal %162 {approx = true} : vector<16x1xf32> -> vector<16x1xf32>
    %164 = vector.broadcast %163 : vector<16x1xf32> to vector<16x16xf32>
    %165 = arith.mulf %160, %164 : vector<16x16xf32>
    %cst_103 = arith.constant dense<0.000000e+00> : vector<16x8xf32>
    %166 = tpu.matmul %165, %133, %cst_103 {dimension_numbers = #tpu.dot_dimension_numbers<[1], [0], [0], [1], [0, 0, 1, 1], [], []>} : vector<16x16xf32>, vector<16x8xf32>, vector<16x8xf32> -> vector<16x8xf32>
    %167 = tpu.concatenate %46, %86, %126, %166 in 1 : vector<16x8xf32>, vector<16x8xf32>, vector<16x8xf32>, vector<16x8xf32> -> vector<16x32xf32>
    %168 = arith.addf %6, %167 : vector<16x32xf32>
    %cst_104 = arith.constant dense<0.000000e+00> : vector<16xf32>
    %169 = vector.multi_reduction <add>, %168, %cst_104 [1] : vector<16x32xf32> to vector<16xf32>
    %170 = vector.shape_cast %169 : vector<16xf32> to vector<16x1xf32>
    %cst_105 = arith.constant 3.200000e+01 : f32
    %171 = vector.broadcast %cst_105 : f32 to vector<16x1xf32>
    %172 = arith.divf %170, %171 : vector<16x1xf32>
    %173 = vector.broadcast %172 : vector<16x1xf32> to vector<16x32xf32>
    %174 = arith.subf %168, %173 : vector<16x32xf32>
    %175 = arith.mulf %174, %174 : vector<16x32xf32>
    %cst_106 = arith.constant dense<0.000000e+00> : vector<16xf32>
    %176 = vector.multi_reduction <add>, %175, %cst_106 [1] : vector<16x32xf32> to vector<16xf32>
    %177 = vector.shape_cast %176 : vector<16xf32> to vector<16x1xf32>
    %cst_107 = arith.constant 3.200000e+01 : f32
    %178 = vector.broadcast %cst_107 : f32 to vector<16x1xf32>
    %179 = arith.divf %177, %178 : vector<16x1xf32>
    %180 = vector.broadcast %172 : vector<16x1xf32> to vector<16x32xf32>
    %181 = arith.subf %168, %180 : vector<16x32xf32>
    %cst_108 = arith.constant 9.99999974E-6 : f32
    %182 = vector.broadcast %cst_108 : f32 to vector<16x1xf32>
    %183 = arith.addf %179, %182 : vector<16x1xf32>
    %184 = math.rsqrt %183 : vector<16x1xf32>
    %185 = vector.broadcast %184 : vector<16x1xf32> to vector<16x32xf32>
    %186 = arith.mulf %181, %185 : vector<16x32xf32>
    %c0_109 = arith.constant 0 : index
    %c0_110 = arith.constant 0 : index
    %187 = vector.load %arg10[%c0_109, %c0_110] : memref<1x32xf32, #tpu.memory_space<vmem>>, vector<1x32xf32>
    %188 = vector.broadcast %187 : vector<1x32xf32> to vector<16x32xf32>
    %189 = arith.mulf %186, %188 : vector<16x32xf32>
    %c0_111 = arith.constant 0 : index
    %c0_112 = arith.constant 0 : index
    %190 = vector.load %arg11[%c0_111, %c0_112] : memref<1x32xf32, #tpu.memory_space<vmem>>, vector<1x32xf32>
    %191 = vector.broadcast %190 : vector<1x32xf32> to vector<16x32xf32>
    %192 = arith.addf %189, %191 : vector<16x32xf32>
    %cst_113 = arith.constant 5.000000e-01 : f32
    %193 = vector.broadcast %cst_113 : f32 to vector<16x32xf32>
    %194 = arith.mulf %193, %192 : vector<16x32xf32>
    %cst_114 = arith.constant 0.707106769 : f32
    %195 = vector.broadcast %cst_114 : f32 to vector<16x32xf32>
    %196 = arith.mulf %192, %195 : vector<16x32xf32>
    %cst_115 = arith.constant 0.000000e+00 : f32
    %197 = vector.broadcast %cst_115 : f32 to vector<16x32xf32>
    %198 = arith.cmpf oge, %196, %197 : vector<16x32xf32>
    %cst_116 = arith.constant 1.000000e+00 : f32
    %cst_117 = arith.constant -1.000000e+00 : f32
    %199 = vector.broadcast %cst_116 : f32 to vector<16x32xf32>
    %200 = vector.broadcast %cst_117 : f32 to vector<16x32xf32>
    %201 = arith.select %198, %199, %200 : vector<16x32xi1>, vector<16x32xf32>
    %202 = math.absf %196 : vector<16x32xf32>
    %cst_118 = arith.constant 0.327591091 : f32
    %203 = vector.broadcast %cst_118 : f32 to vector<16x32xf32>
    %204 = arith.mulf %203, %202 : vector<16x32xf32>
    %cst_119 = arith.constant 1.000000e+00 : f32
    %205 = vector.broadcast %cst_119 : f32 to vector<16x32xf32>
    %206 = arith.addf %205, %204 : vector<16x32xf32>
    %cst_120 = arith.constant 1.000000e+00 : f32
    %207 = vector.broadcast %cst_120 : f32 to vector<16x32xf32>
    %208 = arith.divf %207, %206 : vector<16x32xf32>
    %cst_121 = arith.constant 1.06140542 : f32
    %209 = vector.broadcast %cst_121 : f32 to vector<16x32xf32>
    %210 = arith.mulf %209, %208 : vector<16x32xf32>
    %cst_122 = arith.constant -1.45315206 : f32
    %211 = vector.broadcast %cst_122 : f32 to vector<16x32xf32>
    %212 = arith.addf %210, %211 : vector<16x32xf32>
    %213 = arith.mulf %212, %208 : vector<16x32xf32>
    %cst_123 = arith.constant 1.42141378 : f32
    %214 = vector.broadcast %cst_123 : f32 to vector<16x32xf32>
    %215 = arith.addf %213, %214 : vector<16x32xf32>
    %216 = arith.mulf %215, %208 : vector<16x32xf32>
    %cst_124 = arith.constant -0.284496725 : f32
    %217 = vector.broadcast %cst_124 : f32 to vector<16x32xf32>
    %218 = arith.addf %216, %217 : vector<16x32xf32>
    %219 = arith.mulf %218, %208 : vector<16x32xf32>
    %cst_125 = arith.constant 0.254829586 : f32
    %220 = vector.broadcast %cst_125 : f32 to vector<16x32xf32>
    %221 = arith.addf %219, %220 : vector<16x32xf32>
    %222 = arith.mulf %221, %208 : vector<16x32xf32>
    %cst_126 = arith.constant 0.000000e+00 : f32
    %223 = vector.broadcast %cst_126 : f32 to vector<16x32xf32>
    %224 = arith.subf %223, %202 : vector<16x32xf32>
    %225 = arith.mulf %224, %202 : vector<16x32xf32>
    %226 = math.exp %225 : vector<16x32xf32>
    %227 = arith.mulf %222, %226 : vector<16x32xf32>
    %cst_127 = arith.constant 1.000000e+00 : f32
    %228 = vector.broadcast %cst_127 : f32 to vector<16x32xf32>
    %229 = arith.subf %228, %227 : vector<16x32xf32>
    %230 = arith.mulf %201, %229 : vector<16x32xf32>
    %cst_128 = arith.constant 1.000000e+00 : f32
    %231 = vector.broadcast %cst_128 : f32 to vector<16x32xf32>
    %232 = arith.addf %231, %230 : vector<16x32xf32>
    %233 = arith.mulf %194, %232 : vector<16x32xf32>
    %234 = math.tanh %233 : vector<16x32xf32>
    %c0_129 = arith.constant 0 : index
    %c0_130 = arith.constant 0 : index
    %235 = vector.load %arg12[%c0_129, %c0_130] : memref<1x32xf32, #tpu.memory_space<vmem>>, vector<1x32xf32>
    %cst_131 = arith.constant dense<0.000000e+00> : vector<1x16xf32>
    %236 = tpu.matmul %235, %234, %cst_131 {dimension_numbers = #tpu.dot_dimension_numbers<[1], [1], [0], [0], [0, 0, 1, 0], [], []>} : vector<1x32xf32>, vector<16x32xf32>, vector<1x16xf32> -> vector<1x16xf32>
    %c0_132 = arith.constant 0 : index
    %c0_133 = arith.constant 0 : index
    %237 = vector.load %arg3[%c0_132, %c0_133] : memref<2x16xf32, #tpu.memory_space<vmem>>, vector<2x16xf32>
    %cst_134 = arith.constant 0.000000e+00 : f32
    %238 = vector.broadcast %cst_134 : f32 to vector<2x16xf32>
    %239 = arith.cmpf ogt, %237, %238 : vector<2x16xf32>
    %cst_135 = arith.constant 0xFF800000 : f32
    %240 = vector.shape_cast %236 : vector<1x16xf32> to vector<1x16xf32>
    %241 = vector.broadcast %240 : vector<1x16xf32> to vector<2x16xf32>
    %242 = vector.broadcast %cst_135 : f32 to vector<2x16xf32>
    %243 = arith.select %239, %241, %242 : vector<2x16xi1>, vector<2x16xf32>
    %cst_136 = arith.constant dense<0xFF800000> : vector<2xf32>
    %244 = vector.multi_reduction <maximumf>, %243, %cst_136 [1] : vector<2x16xf32> to vector<2xf32>
    %245 = vector.shape_cast %244 : vector<2xf32> to vector<2x1xf32>
    %246 = vector.broadcast %245 : vector<2x1xf32> to vector<2x16xf32>
    %247 = arith.subf %243, %246 : vector<2x16xf32>
    %248 = math.exp %247 : vector<2x16xf32>
    %cst_137 = arith.constant dense<0.000000e+00> : vector<2xf32>
    %249 = vector.multi_reduction <add>, %248, %cst_137 [1] : vector<2x16xf32> to vector<2xf32>
    %250 = vector.shape_cast %249 : vector<2xf32> to vector<2x1xf32>
    %251 = tpu.reciprocal %250 {approx = true} : vector<2x1xf32> -> vector<2x1xf32>
    %252 = vector.broadcast %251 : vector<2x1xf32> to vector<2x16xf32>
    %253 = arith.mulf %248, %252 : vector<2x16xf32>
    %cst_138 = arith.constant dense<0.000000e+00> : vector<2x32xf32>
    %254 = tpu.matmul %253, %233, %cst_138 {dimension_numbers = #tpu.dot_dimension_numbers<[1], [0], [0], [1], [0, 0, 1, 1], [], []>} : vector<2x16xf32>, vector<16x32xf32>, vector<2x32xf32> -> vector<2x32xf32>
    %255 = math.tanh %254 : vector<2x32xf32>
    %c0_139 = arith.constant 0 : index
    %c0_140 = arith.constant 0 : index
    %256 = vector.load %arg13[%c0_139, %c0_140] : memref<32x5xf32, #tpu.memory_space<vmem>>, vector<32x5xf32>
    %cst_141 = arith.constant dense<0.000000e+00> : vector<2x5xf32>
    %257 = tpu.matmul %255, %256, %cst_141 {dimension_numbers = #tpu.dot_dimension_numbers<[1], [0], [0], [1], [0, 0, 1, 1], [], []>} : vector<2x32xf32>, vector<32x5xf32>, vector<2x5xf32> -> vector<2x5xf32>
    %c0_142 = arith.constant 0 : index
    %c0_143 = arith.constant 0 : index
    %258 = vector.load %arg14[%c0_142, %c0_143] : memref<1x5xf32, #tpu.memory_space<vmem>>, vector<1x5xf32>
    %259 = vector.broadcast %258 : vector<1x5xf32> to vector<2x5xf32>
    %260 = arith.addf %257, %259 : vector<2x5xf32>
    %c0_144 = arith.constant 0 : index
    %c0_145 = arith.constant 0 : index
    %261 = vector.load %arg15[%c0_144, %c0_145] : memref<2x5xf32, #tpu.memory_space<vmem>>, vector<2x5xf32>
    tpu.vector_store %arg15[%c0_144, %c0_145], %260 {strides = array<i32>} : memref<2x5xf32, #tpu.memory_space<vmem>>, vector<2x5xf32>,
    return
  }
}

</mosaic_0001>

<bundles_post_ra>
// kernel: tile.9
= control target key start
LH: loop header
LB: loop body
LE: loop exit
PB: predicated region body
PF: predicated region fallthrough
CT: control target
= control target key end

     0   :  { %vm3_vm0 = vcmask 64512   ;;  %s3255_s12 = smov 120   ;;  %s3257_s15 = smov 104   ;;  %s4711_s0 = inlined_call_operand.vmem [shape: f32[2,8,2,8,32], index: 0, kind: input, shape index: {}]   ;;  %s4712_s1 = inlined_call_operand.vmem [shape: f32[16,16,4,8], index: 1, kind: output, shape index: {}]  }
   0x1   :  { %v3271_v0 = vld [vmem:[%s4711_s0 + $0x10] sm:$0xff]   ;;  %v3276_v1 = vld [vmem:[%s4711_s0] sm:$0xff]   ;;  %v3281_v2 = vld [vmem:[%s4711_s0 + $0x18] sm:$0xff]  }
   0x2   :  { %242 = vrot.lane.b32.xlu1 %v3271_v0, %s3255_s12  ;;  %224 = vrot.lane.b32.xlu0 %v3276_v1, %s3255_s12  ;;  %v3290_v3 = vld [vmem:[%s4711_s0 + $0x8] sm:$0xff]   ;;  %17 = vst.msk [vmem:[#allocation0 + $0x80] ss:$8 sm:$0xf] %vm3_vm0, %v3271_v0   ;;  %v3312_v5 = vld [vmem:[%s4711_s0 + $0x20] sm:$0xff]  }
   0x3   :  { %v3295_v4 = vld [vmem:[%s4711_s0 + $0x28] sm:$0xff]   ;;  %19 = vst.msk [vmem:[#allocation0 + $0x80] ss:$8 sm:$0xf0] %vm3_vm0, %v3271_v0   ;;  %v3317_v6 = vld [vmem:[%s4711_s0 + $0x38] sm:$0xff]   ;;  %v3322_v7 = vld [vmem:[%s4711_s0 + $0x30] sm:$0xff]  }
   0x4   :  { %4 = vst.msk [vmem:[#allocation0] ss:$8 sm:$0xf] %vm3_vm0, %v3276_v1   ;;  %5 = vst.msk [vmem:[#allocation0] ss:$8 sm:$0xf0] %vm3_vm0, %v3276_v1  }
   0x5   :  { %24 = vst.msk [vmem:[#allocation0 + $0xc0] ss:$8 sm:$0xf] %vm3_vm0, %v3281_v2   ;;  %26 = vst.msk [vmem:[#allocation0 + $0xc0] ss:$8 sm:$0xf0] %vm3_vm0, %v3281_v2  }
   0x6   :  { %12 = vst.msk [vmem:[#allocation0 + $0x40] ss:$8 sm:$0xf0] %vm3_vm0, %v3290_v3   ;;  %10 = vst.msk [vmem:[#allocation0 + $0x40] ss:$8 sm:$0xf] %vm3_vm0, %v3290_v3   ;;  %251 = vrot.lane.b32.xlu1 %v3281_v2, %s3255_s12  ;;  %233 = vrot.lane.b32.xlu0 %v3290_v3, %s3255_s12 }
   0x7   :  { %40 = vst.msk [vmem:[#allocation0 + $0x140] ss:$8 sm:$0xf0] %vm3_vm0, %v3295_v4   ;;  %38 = vst.msk [vmem:[#allocation0 + $0x140] ss:$8 sm:$0xf] %vm3_vm0, %v3295_v4  }
   0x8   :  { %v3335_v8 = vld [vmem:[%s4711_s0 + $0x48] sm:$0xff]   ;;  %v3340_v9 = vld [vmem:[%s4711_s0 + $0x40] sm:$0xff]   ;;  %v3345_v10 = vld [vmem:[%s4711_s0 + $0x58] sm:$0xff]   ;;  %31 = vst.msk [vmem:[#allocation0 + $0x100] ss:$8 sm:$0xf] %vm3_vm0, %v3312_v5  }
   0x9   :  { %33 = vst.msk [vmem:[#allocation0 + $0x100] ss:$8 sm:$0xf0] %vm3_vm0, %v3312_v5   ;;  %52 = vst.msk [vmem:[#allocation0 + $0x1c0] ss:$8 sm:$0xf] %vm3_vm0, %v3317_v6  }
   0xa   :  { %54 = vst.msk [vmem:[#allocation0 + $0x1c0] ss:$8 sm:$0xf0] %vm3_vm0, %v3317_v6   ;;  %45 = vst.msk [vmem:[#allocation0 + $0x180] ss:$8 sm:$0xf] %vm3_vm0, %v3322_v7   ;;  %269 = vrot.lane.b32.xlu1 %v3295_v4, %s3255_s12  ;;  %260 = vrot.lane.b32.xlu0 %v3312_v5, %s3255_s12 }
   0xb   :  { %47 = vst.msk [vmem:[#allocation0 + $0x180] ss:$8 sm:$0xf0] %vm3_vm0, %v3322_v7   ;;  %v3362_v11 = vld [vmem:[%s4711_s0 + $0x50] sm:$0xff]   ;;  %v3367_v12 = vld [vmem:[%s4711_s0 + $0x68] sm:$0xff]   ;;  %v3372_v13 = vld [vmem:[%s4711_s0 + $0x60] sm:$0xff]  }
   0xc   :  { %66 = vst.msk [vmem:[#allocation0 + $0x240] ss:$8 sm:$0xf] %vm3_vm0, %v3335_v8   ;;  %68 = vst.msk [vmem:[#allocation0 + $0x240] ss:$8 sm:$0xf0] %vm3_vm0, %v3335_v8  }
   0xd   :  { %59 = vst.msk [vmem:[#allocation0 + $0x200] ss:$8 sm:$0xf] %vm3_vm0, %v3340_v9   ;;  %61 = vst.msk [vmem:[#allocation0 + $0x200] ss:$8 sm:$0xf0] %vm3_vm0, %v3340_v9  }
   0xe   :  { %80 = vst.msk [vmem:[#allocation0 + $0x2c0] ss:$8 sm:$0xf] %vm3_vm0, %v3345_v10   ;;  %82 = vst.msk [vmem:[#allocation0 + $0x2c0] ss:$8 sm:$0xf0] %vm3_vm0, %v3345_v10   ;;  %287 = vrot.lane.b32.xlu1 %v3317_v6, %s3255_s12  ;;  %278 = vrot.lane.b32.xlu0 %v3322_v7, %s3255_s12 }
   0xf   :  { %v3393_v14 = vld [vmem:[%s4711_s0 + $0x78] sm:$0xff]   ;;  %v3398_v15 = vld [vmem:[%s4711_s0 + $0x70] sm:$0xff]   ;;  %73 = vst.msk [vmem:[#allocation0 + $0x280] ss:$8 sm:$0xf] %vm3_vm0, %v3362_v11   ;;  %v3415_v16 = vld [vmem:[%s4711_s0 + $0x88] sm:$0xff]  }
  0x10   :  { %75 = vst.msk [vmem:[#allocation0 + $0x280] ss:$8 sm:$0xf0] %vm3_vm0, %v3362_v11   ;;  %94 = vst.msk [vmem:[#allocation0 + $0x340] ss:$8 sm:$0xf] %vm3_vm0, %v3367_v12  }
  0x11   :  { %96 = vst.msk [vmem:[#allocation0 + $0x340] ss:$8 sm:$0xf0] %vm3_vm0, %v3367_v12   ;;  %87 = vst.msk [vmem:[#allocation0 + $0x300] ss:$8 sm:$0xf] %vm3_vm0, %v3372_v13  }
  0x12   :  { %89 = vst.msk [vmem:[#allocation0 + $0x300] ss:$8 sm:$0xf0] %vm3_vm0, %v3372_v13   ;;  %v3420_v17 = vld [vmem:[%s4711_s0 + $0x80] sm:$0xff]   ;;  %v3425_v18 = vld [vmem:[%s4711_s0 + $0x98] sm:$0xff]   ;;  %v3438_v19 = vld [vmem:[%s4711_s0 + $0x90] sm:$0xff]   ;;  %305 = vrot.lane.b32.xlu1 %v3335_v8, %s3255_s12 }
  0x13   :  { %108 = vst.msk [vmem:[#allocation0 + $0x3c0] ss:$8 sm:$0xf] %vm3_vm0, %v3393_v14   ;;  %110 = vst.msk [vmem:[#allocation0 + $0x3c0] ss:$8 sm:$0xf0] %vm3_vm0, %v3393_v14   ;;  %296 = vrot.lane.b32.xlu0 %v3340_v9, %s3255_s12 }
  0x14   :  { %101 = vst.msk [vmem:[#allocation0 + $0x380] ss:$8 sm:$0xf] %vm3_vm0, %v3398_v15   ;;  %103 = vst.msk [vmem:[#allocation0 + $0x380] ss:$8 sm:$0xf0] %vm3_vm0, %v3398_v15  }
  0x15   :  { %v3443_v20 = vld [vmem:[%s4711_s0 + $0xa8] sm:$0xff]   ;;  %v3448_v21 = vld [vmem:[%s4711_s0 + $0xa0] sm:$0xff]   ;;  %122 = vst.msk [vmem:[#allocation0 + $0x440] ss:$8 sm:$0xf] %vm3_vm0, %v3415_v16   ;;  %v3465_v22 = vld [vmem:[%s4711_s0 + $0xb8] sm:$0xff]  }
  0x16   :  { %124 = vst.msk [vmem:[#allocation0 + $0x440] ss:$8 sm:$0xf0] %vm3_vm0, %v3415_v16   ;;  %115 = vst.msk [vmem:[#allocation0 + $0x400] ss:$8 sm:$0xf] %vm3_vm0, %v3420_v17   ;;  %323 = vrot.lane.b32.xlu1 %v3345_v10, %s3255_s12 }
  0x17   :  { %117 = vst.msk [vmem:[#allocation0 + $0x400] ss:$8 sm:$0xf0] %vm3_vm0, %v3420_v17   ;;  %136 = vst.msk [vmem:[#allocation0 + $0x4c0] ss:$8 sm:$0xf] %vm3_vm0, %v3425_v18   ;;  %314 = vrot.lane.b32.xlu0 %v3362_v11, %s3255_s12 }
  0x18   :  { %138 = vst.msk [vmem:[#allocation0 + $0x4c0] ss:$8 sm:$0xf0] %vm3_vm0, %v3425_v18   ;;  %v3470_v23 = vld [vmem:[%s4711_s0 + $0xb0] sm:$0xff]   ;;  %v3475_v24 = vld [vmem:[%s4711_s0 + $0xc8] sm:$0xff]   ;;  %v3496_v25 = vld [vmem:[%s4711_s0 + $0xc0] sm:$0xff]  }
  0x19   :  { %129 = vst.msk [vmem:[#allocation0 + $0x480] ss:$8 sm:$0xf] %vm3_vm0, %v3438_v19   ;;  %131 = vst.msk [vmem:[#allocation0 + $0x480] ss:$8 sm:$0xf0] %vm3_vm0, %v3438_v19  }
  0x1a   :  { %150 = vst.msk [vmem:[#allocation0 + $0x540] ss:$8 sm:$0xf] %vm3_vm0, %v3443_v20   ;;  %152 = vst.msk [vmem:[#allocation0 + $0x540] ss:$8 sm:$0xf0] %vm3_vm0, %v3443_v20   ;;  %341 = vrot.lane.b32.xlu1 %v3367_v12, %s3255_s12 }
  0x1b   :  { %143 = vst.msk [vmem:[#allocation0 + $0x500] ss:$8 sm:$0xf] %vm3_vm0, %v3448_v21   ;;  %145 = vst.msk [vmem:[#allocation0 + $0x500] ss:$8 sm:$0xf0] %vm3_vm0, %v3448_v21   ;;  %332 = vrot.lane.b32.xlu0 %v3372_v13, %s3255_s12 }
  0x1c   :  { %v3501_v26 = vld [vmem:[%s4711_s0 + $0xd8] sm:$0xff]   ;;  %166 = vst.msk [vmem:[#allocation0 + $0x5c0] ss:$8 sm:$0xf0] %vm3_vm0, %v3465_v22   ;;  %v3518_v27 = vld [vmem:[%s4711_s0 + $0xd0] sm:$0xff]   ;;  %v3523_v28 = vld [vmem:[%s4711_s0 + $0xe8] sm:$0xff]  }
  0x1d   :  { %164 = vst.msk [vmem:[#allocation0 + $0x5c0] ss:$8 sm:$0xf] %vm3_vm0, %v3465_v22   ;;  %159 = vst.msk [vmem:[#allocation0 + $0x580] ss:$8 sm:$0xf0] %vm3_vm0, %v3470_v23  }
  0x1e   :  { %157 = vst.msk [vmem:[#allocation0 + $0x580] ss:$8 sm:$0xf] %vm3_vm0, %v3470_v23   ;;  %180 = vst.msk [vmem:[#allocation0 + $0x640] ss:$8 sm:$0xf0] %vm3_vm0, %v3475_v24   ;;  %359 = vrot.lane.b32.xlu1 %v3393_v14, %s3255_s12 }
  0x1f   :  { %178 = vst.msk [vmem:[#allocation0 + $0x640] ss:$8 sm:$0xf] %vm3_vm0, %v3475_v24   ;;  %173 = vst.msk [vmem:[#allocation0 + $0x600] ss:$8 sm:$0xf0] %vm3_vm0, %v3496_v25   ;;  %350 = vrot.lane.b32.xlu0 %v3398_v15, %s3255_s12 }
  0x20   :  { %171 = vst.msk [vmem:[#allocation0 + $0x600] ss:$8 sm:$0xf] %vm3_vm0, %v3496_v25   ;;  %194 = vst.msk [vmem:[#allocation0 + $0x6c0] ss:$8 sm:$0xf0] %vm3_vm0, %v3501_v26  }
  0x21   :  { %192 = vst.msk [vmem:[#allocation0 + $0x6c0] ss:$8 sm:$0xf] %vm3_vm0, %v3501_v26   ;;  %187 = vst.msk [vmem:[#allocation0 + $0x680] ss:$8 sm:$0xf0] %vm3_vm0, %v3518_v27  }
  0x22   :  { %185 = vst.msk [vmem:[#allocation0 + $0x680] ss:$8 sm:$0xf] %vm3_vm0, %v3518_v27   ;;  %208 = vst.msk [vmem:[#allocation0 + $0x740] ss:$8 sm:$0xf0] %vm3_vm0, %v3523_v28   ;;  %377 = vrot.lane.b32.xlu1 %v3415_v16, %s3255_s12 }
  0x23   :  { %206 = vst.msk [vmem:[#allocation0 + $0x740] ss:$8 sm:$0xf] %vm3_vm0, %v3523_v28   ;;  %368 = vrot.lane.b32.xlu0 %v3420_v17, %s3255_s12  ;;  %v3588_v29 = vld [vmem:[%s4711_s0 + $0xe0] sm:$0xff]   ;;  %v3597_v30 = vld [vmem:[%s4711_s0 + $0xf8] sm:$0xff]   ;;  %v3602_v31 = vld [vmem:[%s4711_s0 + $0xf0] sm:$0xff]  }
  0x26   :  { %395 = vrot.lane.b32.xlu1 %v3425_v18, %s3255_s12 }
  0x27   :  { %386 = vrot.lane.b32.xlu0 %v3438_v19, %s3255_s12 }
  0x2a   :  { %413 = vrot.lane.b32.xlu1 %v3443_v20, %s3255_s12 }
  0x2b   :  { %404 = vrot.lane.b32.xlu0 %v3448_v21, %s3255_s12 }
  0x2e   :  { %431 = vrot.lane.b32.xlu1 %v3465_v22, %s3255_s12 }
  0x2f   :  { %422 = vrot.lane.b32.xlu0 %v3470_v23, %s3255_s12 }
  0x32   :  { %449 = vrot.lane.b32.xlu1 %v3475_v24, %s3255_s12 }
  0x33   :  { %440 = vrot.lane.b32.xlu0 %v3496_v25, %s3255_s12 }
  0x36   :  { %467 = vrot.lane.b32.xlu1 %v3501_v26, %s3255_s12 }
  0x37   :  { %458 = vrot.lane.b32.xlu0 %v3518_v27, %s3255_s12 }
  0x3a   :  { %485 = vrot.lane.b32.xlu1 %v3523_v28, %s3255_s12 }
  0x3b   :  { %476 = vrot.lane.b32.xlu0 %v3588_v29, %s3255_s12 }
  0x3e   :  { %503 = vrot.lane.b32.xlu1 %v3597_v30, %s3255_s12 }
  0x3f   :  { %494 = vrot.lane.b32.xlu0 %v3602_v31, %s3255_s12  ;;  %s3256_s12 = smov 112  }
  0x42   :  { %520 = vrot.lane.b32.xlu1 %v3290_v3, %s3256_s12 }
  0x43   :  { %511 = vrot.lane.b32.xlu0 %v3276_v1, %s3256_s12 }
  0x46   :  { %538 = vrot.lane.b32.xlu1 %v3281_v2, %s3256_s12 }
  0x47   :  { %529 = vrot.lane.b32.xlu0 %v3271_v0, %s3256_s12 }
  0x4a   :  { %556 = vrot.lane.b32.xlu1 %v3295_v4, %s3256_s12 }
  0x4b   :  { %547 = vrot.lane.b32.xlu0 %v3312_v5, %s3256_s12 }
  0x4e   :  { %574 = vrot.lane.b32.xlu1 %v3317_v6, %s3256_s12 }
  0x4f   :  { %565 = vrot.lane.b32.xlu0 %v3322_v7, %s3256_s12 }
  0x52   :  { %592 = vrot.lane.b32.xlu1 %v3335_v8, %s3256_s12 }
  0x53   :  { %583 = vrot.lane.b32.xlu0 %v3340_v9, %s3256_s12 }
  0x56   :  { %610 = vrot.lane.b32.xlu1 %v3345_v10, %s3256_s12 }
  0x57   :  { %601 = vrot.lane.b32.xlu0 %v3362_v11, %s3256_s12 }
  0x5a   :  { %628 = vrot.lane.b32.xlu1 %v3367_v12, %s3256_s12 }
  0x5b   :  { %619 = vrot.lane.b32.xlu0 %v3372_v13, %s3256_s12 }
  0x5e   :  { %646 = vrot.lane.b32.xlu1 %v3393_v14, %s3256_s12 }
  0x5f   :  { %637 = vrot.lane.b32.xlu0 %v3398_v15, %s3256_s12 }
  0x62   :  { %664 = vrot.lane.b32.xlu1 %v3415_v16, %s3256_s12 }
  0x63   :  { %655 = vrot.lane.b32.xlu0 %v3420_v17, %s3256_s12 }
  0x66   :  { %682 = vrot.lane.b32.xlu1 %v3425_v18, %s3256_s12 }
  0x67   :  { %673 = vrot.lane.b32.xlu0 %v3438_v19, %s3256_s12 }
  0x6a   :  { %700 = vrot.lane.b32.xlu1 %v3443_v20, %s3256_s12 }
  0x6b   :  { %691 = vrot.lane.b32.xlu0 %v3448_v21, %s3256_s12 }
  0x6e   :  { %718 = vrot.lane.b32.xlu1 %v3465_v22, %s3256_s12 }
  0x6f   :  { %709 = vrot.lane.b32.xlu0 %v3470_v23, %s3256_s12 }
  0x72   :  { %736 = vrot.lane.b32.xlu1 %v3475_v24, %s3256_s12 }
  0x73   :  { %727 = vrot.lane.b32.xlu0 %v3496_v25, %s3256_s12 }
  0x74   :  { %v243_v32 = vpop.permute.xlu1 %242   ;;  %v225_v33 = vpop.permute.xlu0 %224  }
  0x75   :  { %246 = vst.msk [vmem:[#allocation0 + $0x81] ss:$8 sm:$0xf] %vm3_vm0, %v243_v32   ;;  %248 = vst.msk [vmem:[#allocation0 + $0x81] ss:$8 sm:$0xf0] %vm3_vm0, %v243_v32  }
  0x76   :  { %228 = vst.msk [vmem:[#allocation0 + $0x1] ss:$8 sm:$0xf] %vm3_vm0, %v225_v33   ;;  %230 = vst.msk [vmem:[#allocation0 + $0x1] ss:$8 sm:$0xf0] %vm3_vm0, %v225_v33   ;;  %754 = vrot.lane.b32.xlu1 %v3501_v26, %s3256_s12 }
  0x77   :  { %745 = vrot.lane.b32.xlu0 %v3518_v27, %s3256_s12 }
  0x78   :  { %v252_v34 = vpop.permute.xlu1 %251   ;;  %v234_v35 = vpop.permute.xlu0 %233  }
  0x79   :  { %255 = vst.msk [vmem:[#allocation0 + $0xc1] ss:$8 sm:$0xf] %vm3_vm0, %v252_v34   ;;  %257 = vst.msk [vmem:[#allocation0 + $0xc1] ss:$8 sm:$0xf0] %vm3_vm0, %v252_v34  }
  0x7a   :  { %237 = vst.msk [vmem:[#allocation0 + $0x41] ss:$8 sm:$0xf] %vm3_vm0, %v234_v35   ;;  %239 = vst.msk [vmem:[#allocation0 + $0x41] ss:$8 sm:$0xf0] %vm3_vm0, %v234_v35   ;;  %772 = vrot.lane.b32.xlu1 %v3523_v28, %s3256_s12 }
  0x7b   :  { %763 = vrot.lane.b32.xlu0 %v3588_v29, %s3256_s12 }
  0x7c   :  { %v270_v36 = vpop.permute.xlu1 %269   ;;  %v261_v37 = vpop.permute.xlu0 %260  }
  0x7d   :  { %273 = vst.msk [vmem:[#allocation0 + $0x141] ss:$8 sm:$0xf] %vm3_vm0, %v270_v36   ;;  %275 = vst.msk [vmem:[#allocation0 + $0x141] ss:$8 sm:$0xf0] %vm3_vm0, %v270_v36  }
  0x7e   :  { %264 = vst.msk [vmem:[#allocation0 + $0x101] ss:$8 sm:$0xf] %vm3_vm0, %v261_v37   ;;  %266 = vst.msk [vmem:[#allocation0 + $0x101] ss:$8 sm:$0xf0] %vm3_vm0, %v261_v37   ;;  %790 = vrot.lane.b32.xlu1 %v3597_v30, %s3256_s12 }
  0x7f   :  { %781 = vrot.lane.b32.xlu0 %v3602_v31, %s3256_s12 }
  0x80   :  { %v288_v38 = vpop.permute.xlu1 %287   ;;  %v279_v39 = vpop.permute.xlu0 %278  }
  0x81   :  { %291 = vst.msk [vmem:[#allocation0 + $0x1c1] ss:$8 sm:$0xf] %vm3_vm0, %v288_v38   ;;  %293 = vst.msk [vmem:[#allocation0 + $0x1c1] ss:$8 sm:$0xf0] %vm3_vm0, %v288_v38  }
  0x82   :  { %282 = vst.msk [vmem:[#allocation0 + $0x181] ss:$8 sm:$0xf] %vm3_vm0, %v279_v39   ;;  %284 = vst.msk [vmem:[#allocation0 + $0x181] ss:$8 sm:$0xf0] %vm3_vm0, %v279_v39   ;;  %807 = vrot.lane.b32.xlu1 %v3290_v3, %s3257_s15 }
  0x83   :  { %798 = vrot.lane.b32.xlu0 %v3276_v1, %s3257_s15 }
  0x84   :  { %v306_v40 = vpop.permute.xlu1 %305  }
  0x85   :  { %v297_v41 = vpop.permute.xlu0 %296   ;;  %309 = vst.msk [vmem:[#allocation0 + $0x241] ss:$8 sm:$0xf] %vm3_vm0, %v306_v40   ;;  %311 = vst.msk [vmem:[#allocation0 + $0x241] ss:$8 sm:$0xf0] %vm3_vm0, %v306_v40  }
  0x86   :  { %300 = vst.msk [vmem:[#allocation0 + $0x201] ss:$8 sm:$0xf] %vm3_vm0, %v297_v41   ;;  %302 = vst.msk [vmem:[#allocation0 + $0x201] ss:$8 sm:$0xf0] %vm3_vm0, %v297_v41   ;;  %825 = vrot.lane.b32.xlu1 %v3281_v2, %s3257_s15 }
  0x87   :  { %816 = vrot.lane.b32.xlu0 %v3271_v0, %s3257_s15 }
  0x88   :  { %v324_v42 = vpop.permute.xlu1 %323  }
  0x89   :  { %v315_v43 = vpop.permute.xlu0 %314   ;;  %327 = vst.msk [vmem:[#allocation0 + $0x2c1] ss:$8 sm:$0xf] %vm3_vm0, %v324_v42   ;;  %329 = vst.msk [vmem:[#allocation0 + $0x2c1] ss:$8 sm:$0xf0] %vm3_vm0, %v324_v42  }
  0x8a   :  { %318 = vst.msk [vmem:[#allocation0 + $0x281] ss:$8 sm:$0xf] %vm3_vm0, %v315_v43   ;;  %320 = vst.msk [vmem:[#allocation0 + $0x281] ss:$8 sm:$0xf0] %vm3_vm0, %v315_v43   ;;  %843 = vrot.lane.b32.xlu1 %v3295_v4, %s3257_s15 }
  0x8b   :  { %834 = vrot.lane.b32.xlu0 %v3312_v5, %s3257_s15 }
  0x8c   :  { %v342_v44 = vpop.permute.xlu1 %341  }
  0x8d   :  { %v333_v45 = vpop.permute.xlu0 %332   ;;  %345 = vst.msk [vmem:[#allocation0 + $0x341] ss:$8 sm:$0xf] %vm3_vm0, %v342_v44   ;;  %347 = vst.msk [vmem:[#allocation0 + $0x341] ss:$8 sm:$0xf0] %vm3_vm0, %v342_v44  }
  0x8e   :  { %336 = vst.msk [vmem:[#allocation0 + $0x301] ss:$8 sm:$0xf] %vm3_vm0, %v333_v45   ;;  %338 = vst.msk [vmem:[#allocation0 + $0x301] ss:$8 sm:$0xf0] %vm3_vm0, %v333_v45   ;;  %861 = vrot.lane.b32.xlu1 %v3317_v6, %s3257_s15 }
  0x8f   :  { %852 = vrot.lane.b32.xlu0 %v3322_v7, %s3257_s15 }
  0x90   :  { %v360_v46 = vpop.permute.xlu1 %359  }
  0x91   :  { %v351_v47 = vpop.permute.xlu0 %350   ;;  %363 = vst.msk [vmem:[#allocation0 + $0x3c1] ss:$8 sm:$0xf] %vm3_vm0, %v360_v46   ;;  %365 = vst.msk [vmem:[#allocation0 + $0x3c1] ss:$8 sm:$0xf0] %vm3_vm0, %v360_v46  }
  0x92   :  { %354 = vst.msk [vmem:[#allocation0 + $0x381] ss:$8 sm:$0xf] %vm3_vm0, %v351_v47   ;;  %356 = vst.msk [vmem:[#allocation0 + $0x381] ss:$8 sm:$0xf0] %vm3_vm0, %v351_v47   ;;  %879 = vrot.lane.b32.xlu1 %v3335_v8, %s3257_s15 }
  0x93   :  { %870 = vrot.lane.b32.xlu0 %v3340_v9, %s3257_s15  ;;  %v2900_v8 = vld [vmem:[%s4711_s0 + $0xe0] sm:$0xff]  }
  0x94   :  { %v378_v48 = vpop.permute.xlu1 %377   ;;  %199 = vst.msk [vmem:[#allocation0 + $0x700] ss:$8 sm:$0xf] %vm3_vm0, %v2900_v8   ;;  %201 = vst.msk [vmem:[#allocation0 + $0x700] ss:$8 sm:$0xf0] %vm3_vm0, %v2900_v8  }
  0x95   :  { %v369_v49 = vpop.permute.xlu0 %368   ;;  %381 = vst.msk [vmem:[#allocation0 + $0x441] ss:$8 sm:$0xf] %vm3_vm0, %v378_v48   ;;  %383 = vst.msk [vmem:[#allocation0 + $0x441] ss:$8 sm:$0xf0] %vm3_vm0, %v378_v48  }
  0x96   :  { %372 = vst.msk [vmem:[#allocation0 + $0x401] ss:$8 sm:$0xf] %vm3_vm0, %v369_v49   ;;  %374 = vst.msk [vmem:[#allocation0 + $0x401] ss:$8 sm:$0xf0] %vm3_vm0, %v369_v49   ;;  %897 = vrot.lane.b32.xlu1 %v3345_v10, %s3257_s15 }
  0x97   :  { %888 = vrot.lane.b32.xlu0 %v3362_v11, %s3257_s15  ;;  %v2903_v11 = vld [vmem:[%s4711_s0 + $0xf8] sm:$0xff]  }
  0x98   :  { %v396_v50 = vpop.permute.xlu1 %395   ;;  %220 = vst.msk [vmem:[#allocation0 + $0x7c0] ss:$8 sm:$0xf] %vm3_vm0, %v2903_v11   ;;  %222 = vst.msk [vmem:[#allocation0 + $0x7c0] ss:$8 sm:$0xf0] %vm3_vm0, %v2903_v11  }
  0x99   :  { %v387_v51 = vpop.permute.xlu0 %386   ;;  %399 = vst.msk [vmem:[#allocation0 + $0x4c1] ss:$8 sm:$0xf] %vm3_vm0, %v396_v50   ;;  %401 = vst.msk [vmem:[#allocation0 + $0x4c1] ss:$8 sm:$0xf0] %vm3_vm0, %v396_v50  }
  0x9a   :  { %390 = vst.msk [vmem:[#allocation0 + $0x481] ss:$8 sm:$0xf] %vm3_vm0, %v387_v51   ;;  %392 = vst.msk [vmem:[#allocation0 + $0x481] ss:$8 sm:$0xf0] %vm3_vm0, %v387_v51   ;;  %915 = vrot.lane.b32.xlu1 %v3367_v12, %s3257_s15 }
  0x9b   :  { %906 = vrot.lane.b32.xlu0 %v3372_v13, %s3257_s15  ;;  %v2902_v12 = vld [vmem:[%s4711_s0 + $0xf0] sm:$0xff]  }
  0x9c   :  { %v414_v52 = vpop.permute.xlu1 %413   ;;  %213 = vst.msk [vmem:[#allocation0 + $0x780] ss:$8 sm:$0xf] %vm3_vm0, %v2902_v12   ;;  %215 = vst.msk [vmem:[#allocation0 + $0x780] ss:$8 sm:$0xf0] %vm3_vm0, %v2902_v12  }
  0x9d   :  { %v405_v53 = vpop.permute.xlu0 %404   ;;  %417 = vst.msk [vmem:[#allocation0 + $0x541] ss:$8 sm:$0xf] %vm3_vm0, %v414_v52   ;;  %419 = vst.msk [vmem:[#allocation0 + $0x541] ss:$8 sm:$0xf0] %vm3_vm0, %v414_v52  }
  0x9e   :  { %408 = vst.msk [vmem:[#allocation0 + $0x501] ss:$8 sm:$0xf] %vm3_vm0, %v405_v53   ;;  %410 = vst.msk [vmem:[#allocation0 + $0x501] ss:$8 sm:$0xf0] %vm3_vm0, %v405_v53   ;;  %933 = vrot.lane.b32.xlu1 %v3393_v14, %s3257_s15 }
  0x9f   :  { %924 = vrot.lane.b32.xlu0 %v3398_v15, %s3257_s15 }
  0xa0   :  { %v432_v54 = vpop.permute.xlu1 %431  }
  0xa1   :  { %v423_v55 = vpop.permute.xlu0 %422   ;;  %435 = vst.msk [vmem:[#allocation0 + $0x5c1] ss:$8 sm:$0xf] %vm3_vm0, %v432_v54   ;;  %437 = vst.msk [vmem:[#allocation0 + $0x5c1] ss:$8 sm:$0xf0] %vm3_vm0, %v432_v54  }
  0xa2   :  { %426 = vst.msk [vmem:[#allocation0 + $0x581] ss:$8 sm:$0xf] %vm3_vm0, %v423_v55   ;;  %428 = vst.msk [vmem:[#allocation0 + $0x581] ss:$8 sm:$0xf0] %vm3_vm0, %v423_v55   ;;  %951 = vrot.lane.b32.xlu1 %v3415_v16, %s3257_s15 }
  0xa3   :  { %942 = vrot.lane.b32.xlu0 %v3420_v17, %s3257_s15 }
  0xa4   :  { %v450_v56 = vpop.permute.xlu1 %449  }
  0xa5   :  { %v441_v57 = vpop.permute.xlu0 %440   ;;  %453 = vst.msk [vmem:[#allocation0 + $0x641] ss:$8 sm:$0xf] %vm3_vm0, %v450_v56   ;;  %455 = vst.msk [vmem:[#allocation0 + $0x641] ss:$8 sm:$0xf0] %vm3_vm0, %v450_v56  }
  0xa6   :  { %444 = vst.msk [vmem:[#allocation0 + $0x601] ss:$8 sm:$0xf] %vm3_vm0, %v441_v57   ;;  %446 = vst.msk [vmem:[#allocation0 + $0x601] ss:$8 sm:$0xf0] %vm3_vm0, %v441_v57   ;;  %969 = vrot.lane.b32.xlu1 %v3425_v18, %s3257_s15 }
  0xa7   :  { %960 = vrot.lane.b32.xlu0 %v3438_v19, %s3257_s15 }
  0xa8   :  { %v468_v58 = vpop.permute.xlu1 %467  }
  0xa9   :  { %v459_v59 = vpop.permute.xlu0 %458   ;;  %471 = vst.msk [vmem:[#allocation0 + $0x6c1] ss:$8 sm:$0xf] %vm3_vm0, %v468_v58   ;;  %473 = vst.msk [vmem:[#allocation0 + $0x6c1] ss:$8 sm:$0xf0] %vm3_vm0, %v468_v58  }
  0xaa   :  { %462 = vst.msk [vmem:[#allocation0 + $0x681] ss:$8 sm:$0xf] %vm3_vm0, %v459_v59   ;;  %464 = vst.msk [vmem:[#allocation0 + $0x681] ss:$8 sm:$0xf0] %vm3_vm0, %v459_v59   ;;  %987 = vrot.lane.b32.xlu1 %v3443_v20, %s3257_s15 }
  0xab   :  { %978 = vrot.lane.b32.xlu0 %v3448_v21, %s3257_s15 }
  0xac   :  { %v486_v60 = vpop.permute.xlu1 %485  }
  0xad   :  { %v477_v61 = vpop.permute.xlu0 %476   ;;  %489 = vst.msk [vmem:[#allocation0 + $0x741] ss:$8 sm:$0xf] %vm3_vm0, %v486_v60   ;;  %491 = vst.msk [vmem:[#allocation0 + $0x741] ss:$8 sm:$0xf0] %vm3_vm0, %v486_v60  }
  0xae   :  { %480 = vst.msk [vmem:[#allocation0 + $0x701] ss:$8 sm:$0xf] %vm3_vm0, %v477_v61   ;;  %482 = vst.msk [vmem:[#allocation0 + $0x701] ss:$8 sm:$0xf0] %vm3_vm0, %v477_v61   ;;  %1005 = vrot.lane.b32.xlu1 %v3465_v22, %s3257_s15 }
  0xaf   :  { %996 = vrot.lane.b32.xlu0 %v3470_v23, %s3257_s15 }
  0xb0   :  { %v504_v62 = vpop.permute.xlu1 %503  }
  0xb1   :  { %v495_v63 = vpop.permute.xlu0 %494   ;;  %507 = vst.msk [vmem:[#allocation0 + $0x7c1] ss:$8 sm:$0xf] %vm3_vm0, %v504_v62   ;;  %509 = vst.msk [vmem:[#allocation0 + $0x7c1] ss:$8 sm:$0xf0] %vm3_vm0, %v504_v62  }
  0xb2   :  { %498 = vst.msk [vmem:[#allocation0 + $0x781] ss:$8 sm:$0xf] %vm3_vm0, %v495_v63   ;;  %500 = vst.msk [vmem:[#allocation0 + $0x781] ss:$8 sm:$0xf0] %vm3_vm0, %v495_v63   ;;  %1023 = vrot.lane.b32.xlu1 %v3475_v24, %s3257_s15 }
  0xb3   :  { %1014 = vrot.lane.b32.xlu0 %v3496_v25, %s3257_s15 }
  0xb4   :  { %v521_v0 = vpop.permute.xlu1 %520  }
  0xb5   :  { %v512_v1 = vpop.permute.xlu0 %511   ;;  %524 = vst.msk [vmem:[#allocation0 + $0x42] ss:$8 sm:$0xf] %vm3_vm0, %v521_v0   ;;  %526 = vst.msk [vmem:[#allocation0 + $0x42] ss:$8 sm:$0xf0] %vm3_vm0, %v521_v0  }
  0xb6   :  { %515 = vst.msk [vmem:[#allocation0 + $0x2] ss:$8 sm:$0xf] %vm3_vm0, %v512_v1   ;;  %517 = vst.msk [vmem:[#allocation0 + $0x2] ss:$8 sm:$0xf0] %vm3_vm0, %v512_v1   ;;  %1041 = vrot.lane.b32.xlu1 %v3501_v26, %s3257_s15 }
  0xb7   :  { %1032 = vrot.lane.b32.xlu0 %v3518_v27, %s3257_s15 }
  0xb8   :  { %v539_v2 = vpop.permute.xlu1 %538  }
  0xb9   :  { %v530_v3 = vpop.permute.xlu0 %529   ;;  %542 = vst.msk [vmem:[#allocation0 + $0xc2] ss:$8 sm:$0xf] %vm3_vm0, %v539_v2   ;;  %544 = vst.msk [vmem:[#allocation0 + $0xc2] ss:$8 sm:$0xf0] %vm3_vm0, %v539_v2  }
  0xba   :  { %533 = vst.msk [vmem:[#allocation0 + $0x82] ss:$8 sm:$0xf] %vm3_vm0, %v530_v3   ;;  %535 = vst.msk [vmem:[#allocation0 + $0x82] ss:$8 sm:$0xf0] %vm3_vm0, %v530_v3   ;;  %1059 = vrot.lane.b32.xlu1 %v3523_v28, %s3257_s15 }
  0xbb   :  { %1050 = vrot.lane.b32.xlu0 %v3588_v29, %s3257_s15 }
  0xbc   :  { %v557_v4 = vpop.permute.xlu1 %556  }
  0xbd   :  { %v548_v5 = vpop.permute.xlu0 %547   ;;  %560 = vst.msk [vmem:[#allocation0 + $0x142] ss:$8 sm:$0xf] %vm3_vm0, %v557_v4   ;;  %562 = vst.msk [vmem:[#allocation0 + $0x142] ss:$8 sm:$0xf0] %vm3_vm0, %v557_v4  }
  0xbe   :  { %551 = vst.msk [vmem:[#allocation0 + $0x102] ss:$8 sm:$0xf] %vm3_vm0, %v548_v5   ;;  %553 = vst.msk [vmem:[#allocation0 + $0x102] ss:$8 sm:$0xf0] %vm3_vm0, %v548_v5   ;;  %1077 = vrot.lane.b32.xlu1 %v3597_v30, %s3257_s15 }
  0xbf   :  { %1068 = vrot.lane.b32.xlu0 %v3602_v31, %s3257_s15 }
  0xc0   :  { %v575_v6 = vpop.permute.xlu1 %574  }
  0xc1   :  { %v566_v7 = vpop.permute.xlu0 %565   ;;  %578 = vst.msk [vmem:[#allocation0 + $0x1c2] ss:$8 sm:$0xf] %vm3_vm0, %v575_v6   ;;  %580 = vst.msk [vmem:[#allocation0 + $0x1c2] ss:$8 sm:$0xf0] %vm3_vm0, %v575_v6  }
  0xc2   :  { %569 = vst.msk [vmem:[#allocation0 + $0x182] ss:$8 sm:$0xf] %vm3_vm0, %v566_v7   ;;  %571 = vst.msk [vmem:[#allocation0 + $0x182] ss:$8 sm:$0xf0] %vm3_vm0, %v566_v7  }
  0xc4   :  { %v593_v9 = vpop.permute.xlu1 %592  }
  0xc5   :  { %v584_v10 = vpop.permute.xlu0 %583   ;;  %596 = vst.msk [vmem:[#allocation0 + $0x242] ss:$8 sm:$0xf] %vm3_vm0, %v593_v9   ;;  %598 = vst.msk [vmem:[#allocation0 + $0x242] ss:$8 sm:$0xf0] %vm3_vm0, %v593_v9  }
  0xc6   :  { %587 = vst.msk [vmem:[#allocation0 + $0x202] ss:$8 sm:$0xf] %vm3_vm0, %v584_v10   ;;  %589 = vst.msk [vmem:[#allocation0 + $0x202] ss:$8 sm:$0xf0] %vm3_vm0, %v584_v10  }
  0xc8   :  { %v611_v13 = vpop.permute.xlu1 %610  }
  0xc9   :  { %v602_v14 = vpop.permute.xlu0 %601   ;;  %614 = vst.msk [vmem:[#allocation0 + $0x2c2] ss:$8 sm:$0xf] %vm3_vm0, %v611_v13   ;;  %616 = vst.msk [vmem:[#allocation0 + $0x2c2] ss:$8 sm:$0xf0] %vm3_vm0, %v611_v13  }
  0xca   :  { %605 = vst.msk [vmem:[#allocation0 + $0x282] ss:$8 sm:$0xf] %vm3_vm0, %v602_v14   ;;  %607 = vst.msk [vmem:[#allocation0 + $0x282] ss:$8 sm:$0xf0] %vm3_vm0, %v602_v14  }
  0xcc   :  { %v629_v15 = vpop.permute.xlu1 %628  }
  0xcd   :  { %v620_v16 = vpop.permute.xlu0 %619   ;;  %632 = vst.msk [vmem:[#allocation0 + $0x342] ss:$8 sm:$0xf] %vm3_vm0, %v629_v15   ;;  %634 = vst.msk [vmem:[#allocation0 + $0x342] ss:$8 sm:$0xf0] %vm3_vm0, %v629_v15  }
  0xce   :  { %623 = vst.msk [vmem:[#allocation0 + $0x302] ss:$8 sm:$0xf] %vm3_vm0, %v620_v16   ;;  %625 = vst.msk [vmem:[#allocation0 + $0x302] ss:$8 sm:$0xf0] %vm3_vm0, %v620_v16  }
  0xd0   :  { %v647_v17 = vpop.permute.xlu1 %646  }
  0xd1   :  { %v638_v18 = vpop.permute.xlu0 %637   ;;  %650 = vst.msk [vmem:[#allocation0 + $0x3c2] ss:$8 sm:$0xf] %vm3_vm0, %v647_v17   ;;  %652 = vst.msk [vmem:[#allocation0 + $0x3c2] ss:$8 sm:$0xf0] %vm3_vm0, %v647_v17  }
  0xd2   :  { %641 = vst.msk [vmem:[#allocation0 + $0x382] ss:$8 sm:$0xf] %vm3_vm0, %v638_v18   ;;  %643 = vst.msk [vmem:[#allocation0 + $0x382] ss:$8 sm:$0xf0] %vm3_vm0, %v638_v18  }
  0xd4   :  { %v665_v19 = vpop.permute.xlu1 %664  }
  0xd5   :  { %v656_v20 = vpop.permute.xlu0 %655   ;;  %668 = vst.msk [vmem:[#allocation0 + $0x442] ss:$8 sm:$0xf] %vm3_vm0, %v665_v19   ;;  %670 = vst.msk [vmem:[#allocation0 + $0x442] ss:$8 sm:$0xf0] %vm3_vm0, %v665_v19  }
  0xd6   :  { %659 = vst.msk [vmem:[#allocation0 + $0x402] ss:$8 sm:$0xf] %vm3_vm0, %v656_v20   ;;  %661 = vst.msk [vmem:[#allocation0 + $0x402] ss:$8 sm:$0xf0] %vm3_vm0, %v656_v20  }
  0xd8   :  { %v683_v21 = vpop.permute.xlu1 %682  }
  0xd9   :  { %v674_v22 = vpop.permute.xlu0 %673   ;;  %686 = vst.msk [vmem:[#allocation0 + $0x4c2] ss:$8 sm:$0xf] %vm3_vm0, %v683_v21   ;;  %688 = vst.msk [vmem:[#allocation0 + $0x4c2] ss:$8 sm:$0xf0] %vm3_vm0, %v683_v21  }
  0xda   :  { %677 = vst.msk [vmem:[#allocation0 + $0x482] ss:$8 sm:$0xf] %vm3_vm0, %v674_v22   ;;  %679 = vst.msk [vmem:[#allocation0 + $0x482] ss:$8 sm:$0xf0] %vm3_vm0, %v674_v22  }
  0xdc   :  { %v701_v23 = vpop.permute.xlu1 %700  }
  0xdd   :  { %v692_v24 = vpop.permute.xlu0 %691   ;;  %704 = vst.msk [vmem:[#allocation0 + $0x542] ss:$8 sm:$0xf] %vm3_vm0, %v701_v23   ;;  %706 = vst.msk [vmem:[#allocation0 + $0x542] ss:$8 sm:$0xf0] %vm3_vm0, %v701_v23  }
  0xde   :  { %695 = vst.msk [vmem:[#allocation0 + $0x502] ss:$8 sm:$0xf] %vm3_vm0, %v692_v24   ;;  %697 = vst.msk [vmem:[#allocation0 + $0x502] ss:$8 sm:$0xf0] %vm3_vm0, %v692_v24  }
  0xe0   :  { %v719_v25 = vpop.permute.xlu1 %718  }
  0xe1   :  { %v710_v26 = vpop.permute.xlu0 %709   ;;  %722 = vst.msk [vmem:[#allocation0 + $0x5c2] ss:$8 sm:$0xf] %vm3_vm0, %v719_v25   ;;  %724 = vst.msk [vmem:[#allocation0 + $0x5c2] ss:$8 sm:$0xf0] %vm3_vm0, %v719_v25  }
  0xe2   :  { %713 = vst.msk [vmem:[#allocation0 + $0x582] ss:$8 sm:$0xf] %vm3_vm0, %v710_v26   ;;  %715 = vst.msk [vmem:[#allocation0 + $0x582] ss:$8 sm:$0xf0] %vm3_vm0, %v710_v26  }
  0xe4   :  { %v737_v27 = vpop.permute.xlu1 %736  }
  0xe5   :  { %v728_v28 = vpop.permute.xlu0 %727   ;;  %740 = vst.msk [vmem:[#allocation0 + $0x642] ss:$8 sm:$0xf] %vm3_vm0, %v737_v27   ;;  %742 = vst.msk [vmem:[#allocation0 + $0x642] ss:$8 sm:$0xf0] %vm3_vm0, %v737_v27  }
  0xe6   :  { %731 = vst.msk [vmem:[#allocation0 + $0x602] ss:$8 sm:$0xf] %vm3_vm0, %v728_v28   ;;  %733 = vst.msk [vmem:[#allocation0 + $0x602] ss:$8 sm:$0xf0] %vm3_vm0, %v728_v28  }
  0xe8   :  { %v755_v29 = vpop.permute.xlu1 %754  }
  0xe9   :  { %v746_v30 = vpop.permute.xlu0 %745   ;;  %758 = vst.msk [vmem:[#allocation0 + $0x6c2] ss:$8 sm:$0xf] %vm3_vm0, %v755_v29   ;;  %760 = vst.msk [vmem:[#allocation0 + $0x6c2] ss:$8 sm:$0xf0] %vm3_vm0, %v755_v29  }
  0xea   :  { %749 = vst.msk [vmem:[#allocation0 + $0x682] ss:$8 sm:$0xf] %vm3_vm0, %v746_v30   ;;  %751 = vst.msk [vmem:[#allocation0 + $0x682] ss:$8 sm:$0xf0] %vm3_vm0, %v746_v30  }
  0xec   :  { %v773_v31 = vpop.permute.xlu1 %772  }
  0xed   :  { %v764_v32 = vpop.permute.xlu0 %763   ;;  %776 = vst.msk [vmem:[#allocation0 + $0x742] ss:$8 sm:$0xf] %vm3_vm0, %v773_v31   ;;  %778 = vst.msk [vmem:[#allocation0 + $0x742] ss:$8 sm:$0xf0] %vm3_vm0, %v773_v31  }
  0xee   :  { %767 = vst.msk [vmem:[#allocation0 + $0x702] ss:$8 sm:$0xf] %vm3_vm0, %v764_v32   ;;  %769 = vst.msk [vmem:[#allocation0 + $0x702] ss:$8 sm:$0xf0] %vm3_vm0, %v764_v32  }
  0xf0   :  { %v791_v33 = vpop.permute.xlu1 %790  }
  0xf1   :  { %v782_v34 = vpop.permute.xlu0 %781   ;;  %794 = vst.msk [vmem:[#allocation0 + $0x7c2] ss:$8 sm:$0xf] %vm3_vm0, %v791_v33   ;;  %796 = vst.msk [vmem:[#allocation0 + $0x7c2] ss:$8 sm:$0xf0] %vm3_vm0, %v791_v33  }
  0xf2   :  { %785 = vst.msk [vmem:[#allocation0 + $0x782] ss:$8 sm:$0xf] %vm3_vm0, %v782_v34   ;;  %787 = vst.msk [vmem:[#allocation0 + $0x782] ss:$8 sm:$0xf0] %vm3_vm0, %v782_v34  }
  0xf4   :  { %v808_v35 = vpop.permute.xlu1 %807  }
  0xf5   :  { %v799_v36 = vpop.permute.xlu0 %798   ;;  %811 = vst.msk [vmem:[#allocation0 + $0x43] ss:$8 sm:$0xf] %vm3_vm0, %v808_v35   ;;  %813 = vst.msk [vmem:[#allocation0 + $0x43] ss:$8 sm:$0xf0] %vm3_vm0, %v808_v35  }
  0xf6   :  { %802 = vst.msk [vmem:[#allocation0 + $0x3] ss:$8 sm:$0xf] %vm3_vm0, %v799_v36   ;;  %804 = vst.msk [vmem:[#allocation0 + $0x3] ss:$8 sm:$0xf0] %vm3_vm0, %v799_v36  }
  0xf8   :  { %v826_v37 = vpop.permute.xlu1 %825  }
  0xf9   :  { %v817_v38 = vpop.permute.xlu0 %816   ;;  %829 = vst.msk [vmem:[#allocation0 + $0xc3] ss:$8 sm:$0xf] %vm3_vm0, %v826_v37   ;;  %831 = vst.msk [vmem:[#allocation0 + $0xc3] ss:$8 sm:$0xf0] %vm3_vm0, %v826_v37  }
  0xfa   :  { %820 = vst.msk [vmem:[#allocation0 + $0x83] ss:$8 sm:$0xf] %vm3_vm0, %v817_v38   ;;  %822 = vst.msk [vmem:[#allocation0 + $0x83] ss:$8 sm:$0xf0] %vm3_vm0, %v817_v38  }
  0xfc   :  { %v1132_v39 = vld [vmem:[#allocation0 + $0x40] sm:$0xf]  ;;  %v1138_v40 = vld [vmem:[#allocation0 + $0x48] sm:$0xf]  ;;  %v1144_v41 = vld [vmem:[#allocation0 + $0x50] sm:$0xf]  ;;  %v844_v42 = vpop.permute.xlu1 %843  }
  0xfd   :  { %v835_v43 = vpop.permute.xlu0 %834   ;;  %v1150_v44 = vld [vmem:[#allocation0 + $0x58] sm:$0xf]  ;;  %v1156_v45 = vld [vmem:[#allocation0 + $0x60] sm:$0xf]  ;;  %v1162_v46 = vld [vmem:[#allocation0 + $0x68] sm:$0xf] }
  0xfe   :  { %3004 = vst [vmem:[%s4712_s1 + $0x20] sm:$0xf] %v1132_v39  ;;  %3005 = vst [vmem:[%s4712_s1 + $0x24] sm:$0xf] %v1138_v40  ;;  %v1168_v47 = vld [vmem:[#allocation0 + $0x70] sm:$0xf] }
  0xff   :  { %3006 = vst [vmem:[%s4712_s1 + $0x28] sm:$0xf] %v1144_v41  ;;  %847 = vst.msk [vmem:[#allocation0 + $0x143] ss:$8 sm:$0xf] %vm3_vm0, %v844_v42  }
 0x100   :  { %849 = vst.msk [vmem:[#allocation0 + $0x143] ss:$8 sm:$0xf0] %vm3_vm0, %v844_v42   ;;  %838 = vst.msk [vmem:[#allocation0 + $0x103] ss:$8 sm:$0xf] %vm3_vm0, %v835_v43   ;;  %v862_v56 = vpop.permute.xlu1 %861  }
 0x101   :  { %840 = vst.msk [vmem:[#allocation0 + $0x103] ss:$8 sm:$0xf0] %vm3_vm0, %v835_v43   ;;  %v1174_v48 = vld [vmem:[#allocation0 + $0x78] sm:$0xf]  ;;  %v853_v57 = vpop.permute.xlu0 %852  }
 0x102   :  { %v1108_v49 = vld [vmem:[#allocation0 + $0x20] sm:$0xf]  ;;  %3007 = vst [vmem:[%s4712_s1 + $0x2c] sm:$0xf] %v1150_v44  ;;  %3008 = vst [vmem:[%s4712_s1 + $0x30] sm:$0xf] %v1156_v45 }
 0x103   :  { %3009 = vst [vmem:[%s4712_s1 + $0x34] sm:$0xf] %v1162_v46  ;;  %3000 = vst [vmem:[%s4712_s1 + $0x10] sm:$0xf] %v1108_v49  ;;  %v1114_v50 = vld [vmem:[#allocation0 + $0x28] sm:$0xf] }
 0x104   :  { %v1120_v51 = vld [vmem:[#allocation0 + $0x30] sm:$0xf]  ;;  %v1126_v52 = vld [vmem:[#allocation0 + $0x38] sm:$0xf]  ;;  %3010 = vst [vmem:[%s4712_s1 + $0x38] sm:$0xf] %v1168_v47  ;;  %v880_v6 = vpop.permute.xlu1 %879  }
 0x105   :  { %3011 = vst [vmem:[%s4712_s1 + $0x3c] sm:$0xf] %v1174_v48  ;;  %3001 = vst [vmem:[%s4712_s1 + $0x14] sm:$0xf] %v1114_v50  ;;  %v1087_v53 = vld [vmem:[#allocation0] sm:$0xf]  ;;  %v871_v7 = vpop.permute.xlu0 %870  }
 0x106   :  { %3002 = vst [vmem:[%s4712_s1 + $0x18] sm:$0xf] %v1120_v51  ;;  %3003 = vst [vmem:[%s4712_s1 + $0x1c] sm:$0xf] %v1126_v52  ;;  %v1091_v54 = vld [vmem:[#allocation0 + $0x8] sm:$0xf] }
 0x107   :  { %v1096_v55 = vld [vmem:[#allocation0 + $0x10] sm:$0xf]  ;;  %v1102_v58 = vld [vmem:[#allocation0 + $0x18] sm:$0xf]  ;;  %1089 = vst [vmem:[%s4712_s1] sm:$0xf] %v1087_v53 }
 0x108   :  { %2997 = vst [vmem:[%s4712_s1 + $0x4] sm:$0xf] %v1091_v54  ;;  %2998 = vst [vmem:[%s4712_s1 + $0x8] sm:$0xf] %v1096_v55  ;;  %v1228_v59 = vld [vmem:[#allocation0 + $0xc0] sm:$0xf]  ;;  %v898_v20 = vpop.permute.xlu1 %897  }
 0x109   :  { %v1234_v60 = vld [vmem:[#allocation0 + $0xc8] sm:$0xf]  ;;  %865 = vst.msk [vmem:[#allocation0 + $0x1c3] ss:$8 sm:$0xf] %vm3_vm0, %v862_v56   ;;  %v889_v21 = vpop.permute.xlu0 %888  }
 0x10a   :  { %867 = vst.msk [vmem:[#allocation0 + $0x1c3] ss:$8 sm:$0xf0] %vm3_vm0, %v862_v56   ;;  %856 = vst.msk [vmem:[#allocation0 + $0x183] ss:$8 sm:$0xf] %vm3_vm0, %v853_v57  }
 0x10b   :  { %858 = vst.msk [vmem:[#allocation0 + $0x183] ss:$8 sm:$0xf0] %vm3_vm0, %v853_v57   ;;  %2999 = vst [vmem:[%s4712_s1 + $0xc] sm:$0xf] %v1102_v58 }
 0x10c   :  { %v1240_v61 = vld [vmem:[#allocation0 + $0xd0] sm:$0xf]  ;;  %v1246_v62 = vld [vmem:[#allocation0 + $0xd8] sm:$0xf]  ;;  %v1252_v63 = vld [vmem:[#allocation0 + $0xe0] sm:$0xf]  ;;  %v916_v34 = vpop.permute.xlu1 %915  }
 0x10d   :  { %3020 = vst [vmem:[%s4712_s1 + $0x60] sm:$0xf] %v1228_v59  ;;  %3021 = vst [vmem:[%s4712_s1 + $0x64] sm:$0xf] %v1234_v60  ;;  %v1258_v0 = vld [vmem:[#allocation0 + $0xe8] sm:$0xf]  ;;  %v907_v35 = vpop.permute.xlu0 %906  }
 0x10e   :  { %v1264_v1 = vld [vmem:[#allocation0 + $0xf0] sm:$0xf]  ;;  %v1270_v2 = vld [vmem:[#allocation0 + $0xf8] sm:$0xf]  ;;  %3022 = vst [vmem:[%s4712_s1 + $0x68] sm:$0xf] %v1240_v61 }
 0x10f   :  { %3023 = vst [vmem:[%s4712_s1 + $0x6c] sm:$0xf] %v1246_v62  ;;  %3024 = vst [vmem:[%s4712_s1 + $0x70] sm:$0xf] %v1252_v63  ;;  %v1180_v3 = vld [vmem:[#allocation0 + $0x80] sm:$0xf] }
 0x110   :  { %v1186_v4 = vld [vmem:[#allocation0 + $0x88] sm:$0xf]  ;;  %v1192_v5 = vld [vmem:[#allocation0 + $0x90] sm:$0xf]  ;;  %3025 = vst [vmem:[%s4712_s1 + $0x74] sm:$0xf] %v1258_v0  ;;  %v934_v48 = vpop.permute.xlu1 %933  }
 0x111   :  { %3026 = vst [vmem:[%s4712_s1 + $0x78] sm:$0xf] %v1264_v1  ;;  %3027 = vst [vmem:[%s4712_s1 + $0x7c] sm:$0xf] %v1270_v2  ;;  %v1198_v8 = vld [vmem:[#allocation0 + $0x98] sm:$0xf]  ;;  %v925_v49 = vpop.permute.xlu0 %924  }
 0x112   :  { %v1204_v9 = vld [vmem:[#allocation0 + $0xa0] sm:$0xf]  ;;  %v1210_v10 = vld [vmem:[#allocation0 + $0xa8] sm:$0xf]  ;;  %3012 = vst [vmem:[%s4712_s1 + $0x40] sm:$0xf] %v1180_v3 }
 0x113   :  { %3013 = vst [vmem:[%s4712_s1 + $0x44] sm:$0xf] %v1186_v4  ;;  %3014 = vst [vmem:[%s4712_s1 + $0x48] sm:$0xf] %v1192_v5  ;;  %v1216_v11 = vld [vmem:[#allocation0 + $0xb0] sm:$0xf] }
 0x114   :  { %883 = vst.msk [vmem:[#allocation0 + $0x243] ss:$8 sm:$0xf] %vm3_vm0, %v880_v6   ;;  %885 = vst.msk [vmem:[#allocation0 + $0x243] ss:$8 sm:$0xf0] %vm3_vm0, %v880_v6   ;;  %v952_v62 = vpop.permute.xlu1 %951  }
 0x115   :  { %874 = vst.msk [vmem:[#allocation0 + $0x203] ss:$8 sm:$0xf] %vm3_vm0, %v871_v7   ;;  %876 = vst.msk [vmem:[#allocation0 + $0x203] ss:$8 sm:$0xf0] %vm3_vm0, %v871_v7   ;;  %v943_v63 = vpop.permute.xlu0 %942  }
 0x116   :  { %v1222_v12 = vld [vmem:[#allocation0 + $0xb8] sm:$0xf]  ;;  %3015 = vst [vmem:[%s4712_s1 + $0x4c] sm:$0xf] %v1198_v8  ;;  %3016 = vst [vmem:[%s4712_s1 + $0x50] sm:$0xf] %v1204_v9 }
 0x117   :  { %3017 = vst [vmem:[%s4712_s1 + $0x54] sm:$0xf] %v1210_v10  ;;  %v1324_v13 = vld [vmem:[#allocation0 + $0x140] sm:$0xf]  ;;  %3018 = vst [vmem:[%s4712_s1 + $0x58] sm:$0xf] %v1216_v11 }
 0x118   :  { %3019 = vst [vmem:[%s4712_s1 + $0x5c] sm:$0xf] %v1222_v12  ;;  %v1330_v14 = vld [vmem:[#allocation0 + $0x148] sm:$0xf]  ;;  %v1336_v15 = vld [vmem:[#allocation0 + $0x150] sm:$0xf]  ;;  %v970_v12 = vpop.permute.xlu1 %969  }
 0x119   :  { %v1342_v16 = vld [vmem:[#allocation0 + $0x158] sm:$0xf]  ;;  %3036 = vst [vmem:[%s4712_s1 + $0xa0] sm:$0xf] %v1324_v13  ;;  %v1348_v17 = vld [vmem:[#allocation0 + $0x160] sm:$0xf]  ;;  %v961_v13 = vpop.permute.xlu0 %960  }
 0x11a   :  { %v1354_v18 = vld [vmem:[#allocation0 + $0x168] sm:$0xf]  ;;  %v1360_v19 = vld [vmem:[#allocation0 + $0x170] sm:$0xf]  ;;  %3037 = vst [vmem:[%s4712_s1 + $0xa4] sm:$0xf] %v1330_v14 }
 0x11b   :  { %3038 = vst [vmem:[%s4712_s1 + $0xa8] sm:$0xf] %v1336_v15  ;;  %3039 = vst [vmem:[%s4712_s1 + $0xac] sm:$0xf] %v1342_v16  ;;  %v1366_v22 = vld [vmem:[#allocation0 + $0x178] sm:$0xf] }
 0x11c   :  { %v1276_v23 = vld [vmem:[#allocation0 + $0x100] sm:$0xf]  ;;  %v1282_v24 = vld [vmem:[#allocation0 + $0x108] sm:$0xf]  ;;  %3040 = vst [vmem:[%s4712_s1 + $0xb0] sm:$0xf] %v1348_v17 }
 0x11d   :  { %3041 = vst [vmem:[%s4712_s1 + $0xb4] sm:$0xf] %v1354_v18  ;;  %3042 = vst [vmem:[%s4712_s1 + $0xb8] sm:$0xf] %v1360_v19  ;;  %v1288_v25 = vld [vmem:[#allocation0 + $0x110] sm:$0xf] }
 0x11e   :  { %901 = vst.msk [vmem:[#allocation0 + $0x2c3] ss:$8 sm:$0xf] %vm3_vm0, %v898_v20   ;;  %903 = vst.msk [vmem:[#allocation0 + $0x2c3] ss:$8 sm:$0xf0] %vm3_vm0, %v898_v20  }
 0x11f   :  { %892 = vst.msk [vmem:[#allocation0 + $0x283] ss:$8 sm:$0xf] %vm3_vm0, %v889_v21   ;;  %894 = vst.msk [vmem:[#allocation0 + $0x283] ss:$8 sm:$0xf0] %vm3_vm0, %v889_v21  }
 0x120   :  { %v1294_v26 = vld [vmem:[#allocation0 + $0x118] sm:$0xf]  ;;  %v1300_v27 = vld [vmem:[#allocation0 + $0x120] sm:$0xf]  ;;  %3043 = vst [vmem:[%s4712_s1 + $0xbc] sm:$0xf] %v1366_v22 }
 0x121   :  { %3028 = vst [vmem:[%s4712_s1 + $0x80] sm:$0xf] %v1276_v23  ;;  %3029 = vst [vmem:[%s4712_s1 + $0x84] sm:$0xf] %v1282_v24  ;;  %v1306_v28 = vld [vmem:[#allocation0 + $0x128] sm:$0xf] }
 0x122   :  { %v1312_v29 = vld [vmem:[#allocation0 + $0x130] sm:$0xf]  ;;  %v1318_v30 = vld [vmem:[#allocation0 + $0x138] sm:$0xf]  ;;  %3030 = vst [vmem:[%s4712_s1 + $0x88] sm:$0xf] %v1288_v25 }
 0x123   :  { %3031 = vst [vmem:[%s4712_s1 + $0x8c] sm:$0xf] %v1294_v26  ;;  %3032 = vst [vmem:[%s4712_s1 + $0x90] sm:$0xf] %v1300_v27  ;;  %v1420_v31 = vld [vmem:[#allocation0 + $0x1c0] sm:$0xf]  ;;  %v988_v26 = vpop.permute.xlu1 %987   ;;  %v979_v27 = vpop.permute.xlu0 %978  }
 0x124   :  { %3033 = vst [vmem:[%s4712_s1 + $0x94] sm:$0xf] %v1306_v28  ;;  %3034 = vst [vmem:[%s4712_s1 + $0x98] sm:$0xf] %v1312_v29  ;;  %v1426_v32 = vld [vmem:[#allocation0 + $0x1c8] sm:$0xf] }
 0x125   :  { %3035 = vst [vmem:[%s4712_s1 + $0x9c] sm:$0xf] %v1318_v30  ;;  %v1432_v33 = vld [vmem:[#allocation0 + $0x1d0] sm:$0xf]  ;;  %v1438_v36 = vld [vmem:[#allocation0 + $0x1d8] sm:$0xf] }
 0x126   :  { %v1444_v37 = vld [vmem:[#allocation0 + $0x1e0] sm:$0xf]  ;;  %v1450_v38 = vld [vmem:[#allocation0 + $0x1e8] sm:$0xf]  ;;  %3052 = vst [vmem:[%s4712_s1 + $0xe0] sm:$0xf] %v1420_v31 }
 0x127   :  { %3053 = vst [vmem:[%s4712_s1 + $0xe4] sm:$0xf] %v1426_v32  ;;  %3054 = vst [vmem:[%s4712_s1 + $0xe8] sm:$0xf] %v1432_v33  ;;  %v1456_v39 = vld [vmem:[#allocation0 + $0x1f0] sm:$0xf] }
 0x128   :  { %919 = vst.msk [vmem:[#allocation0 + $0x343] ss:$8 sm:$0xf] %vm3_vm0, %v916_v34   ;;  %921 = vst.msk [vmem:[#allocation0 + $0x343] ss:$8 sm:$0xf0] %vm3_vm0, %v916_v34  }
 0x129   :  { %910 = vst.msk [vmem:[#allocation0 + $0x303] ss:$8 sm:$0xf] %vm3_vm0, %v907_v35   ;;  %912 = vst.msk [vmem:[#allocation0 + $0x303] ss:$8 sm:$0xf0] %vm3_vm0, %v907_v35  }
 0x12a   :  { %v1462_v40 = vld [vmem:[#allocation0 + $0x1f8] sm:$0xf]  ;;  %v1372_v41 = vld [vmem:[#allocation0 + $0x180] sm:$0xf]  ;;  %3055 = vst [vmem:[%s4712_s1 + $0xec] sm:$0xf] %v1438_v36 }
 0x12b   :  { %3056 = vst [vmem:[%s4712_s1 + $0xf0] sm:$0xf] %v1444_v37  ;;  %3057 = vst [vmem:[%s4712_s1 + $0xf4] sm:$0xf] %v1450_v38  ;;  %v1378_v42 = vld [vmem:[#allocation0 + $0x188] sm:$0xf] }
 0x12c   :  { %v1384_v43 = vld [vmem:[#allocation0 + $0x190] sm:$0xf]  ;;  %v1390_v44 = vld [vmem:[#allocation0 + $0x198] sm:$0xf]  ;;  %3058 = vst [vmem:[%s4712_s1 + $0xf8] sm:$0xf] %v1456_v39 }
 0x12d   :  { %3059 = vst [vmem:[%s4712_s1 + $0xfc] sm:$0xf] %v1462_v40  ;;  %3044 = vst [vmem:[%s4712_s1 + $0xc0] sm:$0xf] %v1372_v41  ;;  %v1396_v45 = vld [vmem:[#allocation0 + $0x1a0] sm:$0xf]  ;;  %v1006_v40 = vpop.permute.xlu1 %1005   ;;  %v997_v41 = vpop.permute.xlu0 %996  }
 0x12e   :  { %v1402_v46 = vld [vmem:[#allocation0 + $0x1a8] sm:$0xf]  ;;  %v1408_v47 = vld [vmem:[#allocation0 + $0x1b0] sm:$0xf]  ;;  %3045 = vst [vmem:[%s4712_s1 + $0xc4] sm:$0xf] %v1378_v42 }
 0x12f   :  { %3046 = vst [vmem:[%s4712_s1 + $0xc8] sm:$0xf] %v1384_v43  ;;  %3047 = vst [vmem:[%s4712_s1 + $0xcc] sm:$0xf] %v1390_v44  ;;  %v1414_v50 = vld [vmem:[#allocation0 + $0x1b8] sm:$0xf] }
 0x130   :  { %3048 = vst [vmem:[%s4712_s1 + $0xd0] sm:$0xf] %v1396_v45  ;;  %3049 = vst [vmem:[%s4712_s1 + $0xd4] sm:$0xf] %v1402_v46  ;;  %v1516_v51 = vld [vmem:[#allocation0 + $0x240] sm:$0xf] }
 0x131   :  { %3050 = vst [vmem:[%s4712_s1 + $0xd8] sm:$0xf] %v1408_v47  ;;  %v1522_v52 = vld [vmem:[#allocation0 + $0x248] sm:$0xf]  ;;  %3051 = vst [vmem:[%s4712_s1 + $0xdc] sm:$0xf] %v1414_v50 }
 0x132   :  { %937 = vst.msk [vmem:[#allocation0 + $0x3c3] ss:$8 sm:$0xf] %vm3_vm0, %v934_v48   ;;  %939 = vst.msk [vmem:[#allocation0 + $0x3c3] ss:$8 sm:$0xf0] %vm3_vm0, %v934_v48  }
 0x133   :  { %928 = vst.msk [vmem:[#allocation0 + $0x383] ss:$8 sm:$0xf] %vm3_vm0, %v925_v49   ;;  %930 = vst.msk [vmem:[#allocation0 + $0x383] ss:$8 sm:$0xf0] %vm3_vm0, %v925_v49  }
 0x134   :  { %v1528_v53 = vld [vmem:[#allocation0 + $0x250] sm:$0xf]  ;;  %v1534_v54 = vld [vmem:[#allocation0 + $0x258] sm:$0xf]  ;;  %v1540_v55 = vld [vmem:[#allocation0 + $0x260] sm:$0xf] }
 0x135   :  { %3068 = vst [vmem:[%s4712_s1 + $0x120] sm:$0xf] %v1516_v51  ;;  %3069 = vst [vmem:[%s4712_s1 + $0x124] sm:$0xf] %v1522_v52  ;;  %v1546_v56 = vld [vmem:[#allocation0 + $0x268] sm:$0xf] }
 0x136   :  { %v1552_v57 = vld [vmem:[#allocation0 + $0x270] sm:$0xf]  ;;  %v1558_v58 = vld [vmem:[#allocation0 + $0x278] sm:$0xf]  ;;  %3070 = vst [vmem:[%s4712_s1 + $0x128] sm:$0xf] %v1528_v53 }
 0x137   :  { %3071 = vst [vmem:[%s4712_s1 + $0x12c] sm:$0xf] %v1534_v54  ;;  %3072 = vst [vmem:[%s4712_s1 + $0x130] sm:$0xf] %v1540_v55  ;;  %v1468_v59 = vld [vmem:[#allocation0 + $0x200] sm:$0xf]  ;;  %v1024_v54 = vpop.permute.xlu1 %1023   ;;  %v1015_v55 = vpop.permute.xlu0 %1014  }
 0x138   :  { %v1474_v60 = vld [vmem:[#allocation0 + $0x208] sm:$0xf]  ;;  %v1480_v61 = vld [vmem:[#allocation0 + $0x210] sm:$0xf]  ;;  %3073 = vst [vmem:[%s4712_s1 + $0x134] sm:$0xf] %v1546_v56 }
 0x139   :  { %3074 = vst [vmem:[%s4712_s1 + $0x138] sm:$0xf] %v1552_v57  ;;  %3075 = vst [vmem:[%s4712_s1 + $0x13c] sm:$0xf] %v1558_v58  ;;  %v1486_v0 = vld [vmem:[#allocation0 + $0x218] sm:$0xf] }
 0x13a   :  { %v1492_v1 = vld [vmem:[#allocation0 + $0x220] sm:$0xf]  ;;  %v1498_v2 = vld [vmem:[#allocation0 + $0x228] sm:$0xf]  ;;  %3060 = vst [vmem:[%s4712_s1 + $0x100] sm:$0xf] %v1468_v59 }
 0x13b   :  { %3061 = vst [vmem:[%s4712_s1 + $0x104] sm:$0xf] %v1474_v60  ;;  %3062 = vst [vmem:[%s4712_s1 + $0x108] sm:$0xf] %v1480_v61  ;;  %v1504_v3 = vld [vmem:[#allocation0 + $0x230] sm:$0xf] }
 0x13c   :  { %955 = vst.msk [vmem:[#allocation0 + $0x443] ss:$8 sm:$0xf] %vm3_vm0, %v952_v62   ;;  %957 = vst.msk [vmem:[#allocation0 + $0x443] ss:$8 sm:$0xf0] %vm3_vm0, %v952_v62  }
 0x13d   :  { %946 = vst.msk [vmem:[#allocation0 + $0x403] ss:$8 sm:$0xf] %vm3_vm0, %v943_v63   ;;  %948 = vst.msk [vmem:[#allocation0 + $0x403] ss:$8 sm:$0xf0] %vm3_vm0, %v943_v63  }
 0x13e   :  { %v1510_v4 = vld [vmem:[#allocation0 + $0x238] sm:$0xf]  ;;  %3063 = vst [vmem:[%s4712_s1 + $0x10c] sm:$0xf] %v1486_v0  ;;  %3064 = vst [vmem:[%s4712_s1 + $0x110] sm:$0xf] %v1492_v1 }
 0x13f   :  { %3065 = vst [vmem:[%s4712_s1 + $0x114] sm:$0xf] %v1498_v2  ;;  %v1612_v5 = vld [vmem:[#allocation0 + $0x2c0] sm:$0xf]  ;;  %3066 = vst [vmem:[%s4712_s1 + $0x118] sm:$0xf] %v1504_v3 }
 0x140   :  { %3067 = vst [vmem:[%s4712_s1 + $0x11c] sm:$0xf] %v1510_v4  ;;  %v1618_v6 = vld [vmem:[#allocation0 + $0x2c8] sm:$0xf]  ;;  %v1624_v7 = vld [vmem:[#allocation0 + $0x2d0] sm:$0xf]  ;;  %v1042_v4 = vpop.permute.xlu1 %1041  }
 0x141   :  { %v1630_v8 = vld [vmem:[#allocation0 + $0x2d8] sm:$0xf]  ;;  %3084 = vst [vmem:[%s4712_s1 + $0x160] sm:$0xf] %v1612_v5  ;;  %v1636_v9 = vld [vmem:[#allocation0 + $0x2e0] sm:$0xf]  ;;  %v1033_v5 = vpop.permute.xlu0 %1032  }
 0x142   :  { %v1642_v10 = vld [vmem:[#allocation0 + $0x2e8] sm:$0xf]  ;;  %v1648_v11 = vld [vmem:[#allocation0 + $0x2f0] sm:$0xf]  ;;  %3085 = vst [vmem:[%s4712_s1 + $0x164] sm:$0xf] %v1618_v6 }
 0x143   :  { %3086 = vst [vmem:[%s4712_s1 + $0x168] sm:$0xf] %v1624_v7  ;;  %3087 = vst [vmem:[%s4712_s1 + $0x16c] sm:$0xf] %v1630_v8  ;;  %v1654_v14 = vld [vmem:[#allocation0 + $0x2f8] sm:$0xf] }
 0x144   :  { %v1564_v15 = vld [vmem:[#allocation0 + $0x280] sm:$0xf]  ;;  %v1570_v16 = vld [vmem:[#allocation0 + $0x288] sm:$0xf]  ;;  %3088 = vst [vmem:[%s4712_s1 + $0x170] sm:$0xf] %v1636_v9 }
 0x145   :  { %3089 = vst [vmem:[%s4712_s1 + $0x174] sm:$0xf] %v1642_v10  ;;  %3090 = vst [vmem:[%s4712_s1 + $0x178] sm:$0xf] %v1648_v11  ;;  %v1576_v17 = vld [vmem:[#allocation0 + $0x290] sm:$0xf] }
 0x146   :  { %973 = vst.msk [vmem:[#allocation0 + $0x4c3] ss:$8 sm:$0xf] %vm3_vm0, %v970_v12   ;;  %975 = vst.msk [vmem:[#allocation0 + $0x4c3] ss:$8 sm:$0xf0] %vm3_vm0, %v970_v12  }
 0x147   :  { %964 = vst.msk [vmem:[#allocation0 + $0x483] ss:$8 sm:$0xf] %vm3_vm0, %v961_v13   ;;  %966 = vst.msk [vmem:[#allocation0 + $0x483] ss:$8 sm:$0xf0] %vm3_vm0, %v961_v13  }
 0x148   :  { %v1582_v18 = vld [vmem:[#allocation0 + $0x298] sm:$0xf]  ;;  %v1588_v19 = vld [vmem:[#allocation0 + $0x2a0] sm:$0xf]  ;;  %3091 = vst [vmem:[%s4712_s1 + $0x17c] sm:$0xf] %v1654_v14 }
 0x149   :  { %3076 = vst [vmem:[%s4712_s1 + $0x140] sm:$0xf] %v1564_v15  ;;  %3077 = vst [vmem:[%s4712_s1 + $0x144] sm:$0xf] %v1570_v16  ;;  %v1594_v20 = vld [vmem:[#allocation0 + $0x2a8] sm:$0xf] }
 0x14a   :  { %v1600_v21 = vld [vmem:[#allocation0 + $0x2b0] sm:$0xf]  ;;  %v1606_v22 = vld [vmem:[#allocation0 + $0x2b8] sm:$0xf]  ;;  %3078 = vst [vmem:[%s4712_s1 + $0x148] sm:$0xf] %v1576_v17 }
 0x14b   :  { %3079 = vst [vmem:[%s4712_s1 + $0x14c] sm:$0xf] %v1582_v18  ;;  %3080 = vst [vmem:[%s4712_s1 + $0x150] sm:$0xf] %v1588_v19  ;;  %v1708_v23 = vld [vmem:[#allocation0 + $0x340] sm:$0xf]  ;;  %v1060_v18 = vpop.permute.xlu1 %1059   ;;  %v1051_v19 = vpop.permute.xlu0 %1050  }
 0x14c   :  { %3081 = vst [vmem:[%s4712_s1 + $0x154] sm:$0xf] %v1594_v20  ;;  %3082 = vst [vmem:[%s4712_s1 + $0x158] sm:$0xf] %v1600_v21  ;;  %v1714_v24 = vld [vmem:[#allocation0 + $0x348] sm:$0xf] }
 0x14d   :  { %3083 = vst [vmem:[%s4712_s1 + $0x15c] sm:$0xf] %v1606_v22  ;;  %v1720_v25 = vld [vmem:[#allocation0 + $0x350] sm:$0xf]  ;;  %v1726_v28 = vld [vmem:[#allocation0 + $0x358] sm:$0xf] }
 0x14e   :  { %v1732_v29 = vld [vmem:[#allocation0 + $0x360] sm:$0xf]  ;;  %v1738_v30 = vld [vmem:[#allocation0 + $0x368] sm:$0xf]  ;;  %3100 = vst [vmem:[%s4712_s1 + $0x1a0] sm:$0xf] %v1708_v23 }
 0x14f   :  { %3101 = vst [vmem:[%s4712_s1 + $0x1a4] sm:$0xf] %v1714_v24  ;;  %3102 = vst [vmem:[%s4712_s1 + $0x1a8] sm:$0xf] %v1720_v25  ;;  %v1744_v31 = vld [vmem:[#allocation0 + $0x370] sm:$0xf] }
 0x150   :  { %991 = vst.msk [vmem:[#allocation0 + $0x543] ss:$8 sm:$0xf] %vm3_vm0, %v988_v26   ;;  %993 = vst.msk [vmem:[#allocation0 + $0x543] ss:$8 sm:$0xf0] %vm3_vm0, %v988_v26  }
 0x151   :  { %982 = vst.msk [vmem:[#allocation0 + $0x503] ss:$8 sm:$0xf] %vm3_vm0, %v979_v27   ;;  %984 = vst.msk [vmem:[#allocation0 + $0x503] ss:$8 sm:$0xf0] %vm3_vm0, %v979_v27  }
 0x152   :  { %v1750_v32 = vld [vmem:[#allocation0 + $0x378] sm:$0xf]  ;;  %v1660_v33 = vld [vmem:[#allocation0 + $0x300] sm:$0xf]  ;;  %3103 = vst [vmem:[%s4712_s1 + $0x1ac] sm:$0xf] %v1726_v28 }
 0x153   :  { %3104 = vst [vmem:[%s4712_s1 + $0x1b0] sm:$0xf] %v1732_v29  ;;  %3105 = vst [vmem:[%s4712_s1 + $0x1b4] sm:$0xf] %v1738_v30  ;;  %v1666_v34 = vld [vmem:[#allocation0 + $0x308] sm:$0xf] }
 0x154   :  { %v1672_v35 = vld [vmem:[#allocation0 + $0x310] sm:$0xf]  ;;  %v1678_v36 = vld [vmem:[#allocation0 + $0x318] sm:$0xf]  ;;  %3106 = vst [vmem:[%s4712_s1 + $0x1b8] sm:$0xf] %v1744_v31 }
 0x155   :  { %3107 = vst [vmem:[%s4712_s1 + $0x1bc] sm:$0xf] %v1750_v32  ;;  %3092 = vst [vmem:[%s4712_s1 + $0x180] sm:$0xf] %v1660_v33  ;;  %v1684_v37 = vld [vmem:[#allocation0 + $0x320] sm:$0xf]  ;;  %v1078_v32 = vpop.permute.xlu1 %1077   ;;  %v1069_v33 = vpop.permute.xlu0 %1068  }
 0x156   :  { %v1690_v38 = vld [vmem:[#allocation0 + $0x328] sm:$0xf]  ;;  %v1696_v39 = vld [vmem:[#allocation0 + $0x330] sm:$0xf]  ;;  %3093 = vst [vmem:[%s4712_s1 + $0x184] sm:$0xf] %v1666_v34 }
 0x157   :  { %3094 = vst [vmem:[%s4712_s1 + $0x188] sm:$0xf] %v1672_v35  ;;  %3095 = vst [vmem:[%s4712_s1 + $0x18c] sm:$0xf] %v1678_v36  ;;  %v1702_v42 = vld [vmem:[#allocation0 + $0x338] sm:$0xf] }
 0x158   :  { %3096 = vst [vmem:[%s4712_s1 + $0x190] sm:$0xf] %v1684_v37  ;;  %3097 = vst [vmem:[%s4712_s1 + $0x194] sm:$0xf] %v1690_v38  ;;  %v1804_v43 = vld [vmem:[#allocation0 + $0x3c0] sm:$0xf] }
 0x159   :  { %3098 = vst [vmem:[%s4712_s1 + $0x198] sm:$0xf] %v1696_v39  ;;  %v1810_v44 = vld [vmem:[#allocation0 + $0x3c8] sm:$0xf]  ;;  %3099 = vst [vmem:[%s4712_s1 + $0x19c] sm:$0xf] %v1702_v42 }
 0x15a   :  { %1009 = vst.msk [vmem:[#allocation0 + $0x5c3] ss:$8 sm:$0xf] %vm3_vm0, %v1006_v40   ;;  %1011 = vst.msk [vmem:[#allocation0 + $0x5c3] ss:$8 sm:$0xf0] %vm3_vm0, %v1006_v40  }
 0x15b   :  { %1000 = vst.msk [vmem:[#allocation0 + $0x583] ss:$8 sm:$0xf] %vm3_vm0, %v997_v41   ;;  %1002 = vst.msk [vmem:[#allocation0 + $0x583] ss:$8 sm:$0xf0] %vm3_vm0, %v997_v41  }
 0x15c   :  { %v1816_v45 = vld [vmem:[#allocation0 + $0x3d0] sm:$0xf]  ;;  %v1822_v46 = vld [vmem:[#allocation0 + $0x3d8] sm:$0xf]  ;;  %v1828_v47 = vld [vmem:[#allocation0 + $0x3e0] sm:$0xf] }
 0x15d   :  { %3116 = vst [vmem:[%s4712_s1 + $0x1e0] sm:$0xf] %v1804_v43  ;;  %3117 = vst [vmem:[%s4712_s1 + $0x1e4] sm:$0xf] %v1810_v44  ;;  %v1834_v48 = vld [vmem:[#allocation0 + $0x3e8] sm:$0xf] }
 0x15e   :  { %v1840_v49 = vld [vmem:[#allocation0 + $0x3f0] sm:$0xf]  ;;  %v1846_v50 = vld [vmem:[#allocation0 + $0x3f8] sm:$0xf]  ;;  %3118 = vst [vmem:[%s4712_s1 + $0x1e8] sm:$0xf] %v1816_v45 }
 0x15f   :  { %3119 = vst [vmem:[%s4712_s1 + $0x1ec] sm:$0xf] %v1822_v46  ;;  %3120 = vst [vmem:[%s4712_s1 + $0x1f0] sm:$0xf] %v1828_v47  ;;  %v1756_v51 = vld [vmem:[#allocation0 + $0x380] sm:$0xf] }
 0x160   :  { %v1762_v52 = vld [vmem:[#allocation0 + $0x388] sm:$0xf]  ;;  %v1768_v53 = vld [vmem:[#allocation0 + $0x390] sm:$0xf]  ;;  %3121 = vst [vmem:[%s4712_s1 + $0x1f4] sm:$0xf] %v1834_v48 }
 0x161   :  { %3122 = vst [vmem:[%s4712_s1 + $0x1f8] sm:$0xf] %v1840_v49  ;;  %3123 = vst [vmem:[%s4712_s1 + $0x1fc] sm:$0xf] %v1846_v50  ;;  %v1774_v56 = vld [vmem:[#allocation0 + $0x398] sm:$0xf] }
 0x162   :  { %v1780_v57 = vld [vmem:[#allocation0 + $0x3a0] sm:$0xf]  ;;  %v1786_v58 = vld [vmem:[#allocation0 + $0x3a8] sm:$0xf]  ;;  %3108 = vst [vmem:[%s4712_s1 + $0x1c0] sm:$0xf] %v1756_v51 }
 0x163   :  { %3109 = vst [vmem:[%s4712_s1 + $0x1c4] sm:$0xf] %v1762_v52  ;;  %3110 = vst [vmem:[%s4712_s1 + $0x1c8] sm:$0xf] %v1768_v53  ;;  %v1792_v59 = vld [vmem:[#allocation0 + $0x3b0] sm:$0xf] }
 0x164   :  { %1027 = vst.msk [vmem:[#allocation0 + $0x643] ss:$8 sm:$0xf] %vm3_vm0, %v1024_v54   ;;  %1029 = vst.msk [vmem:[#allocation0 + $0x643] ss:$8 sm:$0xf0] %vm3_vm0, %v1024_v54  }
 0x165   :  { %1018 = vst.msk [vmem:[#allocation0 + $0x603] ss:$8 sm:$0xf] %vm3_vm0, %v1015_v55   ;;  %1020 = vst.msk [vmem:[#allocation0 + $0x603] ss:$8 sm:$0xf0] %vm3_vm0, %v1015_v55  }
 0x166   :  { %v1798_v60 = vld [vmem:[#allocation0 + $0x3b8] sm:$0xf]  ;;  %3111 = vst [vmem:[%s4712_s1 + $0x1cc] sm:$0xf] %v1774_v56  ;;  %3112 = vst [vmem:[%s4712_s1 + $0x1d0] sm:$0xf] %v1780_v57 }
 0x167   :  { %3113 = vst [vmem:[%s4712_s1 + $0x1d4] sm:$0xf] %v1786_v58  ;;  %v1900_v61 = vld [vmem:[#allocation0 + $0x440] sm:$0xf]  ;;  %3114 = vst [vmem:[%s4712_s1 + $0x1d8] sm:$0xf] %v1792_v59 }
 0x168   :  { %3115 = vst [vmem:[%s4712_s1 + $0x1dc] sm:$0xf] %v1798_v60  ;;  %v1906_v62 = vld [vmem:[#allocation0 + $0x448] sm:$0xf]  ;;  %v1912_v63 = vld [vmem:[#allocation0 + $0x450] sm:$0xf] }
 0x169   :  { %v1918_v0 = vld [vmem:[#allocation0 + $0x458] sm:$0xf]  ;;  %3132 = vst [vmem:[%s4712_s1 + $0x220] sm:$0xf] %v1900_v61  ;;  %v1924_v1 = vld [vmem:[#allocation0 + $0x460] sm:$0xf] }
 0x16a   :  { %v1930_v2 = vld [vmem:[#allocation0 + $0x468] sm:$0xf]  ;;  %v1936_v3 = vld [vmem:[#allocation0 + $0x470] sm:$0xf]  ;;  %3133 = vst [vmem:[%s4712_s1 + $0x224] sm:$0xf] %v1906_v62 }
 0x16b   :  { %3134 = vst [vmem:[%s4712_s1 + $0x228] sm:$0xf] %v1912_v63  ;;  %3135 = vst [vmem:[%s4712_s1 + $0x22c] sm:$0xf] %v1918_v0  ;;  %v1942_v6 = vld [vmem:[#allocation0 + $0x478] sm:$0xf] }
 0x16c   :  { %v1852_v7 = vld [vmem:[#allocation0 + $0x400] sm:$0xf]  ;;  %v1858_v8 = vld [vmem:[#allocation0 + $0x408] sm:$0xf]  ;;  %3136 = vst [vmem:[%s4712_s1 + $0x230] sm:$0xf] %v1924_v1 }
 0x16d   :  { %3137 = vst [vmem:[%s4712_s1 + $0x234] sm:$0xf] %v1930_v2  ;;  %3138 = vst [vmem:[%s4712_s1 + $0x238] sm:$0xf] %v1936_v3  ;;  %v1864_v9 = vld [vmem:[#allocation0 + $0x410] sm:$0xf] }
 0x16e   :  { %1045 = vst.msk [vmem:[#allocation0 + $0x6c3] ss:$8 sm:$0xf] %vm3_vm0, %v1042_v4   ;;  %1047 = vst.msk [vmem:[#allocation0 + $0x6c3] ss:$8 sm:$0xf0] %vm3_vm0, %v1042_v4  }
 0x16f   :  { %1036 = vst.msk [vmem:[#allocation0 + $0x683] ss:$8 sm:$0xf] %vm3_vm0, %v1033_v5   ;;  %1038 = vst.msk [vmem:[#allocation0 + $0x683] ss:$8 sm:$0xf0] %vm3_vm0, %v1033_v5  }
 0x170   :  { %v1870_v10 = vld [vmem:[#allocation0 + $0x418] sm:$0xf]  ;;  %v1876_v11 = vld [vmem:[#allocation0 + $0x420] sm:$0xf]  ;;  %3139 = vst [vmem:[%s4712_s1 + $0x23c] sm:$0xf] %v1942_v6 }
 0x171   :  { %3124 = vst [vmem:[%s4712_s1 + $0x200] sm:$0xf] %v1852_v7  ;;  %3125 = vst [vmem:[%s4712_s1 + $0x204] sm:$0xf] %v1858_v8  ;;  %v1882_v12 = vld [vmem:[#allocation0 + $0x428] sm:$0xf] }
 0x172   :  { %v1888_v13 = vld [vmem:[#allocation0 + $0x430] sm:$0xf]  ;;  %v1894_v14 = vld [vmem:[#allocation0 + $0x438] sm:$0xf]  ;;  %3126 = vst [vmem:[%s4712_s1 + $0x208] sm:$0xf] %v1864_v9 }
 0x173   :  { %3127 = vst [vmem:[%s4712_s1 + $0x20c] sm:$0xf] %v1870_v10  ;;  %3128 = vst [vmem:[%s4712_s1 + $0x210] sm:$0xf] %v1876_v11  ;;  %v1996_v15 = vld [vmem:[#allocation0 + $0x4c0] sm:$0xf] }
 0x174   :  { %3129 = vst [vmem:[%s4712_s1 + $0x214] sm:$0xf] %v1882_v12  ;;  %3130 = vst [vmem:[%s4712_s1 + $0x218] sm:$0xf] %v1888_v13  ;;  %v2002_v16 = vld [vmem:[#allocation0 + $0x4c8] sm:$0xf] }
 0x175   :  { %3131 = vst [vmem:[%s4712_s1 + $0x21c] sm:$0xf] %v1894_v14  ;;  %v2008_v17 = vld [vmem:[#allocation0 + $0x4d0] sm:$0xf]  ;;  %v2014_v20 = vld [vmem:[#allocation0 + $0x4d8] sm:$0xf] }
 0x176   :  { %v2020_v21 = vld [vmem:[#allocation0 + $0x4e0] sm:$0xf]  ;;  %v2026_v22 = vld [vmem:[#allocation0 + $0x4e8] sm:$0xf]  ;;  %3148 = vst [vmem:[%s4712_s1 + $0x260] sm:$0xf] %v1996_v15 }
 0x177   :  { %3149 = vst [vmem:[%s4712_s1 + $0x264] sm:$0xf] %v2002_v16  ;;  %3150 = vst [vmem:[%s4712_s1 + $0x268] sm:$0xf] %v2008_v17  ;;  %v2032_v23 = vld [vmem:[#allocation0 + $0x4f0] sm:$0xf] }
 0x178   :  { %1063 = vst.msk [vmem:[#allocation0 + $0x743] ss:$8 sm:$0xf] %vm3_vm0, %v1060_v18   ;;  %1065 = vst.msk [vmem:[#allocation0 + $0x743] ss:$8 sm:$0xf0] %vm3_vm0, %v1060_v18  }
 0x179   :  { %1054 = vst.msk [vmem:[#allocation0 + $0x703] ss:$8 sm:$0xf] %vm3_vm0, %v1051_v19   ;;  %1056 = vst.msk [vmem:[#allocation0 + $0x703] ss:$8 sm:$0xf0] %vm3_vm0, %v1051_v19  }
 0x17a   :  { %v2038_v24 = vld [vmem:[#allocation0 + $0x4f8] sm:$0xf]  ;;  %v1948_v25 = vld [vmem:[#allocation0 + $0x480] sm:$0xf]  ;;  %3151 = vst [vmem:[%s4712_s1 + $0x26c] sm:$0xf] %v2014_v20 }
 0x17b   :  { %3152 = vst [vmem:[%s4712_s1 + $0x270] sm:$0xf] %v2020_v21  ;;  %3153 = vst [vmem:[%s4712_s1 + $0x274] sm:$0xf] %v2026_v22  ;;  %v1954_v26 = vld [vmem:[#allocation0 + $0x488] sm:$0xf] }
 0x17c   :  { %v1960_v27 = vld [vmem:[#allocation0 + $0x490] sm:$0xf]  ;;  %v1966_v28 = vld [vmem:[#allocation0 + $0x498] sm:$0xf]  ;;  %3154 = vst [vmem:[%s4712_s1 + $0x278] sm:$0xf] %v2032_v23 }
 0x17d   :  { %3155 = vst [vmem:[%s4712_s1 + $0x27c] sm:$0xf] %v2038_v24  ;;  %3140 = vst [vmem:[%s4712_s1 + $0x240] sm:$0xf] %v1948_v25  ;;  %v1972_v29 = vld [vmem:[#allocation0 + $0x4a0] sm:$0xf] }
 0x17e   :  { %v1978_v30 = vld [vmem:[#allocation0 + $0x4a8] sm:$0xf]  ;;  %v1984_v31 = vld [vmem:[#allocation0 + $0x4b0] sm:$0xf]  ;;  %3141 = vst [vmem:[%s4712_s1 + $0x244] sm:$0xf] %v1954_v26 }
 0x17f   :  { %3142 = vst [vmem:[%s4712_s1 + $0x248] sm:$0xf] %v1960_v27  ;;  %3143 = vst [vmem:[%s4712_s1 + $0x24c] sm:$0xf] %v1966_v28  ;;  %v1990_v34 = vld [vmem:[#allocation0 + $0x4b8] sm:$0xf] }
 0x180   :  { %3144 = vst [vmem:[%s4712_s1 + $0x250] sm:$0xf] %v1972_v29  ;;  %3145 = vst [vmem:[%s4712_s1 + $0x254] sm:$0xf] %v1978_v30  ;;  %v2092_v35 = vld [vmem:[#allocation0 + $0x540] sm:$0xf] }
 0x181   :  { %3146 = vst [vmem:[%s4712_s1 + $0x258] sm:$0xf] %v1984_v31  ;;  %v2098_v36 = vld [vmem:[#allocation0 + $0x548] sm:$0xf]  ;;  %3147 = vst [vmem:[%s4712_s1 + $0x25c] sm:$0xf] %v1990_v34 }
 0x182   :  { %1081 = vst.msk [vmem:[#allocation0 + $0x7c3] ss:$8 sm:$0xf] %vm3_vm0, %v1078_v32   ;;  %1083 = vst.msk [vmem:[#allocation0 + $0x7c3] ss:$8 sm:$0xf0] %vm3_vm0, %v1078_v32  }
 0x183   :  { %1072 = vst.msk [vmem:[#allocation0 + $0x783] ss:$8 sm:$0xf] %vm3_vm0, %v1069_v33   ;;  %1074 = vst.msk [vmem:[#allocation0 + $0x783] ss:$8 sm:$0xf0] %vm3_vm0, %v1069_v33  }
 0x184   :  { %v2104_v37 = vld [vmem:[#allocation0 + $0x550] sm:$0xf]  ;;  %v2110_v38 = vld [vmem:[#allocation0 + $0x558] sm:$0xf]  ;;  %v2116_v39 = vld [vmem:[#allocation0 + $0x560] sm:$0xf] }
 0x185   :  { %3164 = vst [vmem:[%s4712_s1 + $0x2a0] sm:$0xf] %v2092_v35  ;;  %3165 = vst [vmem:[%s4712_s1 + $0x2a4] sm:$0xf] %v2098_v36  ;;  %v2122_v40 = vld [vmem:[#allocation0 + $0x568] sm:$0xf] }
 0x186   :  { %v2128_v41 = vld [vmem:[#allocation0 + $0x570] sm:$0xf]  ;;  %v2134_v42 = vld [vmem:[#allocation0 + $0x578] sm:$0xf]  ;;  %3166 = vst [vmem:[%s4712_s1 + $0x2a8] sm:$0xf] %v2104_v37 }
 0x187   :  { %3167 = vst [vmem:[%s4712_s1 + $0x2ac] sm:$0xf] %v2110_v38  ;;  %3168 = vst [vmem:[%s4712_s1 + $0x2b0] sm:$0xf] %v2116_v39  ;;  %v2044_v43 = vld [vmem:[#allocation0 + $0x500] sm:$0xf] }
 0x188   :  { %v2050_v44 = vld [vmem:[#allocation0 + $0x508] sm:$0xf]  ;;  %v2056_v45 = vld [vmem:[#allocation0 + $0x510] sm:$0xf]  ;;  %3169 = vst [vmem:[%s4712_s1 + $0x2b4] sm:$0xf] %v2122_v40 }
 0x189   :  { %3170 = vst [vmem:[%s4712_s1 + $0x2b8] sm:$0xf] %v2128_v41  ;;  %3171 = vst [vmem:[%s4712_s1 + $0x2bc] sm:$0xf] %v2134_v42  ;;  %v2062_v46 = vld [vmem:[#allocation0 + $0x518] sm:$0xf] }
 0x18a   :  { %v2068_v47 = vld [vmem:[#allocation0 + $0x520] sm:$0xf]  ;;  %v2074_v48 = vld [vmem:[#allocation0 + $0x528] sm:$0xf]  ;;  %3156 = vst [vmem:[%s4712_s1 + $0x280] sm:$0xf] %v2044_v43 }
 0x18b   :  { %3157 = vst [vmem:[%s4712_s1 + $0x284] sm:$0xf] %v2050_v44  ;;  %3158 = vst [vmem:[%s4712_s1 + $0x288] sm:$0xf] %v2056_v45  ;;  %v2080_v49 = vld [vmem:[#allocation0 + $0x530] sm:$0xf] }
 0x18c   :  { %v2086_v50 = vld [vmem:[#allocation0 + $0x538] sm:$0xf]  ;;  %v2188_v51 = vld [vmem:[#allocation0 + $0x5c0] sm:$0xf]  ;;  %3159 = vst [vmem:[%s4712_s1 + $0x28c] sm:$0xf] %v2062_v46 }
 0x18d   :  { %3160 = vst [vmem:[%s4712_s1 + $0x290] sm:$0xf] %v2068_v47  ;;  %3161 = vst [vmem:[%s4712_s1 + $0x294] sm:$0xf] %v2074_v48  ;;  %v2194_v52 = vld [vmem:[#allocation0 + $0x5c8] sm:$0xf] }
 0x18e   :  { %3180 = vst [vmem:[%s4712_s1 + $0x2e0] sm:$0xf] %v2188_v51  ;;  %v2200_v53 = vld [vmem:[#allocation0 + $0x5d0] sm:$0xf]  ;;  %v2206_v54 = vld [vmem:[#allocation0 + $0x5d8] sm:$0xf] }
 0x18f   :  { %3162 = vst [vmem:[%s4712_s1 + $0x298] sm:$0xf] %v2080_v49  ;;  %3163 = vst [vmem:[%s4712_s1 + $0x29c] sm:$0xf] %v2086_v50  ;;  %v2212_v55 = vld [vmem:[#allocation0 + $0x5e0] sm:$0xf] }
 0x190   :  { %3181 = vst [vmem:[%s4712_s1 + $0x2e4] sm:$0xf] %v2194_v52  ;;  %3182 = vst [vmem:[%s4712_s1 + $0x2e8] sm:$0xf] %v2200_v53  ;;  %v2218_v56 = vld [vmem:[#allocation0 + $0x5e8] sm:$0xf] }
 0x191   :  { %3183 = vst [vmem:[%s4712_s1 + $0x2ec] sm:$0xf] %v2206_v54  ;;  %v2224_v57 = vld [vmem:[#allocation0 + $0x5f0] sm:$0xf]  ;;  %v2230_v58 = vld [vmem:[#allocation0 + $0x5f8] sm:$0xf] }
 0x192   :  { %v2140_v59 = vld [vmem:[#allocation0 + $0x580] sm:$0xf]  ;;  %v2146_v60 = vld [vmem:[#allocation0 + $0x588] sm:$0xf]  ;;  %3184 = vst [vmem:[%s4712_s1 + $0x2f0] sm:$0xf] %v2212_v55 }
 0x193   :  { %3185 = vst [vmem:[%s4712_s1 + $0x2f4] sm:$0xf] %v2218_v56  ;;  %3186 = vst [vmem:[%s4712_s1 + $0x2f8] sm:$0xf] %v2224_v57  ;;  %v2152_v61 = vld [vmem:[#allocation0 + $0x590] sm:$0xf] }
 0x194   :  { %3172 = vst [vmem:[%s4712_s1 + $0x2c0] sm:$0xf] %v2140_v59  ;;  %3173 = vst [vmem:[%s4712_s1 + $0x2c4] sm:$0xf] %v2146_v60  ;;  %v2158_v62 = vld [vmem:[#allocation0 + $0x598] sm:$0xf] }
 0x195   :  { %v2164_v63 = vld [vmem:[#allocation0 + $0x5a0] sm:$0xf]  ;;  %3187 = vst [vmem:[%s4712_s1 + $0x2fc] sm:$0xf] %v2230_v58  ;;  %3174 = vst [vmem:[%s4712_s1 + $0x2c8] sm:$0xf] %v2152_v61 }
 0x196   :  { %3175 = vst [vmem:[%s4712_s1 + $0x2cc] sm:$0xf] %v2158_v62  ;;  %v2170_v0 = vld [vmem:[#allocation0 + $0x5a8] sm:$0xf]  ;;  %v2176_v1 = vld [vmem:[#allocation0 + $0x5b0] sm:$0xf] }
 0x197   :  { %v2182_v2 = vld [vmem:[#allocation0 + $0x5b8] sm:$0xf]  ;;  %3176 = vst [vmem:[%s4712_s1 + $0x2d0] sm:$0xf] %v2164_v63  ;;  %v2284_v3 = vld [vmem:[#allocation0 + $0x640] sm:$0xf] }
 0x198   :  { %v2290_v4 = vld [vmem:[#allocation0 + $0x648] sm:$0xf]  ;;  %v2296_v5 = vld [vmem:[#allocation0 + $0x650] sm:$0xf]  ;;  %3177 = vst [vmem:[%s4712_s1 + $0x2d4] sm:$0xf] %v2170_v0 }
 0x199   :  { %3178 = vst [vmem:[%s4712_s1 + $0x2d8] sm:$0xf] %v2176_v1  ;;  %3179 = vst [vmem:[%s4712_s1 + $0x2dc] sm:$0xf] %v2182_v2  ;;  %v2302_v6 = vld [vmem:[#allocation0 + $0x658] sm:$0xf] }
 0x19a   :  { %3196 = vst [vmem:[%s4712_s1 + $0x320] sm:$0xf] %v2284_v3  ;;  %3197 = vst [vmem:[%s4712_s1 + $0x324] sm:$0xf] %v2290_v4  ;;  %v2308_v7 = vld [vmem:[#allocation0 + $0x660] sm:$0xf] }
 0x19b   :  { %3198 = vst [vmem:[%s4712_s1 + $0x328] sm:$0xf] %v2296_v5  ;;  %v2314_v8 = vld [vmem:[#allocation0 + $0x668] sm:$0xf]  ;;  %3199 = vst [vmem:[%s4712_s1 + $0x32c] sm:$0xf] %v2302_v6 }
 0x19c   :  { %v2320_v9 = vld [vmem:[#allocation0 + $0x670] sm:$0xf]  ;;  %v2326_v10 = vld [vmem:[#allocation0 + $0x678] sm:$0xf]  ;;  %v2236_v11 = vld [vmem:[#allocation0 + $0x600] sm:$0xf] }
 0x19d   :  { %3200 = vst [vmem:[%s4712_s1 + $0x330] sm:$0xf] %v2308_v7  ;;  %3201 = vst [vmem:[%s4712_s1 + $0x334] sm:$0xf] %v2314_v8  ;;  %v2242_v12 = vld [vmem:[#allocation0 + $0x608] sm:$0xf] }
 0x19e   :  { %3188 = vst [vmem:[%s4712_s1 + $0x300] sm:$0xf] %v2236_v11  ;;  %v2248_v13 = vld [vmem:[#allocation0 + $0x610] sm:$0xf]  ;;  %v2254_v14 = vld [vmem:[#allocation0 + $0x618] sm:$0xf] }
 0x19f   :  { %3202 = vst [vmem:[%s4712_s1 + $0x338] sm:$0xf] %v2320_v9  ;;  %3203 = vst [vmem:[%s4712_s1 + $0x33c] sm:$0xf] %v2326_v10  ;;  %v2260_v15 = vld [vmem:[#allocation0 + $0x620] sm:$0xf] }
 0x1a0   :  { %3189 = vst [vmem:[%s4712_s1 + $0x304] sm:$0xf] %v2242_v12  ;;  %3190 = vst [vmem:[%s4712_s1 + $0x308] sm:$0xf] %v2248_v13  ;;  %v2266_v16 = vld [vmem:[#allocation0 + $0x628] sm:$0xf] }
 0x1a1   :  { %3191 = vst [vmem:[%s4712_s1 + $0x30c] sm:$0xf] %v2254_v14  ;;  %v2272_v17 = vld [vmem:[#allocation0 + $0x630] sm:$0xf]  ;;  %v2278_v18 = vld [vmem:[#allocation0 + $0x638] sm:$0xf] }
 0x1a2   :  { %v2380_v19 = vld [vmem:[#allocation0 + $0x6c0] sm:$0xf]  ;;  %v2386_v20 = vld [vmem:[#allocation0 + $0x6c8] sm:$0xf]  ;;  %3192 = vst [vmem:[%s4712_s1 + $0x310] sm:$0xf] %v2260_v15 }
 0x1a3   :  { %3193 = vst [vmem:[%s4712_s1 + $0x314] sm:$0xf] %v2266_v16  ;;  %3194 = vst [vmem:[%s4712_s1 + $0x318] sm:$0xf] %v2272_v17  ;;  %v2392_v21 = vld [vmem:[#allocation0 + $0x6d0] sm:$0xf] }
 0x1a4   :  { %3212 = vst [vmem:[%s4712_s1 + $0x360] sm:$0xf] %v2380_v19  ;;  %3213 = vst [vmem:[%s4712_s1 + $0x364] sm:$0xf] %v2386_v20  ;;  %v2398_v22 = vld [vmem:[#allocation0 + $0x6d8] sm:$0xf] }
 0x1a5   :  { %3195 = vst [vmem:[%s4712_s1 + $0x31c] sm:$0xf] %v2278_v18  ;;  %v2404_v23 = vld [vmem:[#allocation0 + $0x6e0] sm:$0xf]  ;;  %3214 = vst [vmem:[%s4712_s1 + $0x368] sm:$0xf] %v2392_v21 }
 0x1a6   :  { %3215 = vst [vmem:[%s4712_s1 + $0x36c] sm:$0xf] %v2398_v22  ;;  %v2410_v24 = vld [vmem:[#allocation0 + $0x6e8] sm:$0xf]  ;;  %v2416_v25 = vld [vmem:[#allocation0 + $0x6f0] sm:$0xf] }
 0x1a7   :  { %v2422_v26 = vld [vmem:[#allocation0 + $0x6f8] sm:$0xf]  ;;  %3216 = vst [vmem:[%s4712_s1 + $0x370] sm:$0xf] %v2404_v23  ;;  %v2332_v27 = vld [vmem:[#allocation0 + $0x680] sm:$0xf] }
 0x1a8   :  { %v2338_v28 = vld [vmem:[#allocation0 + $0x688] sm:$0xf]  ;;  %v2344_v29 = vld [vmem:[#allocation0 + $0x690] sm:$0xf]  ;;  %3217 = vst [vmem:[%s4712_s1 + $0x374] sm:$0xf] %v2410_v24 }
 0x1a9   :  { %3218 = vst [vmem:[%s4712_s1 + $0x378] sm:$0xf] %v2416_v25  ;;  %3219 = vst [vmem:[%s4712_s1 + $0x37c] sm:$0xf] %v2422_v26  ;;  %v2350_v30 = vld [vmem:[#allocation0 + $0x698] sm:$0xf] }
 0x1aa   :  { %3204 = vst [vmem:[%s4712_s1 + $0x340] sm:$0xf] %v2332_v27  ;;  %3205 = vst [vmem:[%s4712_s1 + $0x344] sm:$0xf] %v2338_v28  ;;  %v2356_v31 = vld [vmem:[#allocation0 + $0x6a0] sm:$0xf] }
 0x1ab   :  { %3206 = vst [vmem:[%s4712_s1 + $0x348] sm:$0xf] %v2344_v29  ;;  %v2362_v32 = vld [vmem:[#allocation0 + $0x6a8] sm:$0xf]  ;;  %3207 = vst [vmem:[%s4712_s1 + $0x34c] sm:$0xf] %v2350_v30 }
 0x1ac   :  { %v2368_v33 = vld [vmem:[#allocation0 + $0x6b0] sm:$0xf]  ;;  %v2374_v34 = vld [vmem:[#allocation0 + $0x6b8] sm:$0xf]  ;;  %v2476_v35 = vld [vmem:[#allocation0 + $0x740] sm:$0xf] }
 0x1ad   :  { %3208 = vst [vmem:[%s4712_s1 + $0x350] sm:$0xf] %v2356_v31  ;;  %3209 = vst [vmem:[%s4712_s1 + $0x354] sm:$0xf] %v2362_v32  ;;  %v2482_v36 = vld [vmem:[#allocation0 + $0x748] sm:$0xf] }
 0x1ae   :  { %3228 = vst [vmem:[%s4712_s1 + $0x3a0] sm:$0xf] %v2476_v35  ;;  %v2488_v37 = vld [vmem:[#allocation0 + $0x750] sm:$0xf]  ;;  %v2494_v38 = vld [vmem:[#allocation0 + $0x758] sm:$0xf] }
 0x1af   :  { %3210 = vst [vmem:[%s4712_s1 + $0x358] sm:$0xf] %v2368_v33  ;;  %3211 = vst [vmem:[%s4712_s1 + $0x35c] sm:$0xf] %v2374_v34  ;;  %v2500_v39 = vld [vmem:[#allocation0 + $0x760] sm:$0xf] }
 0x1b0   :  { %3229 = vst [vmem:[%s4712_s1 + $0x3a4] sm:$0xf] %v2482_v36  ;;  %3230 = vst [vmem:[%s4712_s1 + $0x3a8] sm:$0xf] %v2488_v37  ;;  %v2506_v40 = vld [vmem:[#allocation0 + $0x768] sm:$0xf] }
 0x1b1   :  { %3231 = vst [vmem:[%s4712_s1 + $0x3ac] sm:$0xf] %v2494_v38  ;;  %v2512_v41 = vld [vmem:[#allocation0 + $0x770] sm:$0xf]  ;;  %v2518_v42 = vld [vmem:[#allocation0 + $0x778] sm:$0xf] }
 0x1b2   :  { %v2428_v43 = vld [vmem:[#allocation0 + $0x700] sm:$0xf]  ;;  %v2434_v44 = vld [vmem:[#allocation0 + $0x708] sm:$0xf]  ;;  %3232 = vst [vmem:[%s4712_s1 + $0x3b0] sm:$0xf] %v2500_v39 }
 0x1b3   :  { %3233 = vst [vmem:[%s4712_s1 + $0x3b4] sm:$0xf] %v2506_v40  ;;  %3234 = vst [vmem:[%s4712_s1 + $0x3b8] sm:$0xf] %v2512_v41  ;;  %v2440_v45 = vld [vmem:[#allocation0 + $0x710] sm:$0xf] }
 0x1b4   :  { %3220 = vst [vmem:[%s4712_s1 + $0x380] sm:$0xf] %v2428_v43  ;;  %3221 = vst [vmem:[%s4712_s1 + $0x384] sm:$0xf] %v2434_v44  ;;  %v2446_v46 = vld [vmem:[#allocation0 + $0x718] sm:$0xf] }
 0x1b5   :  { %v2452_v47 = vld [vmem:[#allocation0 + $0x720] sm:$0xf]  ;;  %3235 = vst [vmem:[%s4712_s1 + $0x3bc] sm:$0xf] %v2518_v42  ;;  %3222 = vst [vmem:[%s4712_s1 + $0x388] sm:$0xf] %v2440_v45 }
 0x1b6   :  { %3223 = vst [vmem:[%s4712_s1 + $0x38c] sm:$0xf] %v2446_v46  ;;  %3224 = vst [vmem:[%s4712_s1 + $0x390] sm:$0xf] %v2452_v47  ;;  %v2458_v48 = vld [vmem:[#allocation0 + $0x728] sm:$0xf] }
 0x1b7   :  { %v2464_v49 = vld [vmem:[#allocation0 + $0x730] sm:$0xf]  ;;  %v2470_v50 = vld [vmem:[#allocation0 + $0x738] sm:$0xf]  ;;  %3225 = vst [vmem:[%s4712_s1 + $0x394] sm:$0xf] %v2458_v48 }
 0x1b8   :  { %3226 = vst [vmem:[%s4712_s1 + $0x398] sm:$0xf] %v2464_v49  ;;  %3227 = vst [vmem:[%s4712_s1 + $0x39c] sm:$0xf] %v2470_v50  ;;  %v2572_v51 = vld [vmem:[#allocation0 + $0x7c0] sm:$0xf] }
 0x1b9   :  { %v2578_v52 = vld [vmem:[#allocation0 + $0x7c8] sm:$0xf]  ;;  %v2584_v53 = vld [vmem:[#allocation0 + $0x7d0] sm:$0xf]  ;;  %3244 = vst [vmem:[%s4712_s1 + $0x3e0] sm:$0xf] %v2572_v51 }
 0x1ba   :  { %3245 = vst [vmem:[%s4712_s1 + $0x3e4] sm:$0xf] %v2578_v52  ;;  %3246 = vst [vmem:[%s4712_s1 + $0x3e8] sm:$0xf] %v2584_v53  ;;  %v2590_v54 = vld [vmem:[#allocation0 + $0x7d8] sm:$0xf] }
 0x1bb   :  { %v2596_v55 = vld [vmem:[#allocation0 + $0x7e0] sm:$0xf]  ;;  %v2602_v56 = vld [vmem:[#allocation0 + $0x7e8] sm:$0xf]  ;;  %3247 = vst [vmem:[%s4712_s1 + $0x3ec] sm:$0xf] %v2590_v54 }
 0x1bc   :  { %3248 = vst [vmem:[%s4712_s1 + $0x3f0] sm:$0xf] %v2596_v55  ;;  %3249 = vst [vmem:[%s4712_s1 + $0x3f4] sm:$0xf] %v2602_v56  ;;  %v2608_v57 = vld [vmem:[#allocation0 + $0x7f0] sm:$0xf] }
 0x1bd   :  { %v2614_v58 = vld [vmem:[#allocation0 + $0x7f8] sm:$0xf]  ;;  %v2524_v59 = vld [vmem:[#allocation0 + $0x780] sm:$0xf]  ;;  %3250 = vst [vmem:[%s4712_s1 + $0x3f8] sm:$0xf] %v2608_v57 }
 0x1be   :  { %3251 = vst [vmem:[%s4712_s1 + $0x3fc] sm:$0xf] %v2614_v58  ;;  %3236 = vst [vmem:[%s4712_s1 + $0x3c0] sm:$0xf] %v2524_v59  ;;  %v2530_v60 = vld [vmem:[#allocation0 + $0x788] sm:$0xf] }
 0x1bf   :  { %v2536_v61 = vld [vmem:[#allocation0 + $0x790] sm:$0xf]  ;;  %v2542_v62 = vld [vmem:[#allocation0 + $0x798] sm:$0xf]  ;;  %3237 = vst [vmem:[%s4712_s1 + $0x3c4] sm:$0xf] %v2530_v60 }
 0x1c0   :  { %3238 = vst [vmem:[%s4712_s1 + $0x3c8] sm:$0xf] %v2536_v61  ;;  %3239 = vst [vmem:[%s4712_s1 + $0x3cc] sm:$0xf] %v2542_v62  ;;  %v2548_v63 = vld [vmem:[#allocation0 + $0x7a0] sm:$0xf] }
 0x1c1   :  { %v2554_v0 = vld [vmem:[#allocation0 + $0x7a8] sm:$0xf]  ;;  %v2560_v1 = vld [vmem:[#allocation0 + $0x7b0] sm:$0xf]  ;;  %3240 = vst [vmem:[%s4712_s1 + $0x3d0] sm:$0xf] %v2548_v63 }
 0x1c2   :  { %3241 = vst [vmem:[%s4712_s1 + $0x3d4] sm:$0xf] %v2554_v0  ;;  %3242 = vst [vmem:[%s4712_s1 + $0x3d8] sm:$0xf] %v2560_v1  ;;  %v2566_v2 = vld [vmem:[#allocation0 + $0x7b8] sm:$0xf] }
 0x1c3   :  { %3243 = vst [vmem:[%s4712_s1 + $0x3dc] sm:$0xf] %v2566_v2 }

// kernel: transformer_gate_attention_forward.1
= control target key start
LH: loop header
LB: loop body
LE: loop exit
PB: predicated region body
PF: predicated region fallthrough
CT: control target
= control target key end

     0   :  { %vm66_vm0 = vcmask 261120   ;;  %s5938_s0 = inlined_call_operand.vmem [shape: f32[16,32], index: 0, kind: input, shape index: {}]   ;;  %s5939_s1 = inlined_call_operand.vmem [shape: f32[4,16,16,8], index: 1, kind: input, shape index: {}]   ;;  %s5940_s2 = inlined_call_operand.vmem [shape: f32[16,16], index: 2, kind: input, shape index: {}]   ;;  %s5941_s3 = inlined_call_operand.vmem [shape: f32[2,16], index: 3, kind: input, shape index: {}]   ;;  %s5942_s4 = inlined_call_operand.vmem [shape: f32[32,32], index: 4, kind: input, shape index: {}]   ;;  %s5943_s5 = inlined_call_operand.vmem [shape: f32[1,32], index: 5, kind: input, shape index: {}]   ;;  %s5944_s6 = inlined_call_operand.vmem [shape: f32[4,32,8], index: 6, kind: input, shape index: {}]   ;;  %s5945_s7 = inlined_call_operand.vmem [shape: f32[4,1,8], index: 7, kind: input, shape index: {}]   ;;  %s5946_s8 = inlined_call_operand.vmem [shape: f32[4,1,8], index: 8, kind: input, shape index: {}]   ;;  %s5947_s9 = inlined_call_operand.vmem [shape: f32[4,1,8], index: 9, kind: input, shape index: {}]   ;;  %s5948_s10 = inlined_call_operand.vmem [shape: f32[1,32], index: 10, kind: input, shape index: {}]   ;;  %s5949_s11 = inlined_call_operand.vmem [shape: f32[1,32], index: 11, kind: input, shape index: {}]   ;;  %s5950_s12 = inlined_call_operand.vmem [shape: f32[1,32], index: 12, kind: input, shape index: {}]   ;;  %s5951_s13 = inlined_call_operand.vmem [shape: f32[32,5], index: 13, kind: input, shape index: {}]   ;;  %s5952_s14 = inlined_call_operand.vmem [shape: f32[1,5], index: 14, kind: input, shape index: {}]   ;;  %s5953_s15 = inlined_call_operand.hbm [shape: f32[2,5], index: 15, kind: output, shape index: {}]  }
   0x1   :  { %v148_v0 = vld [vmem:[%s5944_s6] sm:$0xff]  ;;  %v149_v1 = vld [vmem:[%s5944_s6 + $0x8] sm:$0xff]  ;;  %v150_v2 = vld [vmem:[%s5944_s6 + $0x10] sm:$0xff] }
   0x2   :  { %v4294_v3 = vpack.c.bf16 %v149_v1, %v148_v0  ;;  %v151_v4 = vld [vmem:[%s5944_s6 + $0x18] sm:$0xff]  ;;  %v4572_v5 = vld [vmem:[%s5938_s0] sm:$0xff]  ;;  %v56_v8 = vld [vmem:[%s5942_s4 + $0x8] sm:$0xff] }
   0x3   :  { %v4298_v6 = vpack.c.bf16 %v151_v4, %v150_v2  ;;  %4169 = vmatprep.mubr.msk.f32.mxu1 %vm66_vm0, %v4572_v5  ;;  %v55_v7 = vld [vmem:[%s5942_s4] sm:$0xff]  ;;  %v57_v9 = vld [vmem:[%s5942_s4 + $0x10] sm:$0xff]  ;;  %4158 = vmatprep.mubr.msk.f32.mxu0 %vm66_vm0, %v4572_v5  ;;  %v58_v11 = vld [vmem:[%s5942_s4 + $0x18] sm:$0xff] }
   0x4   :  { %4295 = vmatprep.subr.bf16.mxu1 %v4294_v3  ;;  %v4286_v10 = vpack.c.bf16 %v56_v8, %v55_v7 }
   0x5   :  { %20 = vsyncpa [#allocation3], 0  ;;  %4297 = vmatpush3.bf16.msra.mxu1 %v4294_v3  ;;  %v4290_v12 = vpack.c.bf16 %v58_v11, %v57_v9  ;;  %v4593_v13 = vld [vmem:[%s5938_s0 + $0x8] sm:$0xff]  ;;  %v290_v14 = vlaneseq  ;;  %v4468_v20 = vmov 1966171168   ;;  %vm496_vm1 = vcmask 64512  }
   0x6   :  { %4299 = vmatprep.subr.bf16.mxu1 %v4298_v6  ;;  %4287 = vmatprep.subr.bf16.mxu0 %v4286_v10  ;;  %v288_v21 = vunpack.c.l.s4 %v4468_v20  ;;  %v3908_v23 = vld [vmem:[%s5945_s7] ss:$0 sm:$0xff]  ;;  %vm4616_vm2 = vmpackc.low %vm496_vm1, %vm496_vm1  ;;  %v253_v42 = vld [vmem:[%s5939_s1 + $0x88] sm:$0xff]  ;;  %vm636_vm3 = vcmask 130112   ;;  %vm773_vm4 = vcmask 1041409   ;;  %vm775_vm5 = vcmask 1042434  }
   0x7   :  { %4289 = vmatpush3.bf16.msra.mxu0 %v4286_v10  ;;  %v291_v15 = vshrl.u32 %v290_v14, 7  ;;  %v626_v16 = vand.u32 127, %v290_v14  ;;  %v3912_v25 = vld [vmem:[%s5947_s9] ss:$0 sm:$0xff]  ;;  %v255_v49 = vld [vmem:[%s5939_s1 + $0x98] sm:$0xff]  ;;  %v237_v63 = vld [vmem:[%s5939_s1 + $0x8] sm:$0xff] }
   0x8   :  { %4291 = vmatprep.subr.bf16.mxu0 %v4290_v12  ;;  %v289_v22 = vunpack.c.0.s8 %v288_v21  ;;  %v3911_v27 = vld [vmem:[%s5946_s8] ss:$0 sm:$0xff]  ;;  %v257_v0 = vld [vmem:[%s5939_s1 + $0xa8] sm:$0xff]  ;;  %v254_v9 = vld [vmem:[%s5939_s1 + $0x90] sm:$0xff]  ;;  %vm777_vm6 = vcmask 1043459   ;;  %vm779_vm7 = vcmask 1044484  }
   0x9   :  { %4301 = vmatpush3.bf16.msra.mxu1 %v4298_v6  ;;  %v4599_v17 = vsub.s32 %v626_v16, %v291_v15  ;;  %v631_v18 = vadd.s32 4294967288, %v626_v16  ;;  %v4621_v38 = vsub.s32 0, %v291_v15  ;;  %v252_v43 = vld [vmem:[%s5939_s1 + $0x80] sm:$0xff]  ;;  %v261_v8 = vld [vmem:[%s5939_s1 + $0xc8] sm:$0xff]  ;;  %v238_v20 = vld [vmem:[%s5939_s1 + $0x10] sm:$0xff]  ;;  %vm781_vm8 = vcmask 1045509  }
   0xa   :  { %v4612_v28 = vsub.s32 %v289_v22, %v291_v15  ;;  %v236_v50 = vld [vmem:[%s5939_s1] sm:$0xff]  ;;  %vm783_vm9 = vcmask 1046534   ;;  %vm785_vm10 = vcmask 1047559   ;;  %vm889_vm12 = vcmask 130048   ;;  %s4471_s17 = smov 24   ;;  %s4476_s30 = smov [#allocation2]  }
   0xb   :  { %4293 = vmatpush3.bf16.msra.mxu0 %v4290_v12  ;;  %v4601_v19 = vsub.s32 %v631_v18, %v291_v15  ;;  %v256_v18 = vld [vmem:[%s5939_s1 + $0xa0] sm:$0xff]  ;;  %vm3526_vm14 = vcmask 195584   ;;  %vm4473_vm15 = vmmov 0  }
   0xc   :  { %4170 = vmatmul.mubr.msk.f32.vlgmr.msra.gmra.mrb[0].mxu1 %vm66_vm0, %v4593_v13 }
   0xe   :  { %4159 = vmatmul.mubr.msk.f32.vlgmr.msra.gmra.mrb[0].mxu0 %vm66_vm0, %v4593_v13 }
  0xdf   :  { %v4171_v24 = vpop.f32.mrb[0].mxu1 }
  0xe0   :  { %v231_v26 = vadd.f32 %v4171_v24, %v3908_v23  ;;  %v225_v29 = vpop.f32.mrb[1].mxu1 }
  0xe1   :  { %v226_v30 = vadd.f32 %v3908_v23, %v225_v29  ;;  %v239_v29 = vld [vmem:[%s5939_s1 + $0x18] sm:$0xff] }
  0xe2   :  { %v283_v31 = vadd.f32 %v3912_v25, %v231_v26  ;;  %v275_v55 = vadd.f32 %v3911_v27, %v231_v26 }
  0xe3   :  { %v274_v33 = vadd.f32 %v3911_v27, %v226_v30  ;;  %v282_v34 = vadd.f32 %v3912_v25, %v226_v30  ;;  %v4302_v35 = vpack.c.bf16 %v231_v26, %v226_v30  ;;  %v260_v27 = vld [vmem:[%s5939_s1 + $0xc0] sm:$0xff] }
  0xe4   :  { %v335_v36 = vcombine.high %v283_v31, %v283_v31  ;;  %v342_v37 = vrot.slane %v283_v31, %v4612_v28 }
  0xe5   :  { %v293_v39 = vrot.slane %v282_v34, %v4612_v28  ;;  %4304 = vmatprep.subr.msk.bf16.mxu0 %vm4616_vm2, %v4302_v35  ;;  %4176 = vmatprep.mubr.msk.f32.mxu0 %vm496_vm1, %v274_v33  ;;  %v286_v10 = vcombine.high %v282_v34, %v282_v34 }
  0xe6   :  { %4309 = vmatprep.subr.bf16.mxu1 %v4302_v35  ;;  %4307 = vmatpush3.bf16.xpose.msk.msra.mxu0 %vm4616_vm2, %v4302_v35  ;;  %v358_v40 = vrot.slane %v342_v37, %v4612_v28  ;;  %v350_v41 = vcombine.high %v342_v37, %v342_v37  ;;  %v4638_v45 = vrot.slane %v335_v36, %v4612_v28  ;;  %v240_v37 = vld [vmem:[%s5939_s1 + $0x20] sm:$0xff] }
  0xe7   :  { %4311 = vmatpush3.bf16.msra.mxu1 %v4302_v35  ;;  %v309_v44 = vrot.slane %v293_v39, %v4612_v28  ;;  %v301_v58 = vcombine.high %v293_v39, %v293_v39  ;;  %v4691_v22 = vrot.slane %v286_v10, %v4612_v28  ;;  %v241_v39 = vld [vmem:[%s5939_s1 + $0x28] sm:$0xff] }
  0xe8   :  { %v419_v46 = vrot.slane %v358_v40, %v4621_v38  ;;  %v4642_v47 = vrot.slane %v350_v41, %v4612_v28  ;;  %v380_v48 = vcombine.high %v358_v40, %v358_v40  ;;  %v4656_v57 = vrot.slane %v4638_v45, %v4612_v28  ;;  %v265_v10 = vld [vmem:[%s5939_s1 + $0xe8] sm:$0xff] }
  0xe9   :  { %v387_v51 = vrot.slane %v309_v44, %v4621_v38  ;;  %v4668_v2 = vrot.slane %v301_v58, %v4612_v28  ;;  %v331_v21 = vcombine.high %v309_v44, %v309_v44  ;;  %v4703_v33 = vrot.slane %v4691_v22, %v4612_v28 }
  0xea   :  { %v481_v52 = vmul.f32 %v419_v46, %v253_v42  ;;  %v480_v53 = vmul.f32 %v419_v46, %v252_v43  ;;  %v423_v54 = vrot.slane %v4642_v47, %v4621_v38  ;;  %v427_v56 = vrot.slane %v380_v48, %v4621_v38  ;;  %v245_v46 = vld [vmem:[%s5939_s1 + $0x48] sm:$0xff]  ;;  %v244_v48 = vld [vmem:[%s5939_s1 + $0x40] sm:$0xff] }
  0xeb   :  { %v464_v62 = vmul.f32 %v387_v51, %v236_v50  ;;  %v465_v1 = vmul.f32 %v387_v51, %v237_v63  ;;  %v435_v7 = vrot.slane %v4656_v57, %v4621_v38  ;;  %v391_v11 = vrot.slane %v4668_v2, %v4621_v38 }
  0xec   :  { %v548_v59 = vsel %vm496_vm1, %v481_v52, 0.0  ;;  %v545_v60 = vsel %vm496_vm1, %v480_v53, 0.0  ;;  %v483_v61 = vmul.f32 %v423_v54, %v255_v49  ;;  %v485_v6 = vmul.f32 %v427_v56, %v257_v0  ;;  %v263_v0 = vld [vmem:[%s5939_s1 + $0xd8] sm:$0xff] }
  0xed   :  { %549 = vadd.xlane.f32.xlu1 %v548_v59  ;;  %546 = vadd.xlane.f32.xlu0 %v545_v60  ;;  %v497_v4 = vsel %vm496_vm1, %v464_v62, 0.0  ;;  %v500_v14 = vsel %vm496_vm1, %v465_v1, 0.0  ;;  %v489_v15 = vmul.f32 %v435_v7, %v261_v8  ;;  %v482_v16 = vmul.f32 %v423_v54, %v254_v9  ;;  %v262_v1 = vld [vmem:[%s5939_s1 + $0xd0] sm:$0xff] }
  0xee   :  { %4177 = vmatmul.mubr.msk.f32.vlgmr.msra.gmra.mrb[2].mxu0 %vm496_vm1, %v275_v55  ;;  %v554_v3 = vsel %vm496_vm1, %v483_v61, 0.0  ;;  %v560_v12 = vsel %vm496_vm1, %v485_v6, 0.0  ;;  %v484_v25 = vmul.f32 %v427_v56, %v256_v18  ;;  %v466_v26 = vmul.f32 %v391_v11, %v238_v20  ;;  %v243_v18 = vld [vmem:[%s5939_s1 + $0x38] sm:$0xff] }
  0xef   :  { %v572_v23 = vsel %vm496_vm1, %v489_v15, 0.0  ;;  %v551_v24 = vsel %vm496_vm1, %v482_v16, 0.0  ;;  %v488_v30 = vmul.f32 %v435_v7, %v260_v27  ;;  %v467_v31 = vmul.f32 %v391_v11, %v239_v29  ;;  %v264_v11 = vld [vmem:[%s5939_s1 + $0xe0] sm:$0xff]  ;;  %v247_v29 = vld [vmem:[%s5939_s1 + $0x58] sm:$0xff] }
  0xf0   :  { %v557_v34 = vsel %vm496_vm1, %v484_v25, 0.0  ;;  %v503_v35 = vsel %vm496_vm1, %v466_v26, 0.0  ;;  %v395_v36 = vrot.slane %v331_v21, %v4621_v38  ;;  %v403_v42 = vrot.slane %v4703_v33, %v4621_v38  ;;  %v242_v21 = vld [vmem:[%s5939_s1 + $0x30] sm:$0xff] }
  0xf1   :  { %555 = vadd.xlane.f32.xlu1 %v554_v3  ;;  %498 = vadd.xlane.f32.xlu0 %v497_v4  ;;  %v569_v40 = vsel %vm496_vm1, %v488_v30, 0.0  ;;  %v506_v41 = vsel %vm496_vm1, %v467_v31, 0.0  ;;  %v382_v49 = vcombine.high %v4642_v47, %v4642_v47  ;;  %v351_v50 = vcombine.high %v4638_v45, %v4638_v45  ;;  %v259_v47 = vld [vmem:[%s5939_s1 + $0xb8] sm:$0xff]  ;;  %v258_v45 = vld [vmem:[%s5939_s1 + $0xb0] sm:$0xff] }
  0xf2   :  { %v468_v43 = vmul.f32 %v395_v36, %v240_v37  ;;  %v469_v44 = vmul.f32 %v395_v36, %v241_v39  ;;  %v473_v51 = vmul.f32 %v403_v42, %v245_v46  ;;  %v472_v52 = vmul.f32 %v403_v42, %v244_v48  ;;  %v246_v30 = vld [vmem:[%s5939_s1 + $0x50] sm:$0xff]  ;;  %v249_v37 = vld [vmem:[%s5939_s1 + $0x68] sm:$0xff]  ;;  %v248_v39 = vld [vmem:[%s5939_s1 + $0x60] sm:$0xff] }
  0xf3   :  { %v431_v55 = vrot.slane %v382_v49, %v4621_v38  ;;  %v4732_v56 = vrot.slane %v351_v50, %v4612_v28  ;;  %v381_v59 = vcombine.high %v4656_v57, %v4656_v57  ;;  %v333_v57 = vcombine.high %v4668_v2, %v4668_v2  ;;  %v251_v49 = vld [vmem:[%s5939_s1 + $0x78] sm:$0xff]  ;;  %v250_v50 = vld [vmem:[%s5939_s1 + $0x70] sm:$0xff] }
  0xf4   :  { %v509_v53 = vsel %vm496_vm1, %v468_v43, 0.0  ;;  %v512_v54 = vsel %vm496_vm1, %v469_v44, 0.0  ;;  %v524_v58 = vsel %vm496_vm1, %v473_v51, 0.0  ;;  %v521_v60 = vsel %vm496_vm1, %v472_v52, 0.0 }
  0xf5   :  { %561 = vadd.xlane.f32.xlu1 %v560_v12  ;;  %501 = vadd.xlane.f32.xlu0 %v500_v14  ;;  %v487_v61 = vmul.f32 %v431_v55, %v259_v47  ;;  %v486_v62 = vmul.f32 %v431_v55, %v258_v45  ;;  %v439_v63 = vrot.slane %v4732_v56, %v4621_v38  ;;  %v266_v47 = vld [vmem:[%s5939_s1 + $0xf0] sm:$0xff] }
  0xf6   :  { %v443_v3 = vrot.slane %v381_v59, %v4621_v38  ;;  %v302_v4 = vcombine.high %v4691_v22, %v4691_v22  ;;  %v399_v12 = vrot.slane %v333_v57, %v4621_v38  ;;  %v383_v48 = vcombine.high %v4732_v56, %v4732_v56  ;;  %v267_v56 = vld [vmem:[%s5939_s1 + $0xf8] sm:$0xff] }
  0xf7   :  { %v566_v6 = vsel %vm496_vm1, %v487_v61, 0.0  ;;  %v563_v7 = vsel %vm496_vm1, %v486_v62, 0.0  ;;  %v491_v8 = vmul.f32 %v439_v63, %v263_v0  ;;  %v490_v9 = vmul.f32 %v439_v63, %v262_v1  ;;  %v4819_v63 = vpop.f32.mrb[0].mxu0 }
  0xf8   :  { %v493_v2 = vmul.f32 %v443_v3, %v265_v10  ;;  %v492_v16 = vmul.f32 %v443_v3, %v264_v11  ;;  %v330_v20 = vrot.slane %v302_v4, %v4612_v28  ;;  %v471_v22 = vmul.f32 %v399_v12, %v243_v18  ;;  %v4821_v0 = vpop.f32.mrb[1].mxu0 }
  0xf9   :  { %573 = vadd.xlane.f32.xlu1 %v572_v23  ;;  %552 = vadd.xlane.f32.xlu0 %v551_v24  ;;  %v578_v14 = vsel %vm496_vm1, %v491_v8, 0.0  ;;  %v575_v15 = vsel %vm496_vm1, %v490_v9, 0.0  ;;  %v332_v23 = vcombine.high %v4703_v33, %v4703_v33  ;;  %v470_v26 = vmul.f32 %v399_v12, %v242_v21 }
  0xfa   :  { %v584_v24 = vsel %vm496_vm1, %v493_v2, 0.0  ;;  %v581_v25 = vsel %vm496_vm1, %v492_v16, 0.0  ;;  %v407_v27 = vrot.slane %v330_v20, %v4621_v38  ;;  %v518_v31 = vsel %vm496_vm1, %v471_v22, 0.0 }
  0xfb   :  { %v411_v33 = vrot.slane %v332_v23, %v4621_v38  ;;  %v447_v55 = vrot.slane %v383_v48, %v4621_v38 }
  0xfc   :  { %v474_v36 = vmul.f32 %v407_v27, %v246_v30 }
  0xfd   :  { %558 = vadd.xlane.f32.xlu0 %v557_v34  ;;  %504 = vadd.xlane.f32.xlu1 %v503_v35  ;;  %v515_v34 = vsel %vm496_vm1, %v470_v26, 0.0  ;;  %v475_v35 = vmul.f32 %v407_v27, %v247_v29  ;;  %v476_v42 = vmul.f32 %v411_v33, %v248_v39  ;;  %v495_v59 = vmul.f32 %v447_v55, %v267_v56 }
  0xfe   :  { %v527_v44 = vsel %vm496_vm1, %v474_v36, 0.0 }
  0xff   :  { %v530_v43 = vsel %vm496_vm1, %v475_v35, 0.0  ;;  %v533_v52 = vsel %vm496_vm1, %v476_v42, 0.0  ;;  %v590_v61 = vsel %vm496_vm1, %v495_v59, 0.0 }
 0x101   :  { %570 = vadd.xlane.f32.xlu0 %v569_v40  ;;  %507 = vadd.xlane.f32.xlu1 %v506_v41  ;;  %v334_v40 = vcombine.high %v330_v20, %v330_v20  ;;  %v477_v41 = vmul.f32 %v411_v33, %v249_v37 }
 0x103   :  { %v415_v46 = vrot.slane %v334_v40, %v4621_v38  ;;  %v536_v51 = vsel %vm496_vm1, %v477_v41, 0.0 }
 0x105   :  { %510 = vadd.xlane.f32.xlu0 %v509_v53  ;;  %513 = vadd.xlane.f32.xlu1 %v512_v54  ;;  %v479_v53 = vmul.f32 %v415_v46, %v251_v49  ;;  %v478_v54 = vmul.f32 %v415_v46, %v250_v50 }
 0x107   :  { %v542_v45 = vsel %vm496_vm1, %v479_v53, 0.0 }
 0x109   :  { %525 = vadd.xlane.f32.xlu1 %v524_v58  ;;  %522 = vadd.xlane.f32.xlu0 %v521_v60  ;;  %v539_v58 = vsel %vm496_vm1, %v478_v54, 0.0  ;;  %v494_v60 = vmul.f32 %v447_v55, %v266_v47 }
 0x10b   :  { %v587_v62 = vsel %vm496_vm1, %v494_v60, 0.0 }
 0x10d   :  { %567 = vadd.xlane.f32.xlu1 %v566_v6  ;;  %564 = vadd.xlane.f32.xlu0 %v563_v7 }
 0x111   :  { %579 = vadd.xlane.f32.xlu1 %v578_v14  ;;  %576 = vadd.xlane.f32.xlu0 %v575_v15 }
 0x115   :  { %585 = vadd.xlane.f32.xlu1 %v584_v24  ;;  %582 = vadd.xlane.f32.xlu0 %v581_v25 }
 0x119   :  { %519 = vadd.xlane.f32.xlu1 %v518_v31  ;;  %516 = vadd.xlane.f32.xlu0 %v515_v34 }
 0x11d   :  { %531 = vadd.xlane.f32.xlu1 %v530_v43  ;;  %528 = vadd.xlane.f32.xlu0 %v527_v44 }
 0x121   :  { %537 = vadd.xlane.f32.xlu1 %v536_v51  ;;  %534 = vadd.xlane.f32.xlu0 %v533_v52 }
 0x125   :  { %543 = vadd.xlane.f32.xlu1 %v542_v45  ;;  %540 = vadd.xlane.f32.xlu0 %v539_v58 }
 0x129   :  { %591 = vadd.xlane.f32.xlu1 %v590_v61  ;;  %588 = vadd.xlane.f32.xlu0 %v587_v62 }
 0x17a   :  { %v550_v1 = vpop.xlane.xlu1 %549  ;;  %v547_v3 = vpop.xlane.xlu0 %546 }
 0x17b   :  { %v708_v35 = vrot.slane %v550_v1, %v4601_v19  ;;  %v704_v36 = vrot.slane %v547_v3, %v4599_v17 }
 0x17d   :  { %v709_v49 = vsel %vm636_vm3, %v708_v35, %v704_v36 }
 0x17e   :  { %v556_v57 = vpop.xlane.xlu1 %555  ;;  %v499_v4 = vpop.xlane.xlu0 %498 }
 0x17f   :  { %v717_v39 = vrot.slane %v556_v57, %v4601_v19  ;;  %v630_v53 = vrot.slane %v499_v4, %v4599_v17 }
 0x182   :  { %v562_v6 = vpop.xlane.xlu1 %561  ;;  %v502_v7 = vpop.xlane.xlu0 %501 }
 0x183   :  { %v726_v41 = vrot.slane %v562_v6, %v4601_v19  ;;  %v635_v42 = vrot.slane %v502_v7, %v4601_v19 }
 0x185   :  { %v637_v59 = vsel %vm636_vm3, %v635_v42, %v630_v53 }
 0x186   :  { %v4823_v8 = vpop.xlane.xlu1 %573  ;;  %v553_v9 = vpop.xlane.xlu0 %552 }
 0x187   :  { %v713_v31 = vrot.slane %v553_v9, %v4599_v17  ;;  %v744_v60 = vrot.slane %v4823_v8, %v4601_v19 }
 0x189   :  { %v718_v43 = vsel %vm636_vm3, %v717_v39, %v713_v31 }
 0x18a   :  { %v559_v10 = vpop.xlane.xlu0 %558  ;;  %v505_v11 = vpop.xlane.xlu1 %504  ;;  %v787_v47 = vsel %vm773_vm4, %v718_v43, %v709_v49  ;;  %v4921_v43 = vld [vmem:[%s5940_s2 + $0x8] sm:$0xff]  ;;  %v4928_v49 = vld [vmem:[%s5940_s2] sm:$0xff]  ;;  %s4470_s2 = smov 16  }
 0x18b   :  { %v722_v37 = vrot.slane %v559_v10, %v4599_v17  ;;  %v641_v44 = vrot.slane %v505_v11, %v4599_v17  ;;  %vm886_vm11 = vcmp.gt.f32.partialorder %v4921_v43, 0.0  ;;  %vm885_vm13 = vcmp.gt.f32.partialorder %v4928_v49, 0.0 }
 0x18d   :  { %v727_v50 = vsel %vm636_vm3, %v726_v41, %v722_v37 }
 0x18e   :  { %v4825_v2 = vpop.xlane.xlu0 %570  ;;  %v508_v12 = vpop.xlane.xlu1 %507  ;;  %v788_v61 = vsel %vm775_vm5, %v727_v50, %v787_v47 }
 0x18f   :  { %v645_v40 = vrot.slane %v508_v12, %v4601_v19  ;;  %v740_v62 = vrot.slane %v4825_v2, %v4599_v17 }
 0x191   :  { %v646_v54 = vsel %vm636_vm3, %v645_v40, %v641_v44 }
 0x192   :  { %v511_v14 = vpop.xlane.xlu0 %510  ;;  %v514_v15 = vpop.xlane.xlu1 %513  ;;  %v774_v1 = vsel %vm773_vm4, %v646_v54, %v637_v59 }
 0x193   :  { %v650_v51 = vrot.slane %v511_v14, %v4599_v17  ;;  %v654_v52 = vrot.slane %v514_v15, %v4601_v19 }
 0x195   :  { %v655_v3 = vsel %vm636_vm3, %v654_v52, %v650_v51 }
 0x196   :  { %v4827_v16 = vpop.xlane.xlu1 %525  ;;  %v4829_v18 = vpop.xlane.xlu0 %522 }
 0x197   :  { %v672_v57 = vrot.slane %v4827_v16, %v4601_v19  ;;  %v668_v4 = vrot.slane %v4829_v18, %v4599_v17 }
 0x19a   :  { %v568_v20 = vpop.xlane.xlu1 %567  ;;  %v565_v21 = vpop.xlane.xlu0 %564 }
 0x19b   :  { %v735_v55 = vrot.slane %v568_v20, %v4601_v19  ;;  %v731_v56 = vrot.slane %v565_v21, %v4599_v17 }
 0x19d   :  { %v736_v9 = vsel %vm636_vm3, %v735_v55, %v731_v56 }
 0x19e   :  { %v4831_v22 = vpop.xlane.xlu1 %579  ;;  %v4833_v23 = vpop.xlane.xlu0 %576 }
 0x19f   :  { %v753_v8 = vrot.slane %v4831_v22, %v4601_v19  ;;  %v749_v10 = vrot.slane %v4833_v23, %v4599_v17  ;;  %v776_v22 = vsel %vm775_vm5, %v655_v3, %v774_v1  ;;  %v789_v23 = vsel %vm777_vm6, %v736_v9, %v788_v61  ;;  %v3919_v9 = vld [vmem:[%s5944_s6 + $0x20] sm:$0xff] }
 0x1a2   :  { %v4835_v24 = vpop.xlane.xlu1 %585  ;;  %v4837_v25 = vpop.xlane.xlu0 %582 }
 0x1a3   :  { %v762_v11 = vrot.slane %v4835_v24, %v4601_v19  ;;  %v758_v2 = vrot.slane %v4837_v25, %v4599_v17 }
 0x1a5   :  { %v763_v31 = vsel %vm636_vm3, %v762_v11, %v758_v2 }
 0x1a6   :  { %v520_v26 = vpop.xlane.xlu1 %519  ;;  %v517_v27 = vpop.xlane.xlu0 %516 }
 0x1a7   :  { %v663_v45 = vrot.slane %v520_v26, %v4601_v19  ;;  %v659_v58 = vrot.slane %v517_v27, %v4599_v17  ;;  %v754_v26 = vsel %vm636_vm3, %v753_v8, %v749_v10  ;;  %v3920_v8 = vld [vmem:[%s5944_s6 + $0x28] sm:$0xff] }
 0x1a8   :  { %v4312_v10 = vpack.c.bf16 %v3920_v8, %v3919_v9 }
 0x1a9   :  { %v664_v12 = vsel %vm636_vm3, %v663_v45, %v659_v58 }
 0x1aa   :  { %v4839_v29 = vpop.xlane.xlu1 %531  ;;  %v4841_v30 = vpop.xlane.xlu0 %528  ;;  %v778_v27 = vsel %vm777_vm6, %v664_v12, %v776_v22  ;;  %4313 = vmatprep.subr.bf16.mxu1 %v4312_v10 }
 0x1ab   :  { %v681_v14 = vrot.slane %v4839_v29, %v4601_v19  ;;  %v677_v15 = vrot.slane %v4841_v30, %v4599_v17  ;;  %v745_v29 = vsel %vm636_vm3, %v744_v60, %v740_v62 }
 0x1ac   :  { %v790_v35 = vsel %vm779_vm7, %v745_v29, %v789_v23  ;;  %v3961_v29 = vld [vmem:[%s5946_s8 + $0x1] ss:$0 sm:$0xff] }
 0x1ad   :  { %v682_v30 = vsel %vm636_vm3, %v681_v14, %v677_v15  ;;  %v791_v37 = vsel %vm781_vm8, %v754_v26, %v790_v35  ;;  %v3921_v14 = vld [vmem:[%s5944_s6 + $0x30] sm:$0xff]  ;;  %v3922_v15 = vld [vmem:[%s5944_s6 + $0x38] sm:$0xff]  ;;  %v3962_v26 = vld [vmem:[%s5947_s9 + $0x1] ss:$0 sm:$0xff] }
 0x1ae   :  { %v4844_v33 = vpop.xlane.xlu1 %537  ;;  %v4846_v34 = vpop.xlane.xlu0 %534  ;;  %v792_v41 = vsel %vm783_vm9, %v763_v31, %v791_v37 }
 0x1af   :  { %v690_v16 = vrot.slane %v4844_v33, %v4601_v19  ;;  %v686_v18 = vrot.slane %v4846_v34, %v4599_v17  ;;  %v673_v33 = vsel %vm636_vm3, %v672_v57, %v668_v4 }
 0x1b0   :  { %v780_v40 = vsel %vm779_vm7, %v673_v33, %v778_v27 }
 0x1b1   :  { %v691_v36 = vsel %vm636_vm3, %v690_v16, %v686_v18  ;;  %v782_v42 = vsel %vm781_vm8, %v682_v30, %v780_v40 }
 0x1b2   :  { %v544_v46 = vpop.xlane.xlu1 %543  ;;  %v541_v48 = vpop.xlane.xlu0 %540 }
 0x1b3   :  { %v699_v24 = vrot.slane %v544_v46, %v4601_v19  ;;  %v695_v25 = vrot.slane %v541_v48, %v4599_v17  ;;  %v784_v48 = vsel %vm783_vm9, %v691_v36, %v782_v42  ;;  %v3946_v42 = vld [vmem:[%s5939_s1 + $0x188] sm:$0xff] }
 0x1b5   :  { %v700_v39 = vsel %vm636_vm3, %v699_v24, %v695_v25  ;;  %v3924_v24 = vld [vmem:[%s5945_s7 + $0x1] ss:$0 sm:$0xff] }
 0x1b6   :  { %v592_v6 = vpop.xlane.xlu1 %591  ;;  %v589_v7 = vpop.xlane.xlu0 %588  ;;  %v786_v51 = vsel %vm785_vm10, %v700_v39, %v784_v48 }
 0x1b7   :  { %v771_v20 = vrot.slane %v592_v6, %v4601_v19  ;;  %v767_v21 = vrot.slane %v589_v7, %v4599_v17 }
 0x1b9   :  { %v772_v34 = vsel %vm636_vm3, %v771_v20, %v767_v21  ;;  %v4316_v21 = vpack.c.bf16 %v3922_v15, %v3921_v14 }
 0x1ba   :  { %v793_v44 = vsel %vm785_vm10, %v772_v34, %v792_v41 }
 0x1c1   :  { %v4178_v46 = vpop.f32.mrb[2].mxu0 }
 0x1c2   :  { %v880_v50 = vadd.f32 %v4178_v46, %v793_v44  ;;  %v874_v52 = vpop.f32.mrb[3].mxu0  ;;  %v3945_v44 = vld [vmem:[%s5939_s1 + $0x180] sm:$0xff] }
 0x1c3   :  { %v875_v53 = vadd.f32 %v874_v52, %v786_v51  ;;  %v3930_v51 = vld [vmem:[%s5939_s1 + $0x108] sm:$0xff] }
 0x1c4   :  { %v884_v54 = vmul.f32 0.35355338, %v880_v50 }
 0x1c5   :  { %v883_v55 = vmul.f32 0.35355338, %v875_v53  ;;  %v3929_v53 = vld [vmem:[%s5939_s1 + $0x100] sm:$0xff] }
 0x1c6   :  { %v888_v56 = vsel %vm886_vm11, %v884_v54, -1e+15 }
 0x1c7   :  { %v893_v47 = vsel %vm889_vm12, %v888_v56, -inf  ;;  %v887_v45 = vsel %vm885_vm13, %v883_v55, -1e+15 }
 0x1c8   :  { %894 = vmax.xlane.f32.xlu1 %v893_v47  ;;  %v890_v58 = vsel %vm889_vm12, %v887_v45, -inf }
 0x1c9   :  { %891 = vmax.xlane.f32.xlu0 %v890_v58 }
 0x255   :  { %v895_v59 = vpop.xlane.xlu1 %894 }
 0x256   :  { %v897_v60 = vsub.f32 %v888_v56, %v895_v59  ;;  %v892_v61 = vpop.xlane.xlu0 %891 }
 0x257   :  { %v896_v62 = vsub.f32 %v887_v45, %v892_v61 }
 0x258   :  { %v900_v1 = vmul.f32 1.442695, %v897_v60 }
 0x259   :  { %v898_v3 = vmul.f32 1.442695, %v896_v62 }
 0x25a   :  { %4388 = vpow2.f32 %v900_v1  ;;  %v3948_v1 = vld [vmem:[%s5939_s1 + $0x198] sm:$0xff] }
 0x25b   :  { %4390 = vpow2.f32 %v898_v3  ;;  %v3947_v3 = vld [vmem:[%s5939_s1 + $0x190] sm:$0xff] }
 0x264   :  { %v4389_v57 = vpop.eup %4388 }
 0x265   :  { %v4391_v4 = vpop.eup %4390  ;;  %v905_v6 = vsel %vm889_vm12, %v4389_v57, 0.0 }
 0x266   :  { %906 = vadd.xlane.f32.xlu1 %v905_v6  ;;  %v902_v7 = vsel %vm889_vm12, %v4391_v4, 0.0 }
 0x267   :  { %903 = vadd.xlane.f32.xlu0 %v902_v7 }
 0x2f3   :  { %v907_v11 = vpop.xlane.xlu1 %906 }
 0x2f4   :  { %4392 = vrcp.f32 %v907_v11  ;;  %v904_v2 = vpop.xlane.xlu0 %903  ;;  %v3950_v11 = vld [vmem:[%s5939_s1 + $0x1a8] sm:$0xff] }
 0x2f5   :  { %4394 = vrcp.f32 %v904_v2  ;;  %v3949_v2 = vld [vmem:[%s5939_s1 + $0x1a0] sm:$0xff] }
 0x2fe   :  { %v4393_v12 = vpop.eup %4392 }
 0x2ff   :  { %v4395_v16 = vpop.eup %4394  ;;  %v911_v20 = vmul.f32 %v4393_v12, %v4389_v57 }
 0x300   :  { %v910_v18 = vmul.f32 %v4395_v16, %v4391_v4 }
 0x302   :  { %4183 = vmatprep.mubr.msk.f32.mxu1 %vm889_vm12, %v910_v18 }
 0x303   :  { %4184 = vmatmul.mubr.msk.f32.vlgmr.msra.gmra.mrb[2].mxu1 %vm889_vm12, %v911_v20 }
 0x304   :  { %4315 = vmatpush3.bf16.msra.mxu1 %v4312_v10  ;;  %4194 = vmatprep.mubr.msk.f32.mxu1 %vm66_vm0, %v4572_v5 }
 0x305   :  { %4317 = vmatprep.subr.bf16.mxu1 %v4316_v21 }
 0x308   :  { %4319 = vmatpush3.bf16.msra.mxu1 %v4316_v21  ;;  %v3954_v21 = vld [vmem:[%s5939_s1 + $0x1c8] sm:$0xff] }
 0x30b   :  { %4195 = vmatmul.mubr.msk.f32.vlgmr.msra.gmra.mrb[4].mxu1 %vm66_vm0, %v4593_v13 }
 0x3d6   :  { %v4959_v22 = vpop.f32.mrb[2].mxu1 }
 0x3d7   :  { %v4961_v23 = vpop.f32.mrb[3].mxu1 }
 0x3de   :  { %v4196_v25 = vpop.f32.mrb[4].mxu1 }
 0x3df   :  { %v1078_v27 = vadd.f32 %v4196_v25, %v3924_v24  ;;  %v1072_v30 = vpop.f32.mrb[5].mxu1 }
 0x3e0   :  { %v1073_v13 = vadd.f32 %v3924_v24, %v1072_v30  ;;  %v3953_v24 = vld [vmem:[%s5939_s1 + $0x1c0] sm:$0xff] }
 0x3e1   :  { %v1133_v31 = vadd.f32 %v3962_v26, %v1078_v27  ;;  %v1125_v56 = vadd.f32 %v3961_v29, %v1078_v27 }
 0x3e2   :  { %v1124_v33 = vadd.f32 %v3961_v29, %v1073_v13  ;;  %v1132_v34 = vadd.f32 %v3962_v26, %v1073_v13  ;;  %v4320_v35 = vpack.c.bf16 %v1078_v27, %v1073_v13 }
 0x3e3   :  { %v1192_v36 = vrot.slane %v1133_v31, %v4612_v28  ;;  %v1185_v41 = vcombine.high %v1133_v31, %v1133_v31 }
 0x3e4   :  { %v1143_v37 = vrot.slane %v1132_v34, %v4612_v28  ;;  %4322 = vmatprep.subr.msk.bf16.mxu0 %vm4616_vm2, %v4320_v35  ;;  %4201 = vmatprep.mubr.msk.f32.mxu0 %vm496_vm1, %v1124_v33  ;;  %v1136_v12 = vcombine.high %v1132_v34, %v1132_v34  ;;  %v3932_v33 = vld [vmem:[%s5939_s1 + $0x118] sm:$0xff]  ;;  %v3931_v34 = vld [vmem:[%s5939_s1 + $0x110] sm:$0xff] }
 0x3e5   :  { %4327 = vmatprep.subr.bf16.mxu1 %v4320_v35  ;;  %4325 = vmatpush3.bf16.xpose.msk.msra.mxu0 %vm4616_vm2, %v4320_v35  ;;  %v1208_v39 = vrot.slane %v1192_v36, %v4612_v28  ;;  %v1200_v40 = vcombine.high %v1192_v36, %v1192_v36  ;;  %v5001_v58 = vrot.slane %v1185_v41, %v4612_v28 }
 0x3e6   :  { %4329 = vmatpush3.bf16.msra.mxu1 %v4320_v35  ;;  %v1159_v46 = vrot.slane %v1143_v37, %v4612_v28  ;;  %v1151_v6 = vcombine.high %v1143_v37, %v1143_v37  ;;  %v5043_v27 = vrot.slane %v1136_v12, %v4612_v28 }
 0x3e7   :  { %v1269_v48 = vrot.slane %v1208_v39, %v4621_v38  ;;  %v4989_v50 = vrot.slane %v1200_v40, %v4612_v28  ;;  %v1230_v45 = vcombine.high %v1208_v39, %v1208_v39  ;;  %v5015_v4 = vrot.slane %v5001_v58, %v4612_v28 }
 0x3e8   :  { %v1237_v52 = vrot.slane %v1159_v46, %v4621_v38  ;;  %v5030_v14 = vrot.slane %v1151_v6, %v4612_v28  ;;  %v1181_v26 = vcombine.high %v1159_v46, %v1159_v46  ;;  %v5055_v37 = vrot.slane %v5043_v27, %v4612_v28 }
 0x3e9   :  { %v1331_v54 = vmul.f32 %v3946_v42, %v1269_v48  ;;  %v1330_v55 = vmul.f32 %v3945_v44, %v1269_v48  ;;  %v1273_v47 = vrot.slane %v4989_v50, %v4621_v38  ;;  %v1277_v57 = vrot.slane %v1230_v45, %v4621_v38  ;;  %v3934_v42 = vld [vmem:[%s5939_s1 + $0x128] sm:$0xff]  ;;  %v3933_v44 = vld [vmem:[%s5939_s1 + $0x120] sm:$0xff] }
 0x3ea   :  { %v1315_v61 = vmul.f32 %v3930_v51, %v1237_v52  ;;  %v1314_v62 = vmul.f32 %v3929_v53, %v1237_v52  ;;  %v1241_v25 = vrot.slane %v5030_v14, %v4621_v38  ;;  %v1245_v41 = vrot.slane %v1181_v26, %v4621_v38 }
 0x3eb   :  { %v1397_v59 = vsel %vm496_vm1, %v1331_v54, 0.0  ;;  %v1394_v60 = vsel %vm496_vm1, %v1330_v55, 0.0  ;;  %v1333_v8 = vmul.f32 %v3948_v1, %v1273_v47  ;;  %v1332_v10 = vmul.f32 %v3947_v3, %v1273_v47  ;;  %v3938_v54 = vld [vmem:[%s5939_s1 + $0x148] sm:$0xff]  ;;  %v3937_v55 = vld [vmem:[%s5939_s1 + $0x140] sm:$0xff] }
 0x3ec   :  { %1398 = vadd.xlane.f32.xlu1 %v1397_v59  ;;  %1395 = vadd.xlane.f32.xlu0 %v1394_v60  ;;  %v1349_v7 = vsel %vm496_vm1, %v1315_v61, 0.0  ;;  %v1346_v9 = vsel %vm496_vm1, %v1314_v62, 0.0  ;;  %v1335_v18 = vmul.f32 %v3950_v11, %v1277_v57  ;;  %v1334_v20 = vmul.f32 %v3949_v2, %v1277_v57  ;;  %v3955_v11 = vld [vmem:[%s5939_s1 + $0x1d0] sm:$0xff] }
 0x3ed   :  { %4202 = vmatmul.mubr.msk.f32.vlgmr.msra.gmra.mrb[4].mxu0 %vm496_vm1, %v1125_v56  ;;  %v1403_v15 = vsel %vm496_vm1, %v1333_v8, 0.0  ;;  %v1400_v16 = vsel %vm496_vm1, %v1332_v10, 0.0  ;;  %v1317_v35 = vmul.f32 %v3932_v33, %v1241_v25  ;;  %v1316_v36 = vmul.f32 %v3931_v34, %v1241_v25  ;;  %v3956_v10 = vld [vmem:[%s5939_s1 + $0x1d8] sm:$0xff] }
 0x3ee   :  { %4219 = vmatprep.mubr.msk.f32.mxu0 %vm66_vm0, %v4572_v5  ;;  %v1285_v5 = vrot.slane %v5015_v4, %v4621_v38  ;;  %v1409_v29 = vsel %vm496_vm1, %v1335_v18, 0.0  ;;  %v1406_v30 = vsel %vm496_vm1, %v1334_v20, 0.0  ;;  %v1253_v51 = vrot.slane %v5055_v37, %v4621_v38  ;;  %v3958_v20 = vld [vmem:[%s5939_s1 + $0x1e8] sm:$0xff] }
 0x3ef   :  { %v1355_v46 = vsel %vm496_vm1, %v1317_v35, 0.0  ;;  %v1352_v48 = vsel %vm496_vm1, %v1316_v36, 0.0  ;;  %v1319_v52 = vmul.f32 %v3934_v42, %v1245_v41  ;;  %v1318_v53 = vmul.f32 %v3933_v44, %v1245_v41  ;;  %v3939_v41 = vld [vmem:[%s5939_s1 + $0x150] sm:$0xff] }
 0x3f0   :  { %1350 = vadd.xlane.f32.xlu1 %v1349_v7  ;;  %1347 = vadd.xlane.f32.xlu0 %v1346_v9  ;;  %v1339_v13 = vmul.f32 %v3954_v21, %v1285_v5  ;;  %v1338_v31 = vmul.f32 %v3953_v24, %v1285_v5  ;;  %v1232_v56 = vcombine.high %v4989_v50, %v4989_v50  ;;  %v3952_v50 = vld [vmem:[%s5939_s1 + $0x1b8] sm:$0xff]  ;;  %v3957_v21 = vld [vmem:[%s5939_s1 + $0x1e0] sm:$0xff] }
 0x3f1   :  { %v1201_v47 = vcombine.high %v5001_v58, %v5001_v58  ;;  %v1323_v45 = vmul.f32 %v3938_v54, %v1253_v51  ;;  %v1322_v59 = vmul.f32 %v3937_v55, %v1253_v51  ;;  %v1361_v60 = vsel %vm496_vm1, %v1319_v52, 0.0  ;;  %v3951_v58 = vld [vmem:[%s5939_s1 + $0x1b0] sm:$0xff]  ;;  %v3942_v51 = vld [vmem:[%s5939_s1 + $0x168] sm:$0xff]  ;;  %v3941_v52 = vld [vmem:[%s5939_s1 + $0x160] sm:$0xff] }
 0x3f2   :  { %v1421_v39 = vsel %vm496_vm1, %v1339_v13, 0.0  ;;  %v1418_v40 = vsel %vm496_vm1, %v1338_v31, 0.0  ;;  %v1358_v61 = vsel %vm496_vm1, %v1318_v53, 0.0  ;;  %v1281_v62 = vrot.slane %v1232_v56, %v4621_v38  ;;  %v3935_v13 = vld [vmem:[%s5939_s1 + $0x130] sm:$0xff] }
 0x3f3   :  { %v5084_v1 = vrot.slane %v1201_v47, %v4612_v28  ;;  %v1373_v3 = vsel %vm496_vm1, %v1323_v45, 0.0  ;;  %v1231_v57 = vcombine.high %v5015_v4, %v5015_v4  ;;  %v1370_v6 = vsel %vm496_vm1, %v1322_v59, 0.0 }
 0x3f4   :  { %1404 = vadd.xlane.f32.xlu1 %v1403_v15  ;;  %1401 = vadd.xlane.f32.xlu0 %v1400_v16  ;;  %v1337_v7 = vmul.f32 %v3952_v50, %v1281_v62  ;;  %v1336_v9 = vmul.f32 %v3951_v58, %v1281_v62  ;;  %v1183_v4 = vcombine.high %v5030_v14, %v5030_v14 }
 0x3f5   :  { %v1289_v8 = vrot.slane %v5084_v1, %v4621_v38  ;;  %v1293_v2 = vrot.slane %v1231_v57, %v4621_v38  ;;  %v1152_v12 = vcombine.high %v5043_v27, %v5043_v27  ;;  %v1182_v33 = vcombine.high %v5055_v37, %v5055_v37 }
 0x3f6   :  { %v1415_v5 = vsel %vm496_vm1, %v1337_v7, 0.0  ;;  %v1412_v15 = vsel %vm496_vm1, %v1336_v9, 0.0  ;;  %v1249_v24 = vrot.slane %v1183_v4, %v4621_v38  ;;  %v1233_v59 = vcombine.high %v5084_v1, %v5084_v1  ;;  %v3960_v1 = vld [vmem:[%s5939_s1 + $0x1f8] sm:$0xff]  ;;  %v3969_v4 = vld [vmem:[%s5944_s6 + $0x40] sm:$0xff] }
 0x3f7   :  { %v1341_v16 = vmul.f32 %v3956_v10, %v1289_v8  ;;  %v1340_v18 = vmul.f32 %v3955_v11, %v1289_v8  ;;  %v1343_v14 = vmul.f32 %v3958_v20, %v1293_v2  ;;  %v1342_v27 = vmul.f32 %v3957_v21, %v1293_v2  ;;  %v5186_v20 = vld [vmem:[%s5938_s0 + $0x8] sm:$0xff] }
 0x3f8   :  { %1410 = vadd.xlane.f32.xlu1 %v1409_v29  ;;  %1407 = vadd.xlane.f32.xlu0 %v1406_v30  ;;  %v3936_v29 = vld [vmem:[%s5939_s1 + $0x138] sm:$0xff]  ;;  %v1180_v30 = vrot.slane %v1152_v12, %v4612_v28  ;;  %v1320_v36 = vmul.f32 %v3935_v13, %v1249_v24  ;;  %v1261_v37 = vrot.slane %v1182_v33, %v4621_v38  ;;  %v3970_v12 = vld [vmem:[%s5944_s6 + $0x48] sm:$0xff] }
 0x3f9   :  { %v1427_v25 = vsel %vm496_vm1, %v1341_v16, 0.0  ;;  %v1424_v26 = vsel %vm496_vm1, %v1340_v18, 0.0  ;;  %v1321_v31 = vmul.f32 %v3936_v29, %v1249_v24  ;;  %v1433_v34 = vsel %vm496_vm1, %v1343_v14, 0.0  ;;  %v3972_v16 = vld [vmem:[%s5944_s6 + $0x58] sm:$0xff] }
 0x3fa   :  { %v1430_v35 = vsel %vm496_vm1, %v1342_v27, 0.0  ;;  %v1364_v44 = vsel %vm496_vm1, %v1320_v36, 0.0  ;;  %v1184_v53 = vcombine.high %v1180_v30, %v1180_v30  ;;  %v1327_v54 = vmul.f32 %v3942_v51, %v1261_v37 }
 0x3fb   :  { %v1367_v42 = vsel %vm496_vm1, %v1321_v31, 0.0  ;;  %v1326_v55 = vmul.f32 %v3941_v52, %v1261_v37  ;;  %v1297_v57 = vrot.slane %v1233_v59, %v4621_v38 }
 0x3fc   :  { %1422 = vadd.xlane.f32.xlu1 %v1421_v39  ;;  %1419 = vadd.xlane.f32.xlu0 %v1418_v40  ;;  %v1257_v39 = vrot.slane %v1180_v30, %v4621_v38  ;;  %v3940_v40 = vld [vmem:[%s5939_s1 + $0x158] sm:$0xff]  ;;  %v1265_v45 = vrot.slane %v1184_v53, %v4621_v38  ;;  %v1385_v62 = vsel %vm496_vm1, %v1327_v54, 0.0 }
 0x3fd   :  { %v1382_v50 = vsel %vm496_vm1, %v1326_v55, 0.0  ;;  %v1345_v8 = vmul.f32 %v3960_v1, %v1297_v57 }
 0x3ff   :  { %v1439_v11 = vsel %vm496_vm1, %v1345_v8, 0.0 }
 0x400   :  { %1356 = vadd.xlane.f32.xlu1 %v1355_v46  ;;  %1353 = vadd.xlane.f32.xlu0 %v1352_v48  ;;  %v1325_v46 = vmul.f32 %v3940_v40, %v1257_v39  ;;  %v1324_v48 = vmul.f32 %v3939_v41, %v1257_v39 }
 0x402   :  { %v1379_v56 = vsel %vm496_vm1, %v1325_v46, 0.0  ;;  %v1376_v47 = vsel %vm496_vm1, %v1324_v48, 0.0 }
 0x404   :  { %1362 = vadd.xlane.f32.xlu1 %v1361_v60  ;;  %1359 = vadd.xlane.f32.xlu0 %v1358_v61  ;;  %v3944_v60 = vld [vmem:[%s5939_s1 + $0x178] sm:$0xff]  ;;  %v3943_v61 = vld [vmem:[%s5939_s1 + $0x170] sm:$0xff] }
 0x405   :  { %v1329_v58 = vmul.f32 %v3944_v60, %v1265_v45 }
 0x407   :  { %v1391_v7 = vsel %vm496_vm1, %v1329_v58, 0.0 }
 0x408   :  { %1374 = vadd.xlane.f32.xlu1 %v1373_v3  ;;  %1371 = vadd.xlane.f32.xlu0 %v1370_v6  ;;  %v1328_v3 = vmul.f32 %v3943_v61, %v1265_v45  ;;  %v3959_v6 = vld [vmem:[%s5939_s1 + $0x1f0] sm:$0xff] }
 0x409   :  { %v1344_v10 = vmul.f32 %v3959_v6, %v1297_v57 }
 0x40a   :  { %v1388_v9 = vsel %vm496_vm1, %v1328_v3, 0.0 }
 0x40b   :  { %v1436_v2 = vsel %vm496_vm1, %v1344_v10, 0.0 }
 0x40c   :  { %1416 = vadd.xlane.f32.xlu1 %v1415_v5  ;;  %1413 = vadd.xlane.f32.xlu0 %v1412_v15  ;;  %v3971_v5 = vld [vmem:[%s5944_s6 + $0x50] sm:$0xff]  ;;  %v4330_v15 = vpack.c.bf16 %v3970_v12, %v3969_v4 }
 0x40d   :  { %v4334_v18 = vpack.c.bf16 %v3972_v16, %v3971_v5 }
 0x40e   :  { %4331 = vmatprep.subr.bf16.mxu0 %v4330_v15 }
 0x40f   :  { %4333 = vmatpush3.bf16.msra.mxu0 %v4330_v15 }
 0x410   :  { %1428 = vadd.xlane.f32.xlu1 %v1427_v25  ;;  %1425 = vadd.xlane.f32.xlu0 %v1424_v26 }
 0x411   :  { %4335 = vmatprep.subr.bf16.mxu0 %v4334_v18 }
 0x413   :  { %4337 = vmatpush3.bf16.msra.mxu0 %v4334_v18 }
 0x414   :  { %1434 = vadd.xlane.f32.xlu1 %v1433_v34  ;;  %1431 = vadd.xlane.f32.xlu0 %v1430_v35 }
 0x416   :  { %4220 = vmatmul.mubr.msk.f32.vlgmr.msra.gmra.mrb[6].mxu0 %vm66_vm0, %v5186_v20 }
 0x418   :  { %1368 = vadd.xlane.f32.xlu1 %v1367_v42  ;;  %1365 = vadd.xlane.f32.xlu0 %v1364_v44 }
 0x41c   :  { %1380 = vadd.xlane.f32.xlu1 %v1379_v56  ;;  %1377 = vadd.xlane.f32.xlu0 %v1376_v47 }
 0x420   :  { %1386 = vadd.xlane.f32.xlu1 %v1385_v62  ;;  %1383 = vadd.xlane.f32.xlu0 %v1382_v50 }
 0x424   :  { %1392 = vadd.xlane.f32.xlu1 %v1391_v7  ;;  %1389 = vadd.xlane.f32.xlu0 %v1388_v9 }
 0x428   :  { %1440 = vadd.xlane.f32.xlu1 %v1439_v11  ;;  %1437 = vadd.xlane.f32.xlu0 %v1436_v2 }
 0x479   :  { %v1399_v21 = vpop.xlane.xlu1 %1398  ;;  %v1396_v14 = vpop.xlane.xlu0 %1395 }
 0x47a   :  { %v1553_v61 = vrot.slane %v1399_v21, %v4601_v19  ;;  %v1549_v62 = vrot.slane %v1396_v14, %v4599_v17 }
 0x47c   :  { %v1554_v11 = vsel %vm636_vm3, %v1553_v61, %v1549_v62 }
 0x47d   :  { %v1351_v24 = vpop.xlane.xlu1 %1350  ;;  %v1348_v25 = vpop.xlane.xlu0 %1347 }
 0x47e   :  { %v1481_v3 = vrot.slane %v1351_v24, %v4601_v19  ;;  %v1477_v57 = vrot.slane %v1348_v25, %v4599_v17 }
 0x480   :  { %v1482_v18 = vsel %vm636_vm3, %v1481_v3, %v1477_v57 }
 0x481   :  { %v1405_v26 = vpop.xlane.xlu1 %1404  ;;  %v1402_v27 = vpop.xlane.xlu0 %1401 }
 0x482   :  { %v1562_v55 = vrot.slane %v1405_v26, %v4601_v19  ;;  %v1558_v56 = vrot.slane %v1402_v27, %v4599_v17 }
 0x484   :  { %v1563_v1 = vsel %vm636_vm3, %v1562_v55, %v1558_v56 }
 0x485   :  { %v1411_v29 = vpop.xlane.xlu1 %1410  ;;  %v1408_v30 = vpop.xlane.xlu0 %1407  ;;  %v1625_v5 = vsel %vm773_vm4, %v1563_v1, %v1554_v11 }
 0x486   :  { %v1571_v59 = vrot.slane %v1411_v29, %v4601_v19  ;;  %v1567_v60 = vrot.slane %v1408_v30, %v4599_v17 }
 0x488   :  { %v1572_v9 = vsel %vm636_vm3, %v1571_v59, %v1567_v60 }
 0x489   :  { %v5190_v13 = vpop.xlane.xlu1 %1422  ;;  %v5192_v31 = vpop.xlane.xlu0 %1419  ;;  %v1626_v21 = vsel %vm775_vm5, %v1572_v9, %v1625_v5 }
 0x48a   :  { %v1589_v14 = vrot.slane %v5190_v13, %v4601_v19  ;;  %v1585_v24 = vrot.slane %v5192_v31, %v4599_v17 }
 0x48c   :  { %v1590_v56 = vsel %vm636_vm3, %v1589_v14, %v1585_v24 }
 0x48d   :  { %v1357_v33 = vpop.xlane.xlu1 %1356  ;;  %v1354_v34 = vpop.xlane.xlu0 %1353 }
 0x48e   :  { %v1490_v50 = vrot.slane %v1357_v33, %v4601_v19  ;;  %v1486_v58 = vrot.slane %v1354_v34, %v4599_v17 }
 0x490   :  { %v1491_v2 = vsel %vm636_vm3, %v1490_v50, %v1486_v58 }
 0x491   :  { %v1363_v35 = vpop.xlane.xlu1 %1362  ;;  %v1360_v36 = vpop.xlane.xlu0 %1359  ;;  %v1618_v25 = vsel %vm773_vm4, %v1491_v2, %v1482_v18 }
 0x492   :  { %v1499_v8 = vrot.slane %v1363_v35, %v4601_v19  ;;  %v1495_v10 = vrot.slane %v1360_v36, %v4599_v17 }
 0x494   :  { %v1500_v26 = vsel %vm636_vm3, %v1499_v8, %v1495_v10 }
 0x495   :  { %v5194_v39 = vpop.xlane.xlu1 %1374  ;;  %v5196_v40 = vpop.xlane.xlu0 %1371 }
 0x496   :  { %v1517_v27 = vrot.slane %v5194_v39, %v4601_v19  ;;  %v1513_v29 = vrot.slane %v5196_v40, %v4599_v17 }
 0x498   :  { %v1518_v59 = vsel %vm636_vm3, %v1517_v27, %v1513_v29  ;;  %v4012_v29 = vld [vmem:[%s5947_s9 + $0x2] ss:$0 sm:$0xff] }
 0x499   :  { %v1417_v41 = vpop.xlane.xlu1 %1416  ;;  %v1414_v42 = vpop.xlane.xlu0 %1413 }
 0x49a   :  { %v1580_v4 = vrot.slane %v1417_v41, %v4601_v19  ;;  %v1576_v12 = vrot.slane %v1414_v42, %v4599_v17 }
 0x49c   :  { %v1581_v34 = vsel %vm636_vm3, %v1580_v4, %v1576_v12 }
 0x49d   :  { %v1429_v37 = vpop.xlane.xlu1 %1428  ;;  %v1426_v44 = vpop.xlane.xlu0 %1425 }
 0x49e   :  { %v1598_v35 = vrot.slane %v1429_v37, %v4601_v19  ;;  %v1594_v13 = vrot.slane %v1426_v44, %v4599_v17  ;;  %v1619_v44 = vsel %vm775_vm5, %v1500_v26, %v1618_v25 }
 0x4a1   :  { %v5198_v46 = vpop.xlane.xlu1 %1434  ;;  %v1432_v48 = vpop.xlane.xlu0 %1431 }
 0x4a2   :  { %v1607_v31 = vrot.slane %v5198_v46, %v4601_v19  ;;  %v1603_v36 = vrot.slane %v1432_v48, %v4599_v17  ;;  %v1627_v46 = vsel %vm777_vm6, %v1581_v34, %v1626_v21  ;;  %v3974_v21 = vld [vmem:[%s5945_s7 + $0x2] ss:$0 sm:$0xff] }
 0x4a3   :  { %v1628_v62 = vsel %vm779_vm7, %v1590_v56, %v1627_v46 }
 0x4a5   :  { %v1369_v51 = vpop.xlane.xlu1 %1368  ;;  %v1366_v52 = vpop.xlane.xlu0 %1365 }
 0x4a6   :  { %v1508_v15 = vrot.slane %v1369_v51, %v4601_v19  ;;  %v1504_v16 = vrot.slane %v1366_v52, %v4599_v17 }
 0x4a8   :  { %v1509_v41 = vsel %vm636_vm3, %v1508_v15, %v1504_v16 }
 0x4a9   :  { %v1381_v53 = vpop.xlane.xlu1 %1380  ;;  %v1378_v54 = vpop.xlane.xlu0 %1377 }
 0x4aa   :  { %v1526_v39 = vrot.slane %v1381_v53, %v4601_v19  ;;  %v1522_v42 = vrot.slane %v1378_v54, %v4599_v17  ;;  %v1599_v53 = vsel %vm636_vm3, %v1598_v35, %v1594_v13  ;;  %v1620_v54 = vsel %vm777_vm6, %v1509_v41, %v1619_v44  ;;  %v3979_v44 = vld [vmem:[%s5939_s1 + $0x200] sm:$0xff] }
 0x4ab   :  { %v1629_v50 = vsel %vm781_vm8, %v1599_v53, %v1628_v62  ;;  %v1621_v3 = vsel %vm779_vm7, %v1518_v59, %v1620_v54 }
 0x4ad   :  { %v1387_v47 = vpop.xlane.xlu1 %1386  ;;  %v1384_v45 = vpop.xlane.xlu0 %1383 }
 0x4ae   :  { %v1535_v40 = vrot.slane %v1387_v47, %v4601_v19  ;;  %v1531_v51 = vrot.slane %v1384_v45, %v4599_v17  ;;  %v1527_v47 = vsel %vm636_vm3, %v1526_v39, %v1522_v42  ;;  %v1608_v45 = vsel %vm636_vm3, %v1607_v31, %v1603_v36 }
 0x4af   :  { %v1630_v57 = vsel %vm783_vm9, %v1608_v45, %v1629_v50  ;;  %v1622_v1 = vsel %vm781_vm8, %v1527_v47, %v1621_v3  ;;  %v3982_v47 = vld [vmem:[%s5939_s1 + $0x218] sm:$0xff] }
 0x4b0   :  { %v1536_v60 = vsel %vm636_vm3, %v1535_v40, %v1531_v51 }
 0x4b1   :  { %v1393_v6 = vpop.xlane.xlu1 %1392  ;;  %v1390_v7 = vpop.xlane.xlu0 %1389  ;;  %v1623_v9 = vsel %vm783_vm9, %v1536_v60, %v1622_v1  ;;  %v3981_v60 = vld [vmem:[%s5939_s1 + $0x210] sm:$0xff] }
 0x4b2   :  { %v1544_v48 = vrot.slane %v1393_v6, %v4601_v19  ;;  %v1540_v55 = vrot.slane %v1390_v7, %v4599_v17 }
 0x4b4   :  { %v1545_v58 = vsel %vm636_vm3, %v1544_v48, %v1540_v55 }
 0x4b5   :  { %v1441_v30 = vpop.xlane.xlu1 %1440  ;;  %v1438_v33 = vpop.xlane.xlu0 %1437  ;;  %v1624_v10 = vsel %vm785_vm10, %v1545_v58, %v1623_v9  ;;  %v3983_v9 = vld [vmem:[%s5939_s1 + $0x220] sm:$0xff] }
 0x4b6   :  { %v1616_v52 = vrot.slane %v1441_v30, %v4601_v19  ;;  %v1612_v37 = vrot.slane %v1438_v33, %v4599_v17 }
 0x4b8   :  { %v1617_v61 = vsel %vm636_vm3, %v1616_v52, %v1612_v37  ;;  %v3980_v37 = vld [vmem:[%s5939_s1 + $0x208] sm:$0xff] }
 0x4b9   :  { %v1631_v6 = vsel %vm785_vm10, %v1617_v61, %v1630_v57 }
 0x4c0   :  { %v4203_v7 = vpop.f32.mrb[4].mxu0 }
 0x4c1   :  { %v1718_v8 = vadd.f32 %v4203_v7, %v1631_v6  ;;  %v1712_v11 = vpop.f32.mrb[5].mxu0  ;;  %v3984_v7 = vld [vmem:[%s5939_s1 + $0x228] sm:$0xff] }
 0x4c2   :  { %v1713_v2 = vadd.f32 %v1712_v11, %v1624_v10 }
 0x4c3   :  { %v1722_v4 = vmul.f32 0.35355338, %v1718_v8 }
 0x4c4   :  { %v1721_v12 = vmul.f32 0.35355338, %v1713_v2 }
 0x4c5   :  { %v1724_v5 = vsel %vm886_vm11, %v1722_v4, -1e+15 }
 0x4c6   :  { %v1728_v15 = vsel %vm889_vm12, %v1724_v5, -inf  ;;  %v1723_v16 = vsel %vm885_vm13, %v1721_v12, -1e+15 }
 0x4c7   :  { %1729 = vmax.xlane.f32.xlu1 %v1728_v15  ;;  %v1725_v18 = vsel %vm889_vm12, %v1723_v16, -inf  ;;  %v3995_v15 = vld [vmem:[%s5939_s1 + $0x280] sm:$0xff] }
 0x4c8   :  { %1726 = vmax.xlane.f32.xlu0 %v1725_v18 }
 0x4e9   :  { %v4221_v14 = vpop.f32.mrb[6].mxu0 }
 0x4ea   :  { %v1907_v24 = vpop.f32.mrb[7].mxu0  ;;  %v5276_v25 = vadd.f32 %v4221_v14, %v3974_v21 }
 0x4eb   :  { %v5278_v26 = vadd.f32 %v3974_v21, %v1907_v24 }
 0x4ec   :  { %v5299_v40 = vadd.f32 %v4012_v29, %v5276_v25 }
 0x4ed   :  { %v5282_v27 = vpack.c.bf16 %v5276_v25, %v5278_v26  ;;  %v5293_v30 = vadd.f32 %v4012_v29, %v5278_v26 }
 0x4ee   :  { %v2027_v46 = vrot.slane %v5299_v40, %v4612_v28 }
 0x4ef   :  { %4345 = vmatprep.subr.bf16.mxu0 %v5282_v27  ;;  %4340 = vmatprep.subr.msk.bf16.mxu1 %vm4616_vm2, %v5282_v27  ;;  %v1978_v31 = vrot.slane %v5293_v30, %v4612_v28 }
 0x4f0   :  { %4347 = vmatpush3.bf16.msra.mxu0 %v5282_v27  ;;  %v2043_v62 = vrot.slane %v2027_v46, %v4612_v28  ;;  %v2035_v57 = vcombine.high %v2027_v46, %v2027_v46 }
 0x4f1   :  { %v1994_v39 = vrot.slane %v1978_v31, %v4612_v28  ;;  %v1986_v42 = vcombine.high %v1978_v31, %v1978_v31 }
 0x4f2   :  { %v2104_v11 = vrot.slane %v2043_v62, %v4621_v38  ;;  %v2057_v2 = vrot.slane %v2035_v57, %v4612_v28  ;;  %v3988_v57 = vld [vmem:[%s5939_s1 + $0x248] sm:$0xff] }
 0x4f3   :  { %v2072_v51 = vrot.slane %v1994_v39, %v4621_v38  ;;  %v2008_v52 = vrot.slane %v1986_v42, %v4612_v28  ;;  %v2016_v53 = vcombine.high %v1994_v39, %v1994_v39 }
 0x4f4   :  { %v2108_v14 = vrot.slane %v2057_v2, %v4621_v38 }
 0x4f5   :  { %v2150_v48 = vmul.f32 %v3980_v37, %v2072_v51  ;;  %v2076_v55 = vrot.slane %v2008_v52, %v4621_v38  ;;  %v2149_v56 = vmul.f32 %v3979_v44, %v2072_v51  ;;  %v2080_v3 = vrot.slane %v2016_v53, %v4621_v38  ;;  %v3986_v51 = vld [vmem:[%s5939_s1 + $0x238] sm:$0xff] }
 0x4f6   :  { %v2018_v24 = vcombine.high %v2008_v52, %v2008_v52  ;;  %v3985_v52 = vld [vmem:[%s5939_s1 + $0x230] sm:$0xff] }
 0x4f7   :  { %v2184_v50 = vsel %vm496_vm1, %v2150_v48, 0.0  ;;  %v2152_v58 = vmul.f32 %v3982_v47, %v2076_v55  ;;  %v2181_v1 = vsel %vm496_vm1, %v2149_v56, 0.0  ;;  %v2151_v6 = vmul.f32 %v3981_v60, %v2076_v55  ;;  %v4000_v48 = vld [vmem:[%s5939_s1 + $0x2a8] sm:$0xff]  ;;  %v3999_v47 = vld [vmem:[%s5939_s1 + $0x2a0] sm:$0xff] }
 0x4f8   :  { %v2154_v10 = vmul.f32 %v3984_v7, %v2080_v3  ;;  %v2153_v12 = vmul.f32 %v3983_v9, %v2080_v3  ;;  %v2020_v60 = vcombine.high %v5299_v40, %v5299_v40 }
 0x4f9   :  { %v2190_v8 = vsel %vm496_vm1, %v2152_v58, 0.0  ;;  %v2187_v4 = vsel %vm496_vm1, %v2151_v6, 0.0 }
 0x4fa   :  { %v2196_v18 = vsel %vm496_vm1, %v2154_v10, 0.0  ;;  %v2193_v29 = vsel %vm496_vm1, %v2153_v12, 0.0  ;;  %v2034_v10 = vrot.slane %v2020_v60, %v4612_v28  ;;  %v4001_v12 = vld [vmem:[%s5939_s1 + $0x2b0] sm:$0xff] }
 0x554   :  { %v1730_v33 = vpop.xlane.xlu1 %1729 }
 0x555   :  { %v1732_v34 = vsub.f32 %v1724_v5, %v1730_v33  ;;  %v1727_v35 = vpop.xlane.xlu0 %1726  ;;  %v3996_v5 = vld [vmem:[%s5939_s1 + $0x288] sm:$0xff]  ;;  %v2165_v33 = vmul.f32 %v3995_v15, %v2104_v11 }
 0x556   :  { %v1731_v13 = vsub.f32 %v1723_v16, %v1727_v35  ;;  %v1971_v16 = vcombine.high %v5293_v30, %v5293_v30  ;;  %v2166_v21 = vmul.f32 %v3996_v5, %v2104_v11  ;;  %v3997_v35 = vld [vmem:[%s5939_s1 + $0x290] sm:$0xff]  ;;  %v2065_v30 = vcombine.high %v2043_v62, %v2043_v62 }
 0x557   :  { %v1735_v36 = vmul.f32 1.442695, %v1732_v34  ;;  %v3998_v34 = vld [vmem:[%s5939_s1 + $0x298] sm:$0xff]  ;;  %v2229_v39 = vsel %vm496_vm1, %v2165_v33, 0.0  ;;  %v2167_v42 = vmul.f32 %v3997_v35, %v2108_v14 }
 0x558   :  { %v1733_v41 = vmul.f32 1.442695, %v1731_v13  ;;  %v2232_v13 = vsel %vm496_vm1, %v2166_v21, 0.0  ;;  %v2168_v31 = vmul.f32 %v3998_v34, %v2108_v14  ;;  %v2112_v37 = vrot.slane %v2065_v30, %v4621_v38 }
 0x559   :  { %4396 = vpow2.f32 %v1735_v36  ;;  %v2084_v36 = vrot.slane %v2018_v24, %v4621_v38  ;;  %v2235_v53 = vsel %vm496_vm1, %v2167_v42, 0.0  ;;  %v3990_v24 = vld [vmem:[%s5939_s1 + $0x258] sm:$0xff] }
 0x55a   :  { %4398 = vpow2.f32 %v1733_v41  ;;  %v1985_v41 = vrot.slane %v1971_v16, %v4612_v28  ;;  %v2238_v44 = vsel %vm496_vm1, %v2168_v31, 0.0  ;;  %v2169_v3 = vmul.f32 %v3999_v47, %v2112_v37 }
 0x55b   :  { %v2156_v46 = vmul.f32 %v3986_v51, %v2084_v36  ;;  %v2155_v56 = vmul.f32 %v3985_v52, %v2084_v36 }
 0x55c   :  { %v2001_v55 = vrot.slane %v1985_v41, %v4612_v28  ;;  %v1987_v6 = vcombine.high %v1985_v41, %v1985_v41  ;;  %v2241_v11 = vsel %vm496_vm1, %v2169_v3, 0.0  ;;  %v4004_v41 = vld [vmem:[%s5939_s1 + $0x2c8] sm:$0xff] }
 0x55d   :  { %v2199_v58 = vsel %vm496_vm1, %v2155_v56, 0.0 }
 0x55e   :  { %v2088_v62 = vrot.slane %v2001_v55, %v4621_v38  ;;  %v2017_v33 = vcombine.high %v2001_v55, %v2001_v55  ;;  %v3991_v55 = vld [vmem:[%s5939_s1 + $0x260] sm:$0xff] }
 0x560   :  { %v2158_v7 = vmul.f32 %v3988_v57, %v2088_v62  ;;  %v2096_v52 = vrot.slane %v2017_v33, %v4621_v38  ;;  %v4009_v33 = vld [vmem:[%s5939_s1 + $0x2f0] sm:$0xff] }
 0x562   :  { %v2208_v5 = vsel %vm496_vm1, %v2158_v7, 0.0  ;;  %v3994_v7 = vld [vmem:[%s5939_s1 + $0x278] sm:$0xff] }
 0x563   :  { %v5312_v54 = vpop.eup %4396 }
 0x564   :  { %v5317_v45 = vpop.eup %4398  ;;  %v1740_v59 = vsel %vm889_vm12, %v5312_v54, 0.0 }
 0x565   :  { %1741 = vadd.xlane.f32.xlu1 %v1740_v59  ;;  %v1737_v61 = vsel %vm889_vm12, %v5317_v45, 0.0  ;;  %v2170_v59 = vmul.f32 %v4000_v48, %v2112_v37  ;;  %v3992_v48 = vld [vmem:[%s5939_s1 + $0x268] sm:$0xff] }
 0x566   :  { %1738 = vadd.xlane.f32.xlu0 %v1737_v61  ;;  %v2202_v61 = vsel %vm496_vm1, %v2156_v46, 0.0  ;;  %v2162_v56 = vmul.f32 %v3992_v48, %v2096_v52 }
 0x567   :  { %v2244_v40 = vsel %vm496_vm1, %v2170_v59, 0.0 }
 0x569   :  { %2185 = vadd.xlane.f32.xlu1 %v2184_v50  ;;  %v2067_v50 = vcombine.high %v2057_v2, %v2057_v2 }
 0x56a   :  { %2182 = vadd.xlane.f32.xlu0 %v2181_v1  ;;  %v3987_v1 = vld [vmem:[%s5939_s1 + $0x240] sm:$0xff] }
 0x56b   :  { %v2116_v9 = vrot.slane %v2067_v50, %v4621_v38  ;;  %v2157_v2 = vmul.f32 %v3987_v1, %v2088_v62  ;;  %v4006_v62 = vld [vmem:[%s5939_s1 + $0x2d8] sm:$0xff]  ;;  %v4005_v50 = vld [vmem:[%s5939_s1 + $0x2d0] sm:$0xff] }
 0x56d   :  { %2191 = vadd.xlane.f32.xlu1 %v2190_v8  ;;  %v2015_v8 = vrot.slane %v1987_v6, %v4612_v28  ;;  %v2205_v21 = vsel %vm496_vm1, %v2157_v2, 0.0  ;;  %v2171_v14 = vmul.f32 %v4001_v12, %v2116_v9 }
 0x56e   :  { %2188 = vadd.xlane.f32.xlu0 %v2187_v4  ;;  %v4002_v4 = vld [vmem:[%s5939_s1 + $0x2b8] sm:$0xff] }
 0x56f   :  { %v2172_v15 = vmul.f32 %v4002_v4, %v2116_v9  ;;  %v2092_v16 = vrot.slane %v2015_v8, %v4621_v38  ;;  %v2247_v31 = vsel %vm496_vm1, %v2171_v14, 0.0  ;;  %v2019_v59 = vcombine.high %v2015_v8, %v2015_v8  ;;  %v3993_v9 = vld [vmem:[%s5939_s1 + $0x270] sm:$0xff] }
 0x571   :  { %2197 = vadd.xlane.f32.xlu1 %v2196_v18  ;;  %v2050_v18 = vrot.slane %v2034_v10, %v4612_v28  ;;  %v2250_v34 = vsel %vm496_vm1, %v2172_v15, 0.0  ;;  %v2160_v35 = vmul.f32 %v3990_v24, %v2092_v16  ;;  %v2100_v57 = vrot.slane %v2019_v59, %v4621_v38  ;;  %v4007_v15 = vld [vmem:[%s5939_s1 + $0x2e0] sm:$0xff] }
 0x572   :  { %2194 = vadd.xlane.f32.xlu0 %v2193_v29  ;;  %v3989_v29 = vld [vmem:[%s5939_s1 + $0x250] sm:$0xff] }
 0x573   :  { %v2120_v30 = vrot.slane %v2050_v18, %v4621_v38  ;;  %v2159_v36 = vmul.f32 %v3989_v29, %v2092_v16  ;;  %v2214_v42 = vsel %vm496_vm1, %v2160_v35, 0.0  ;;  %v2066_v1 = vcombine.high %v2050_v18, %v2050_v18  ;;  %v4010_v29 = vld [vmem:[%s5939_s1 + $0x2f8] sm:$0xff] }
 0x574   :  { %v2163_v12 = vmul.f32 %v3993_v9, %v2100_v57 }
 0x575   :  { %2233 = vadd.xlane.f32.xlu1 %v2232_v13  ;;  %v2036_v13 = vcombine.high %v2034_v10, %v2034_v10  ;;  %v2174_v51 = vmul.f32 %v4004_v41, %v2120_v30  ;;  %v2164_v10 = vmul.f32 %v3994_v7, %v2100_v57 }
 0x576   :  { %2230 = vadd.xlane.f32.xlu0 %v2229_v39  ;;  %v4003_v39 = vld [vmem:[%s5939_s1 + $0x2c0] sm:$0xff]  ;;  %v2223_v14 = vsel %vm496_vm1, %v2163_v12, 0.0 }
 0x577   :  { %v2064_v37 = vrot.slane %v2036_v13, %v4612_v28  ;;  %v2173_v46 = vmul.f32 %v4003_v39, %v2120_v30  ;;  %v2226_v16 = vsel %vm496_vm1, %v2164_v10, 0.0 }
 0x579   :  { %2239 = vadd.xlane.f32.xlu1 %v2238_v44  ;;  %v2211_v44 = vsel %vm496_vm1, %v2159_v36, 0.0  ;;  %v2124_v47 = vrot.slane %v2064_v37, %v4621_v38  ;;  %v2253_v60 = vsel %vm496_vm1, %v2173_v46, 0.0  ;;  %v2068_v2 = vcombine.high %v2064_v37, %v2064_v37 }
 0x57a   :  { %2236 = vadd.xlane.f32.xlu0 %v2235_v53  ;;  %v2256_v53 = vsel %vm496_vm1, %v2174_v51, 0.0 }
 0x57b   :  { %v2176_v3 = vmul.f32 %v4006_v62, %v2124_v47 }
 0x57d   :  { %2203 = vadd.xlane.f32.xlu1 %v2202_v61  ;;  %v2161_v61 = vmul.f32 %v3991_v55, %v2096_v52  ;;  %v2262_v8 = vsel %vm496_vm1, %v2176_v3, 0.0  ;;  %v4011_v52 = vld [vmem:[%s5946_s8 + $0x2] ss:$0 sm:$0xff]  ;;  %v4022_v55 = vld [vmem:[%s5944_s6 + $0x78] sm:$0xff] }
 0x57e   :  { %2200 = vadd.xlane.f32.xlu0 %v2199_v58  ;;  %v2220_v58 = vsel %vm496_vm1, %v2162_v56, 0.0  ;;  %v1959_v46 = vadd.f32 %v4011_v52, %v5278_v26  ;;  %v1960_v48 = vadd.f32 %v4011_v52, %v5276_v25  ;;  %v4019_v26 = vld [vmem:[%s5944_s6 + $0x60] sm:$0xff]  ;;  %v4021_v25 = vld [vmem:[%s5944_s6 + $0x70] sm:$0xff] }
 0x57f   :  { %v2217_v6 = vsel %vm496_vm1, %v2161_v61, 0.0 }
 0x581   :  { %2245 = vadd.xlane.f32.xlu1 %v2244_v40  ;;  %v2175_v40 = vmul.f32 %v4005_v50, %v2124_v47 }
 0x582   :  { %2242 = vadd.xlane.f32.xlu0 %v2241_v11  ;;  %v2128_v11 = vrot.slane %v2066_v1, %v4621_v38 }
 0x583   :  { %v2259_v4 = vsel %vm496_vm1, %v2175_v40, 0.0 }
 0x584   :  { %v2177_v24 = vmul.f32 %v4007_v15, %v2128_v11 }
 0x585   :  { %2209 = vadd.xlane.f32.xlu1 %v2208_v5  ;;  %v4008_v5 = vld [vmem:[%s5939_s1 + $0x2e8] sm:$0xff] }
 0x586   :  { %2206 = vadd.xlane.f32.xlu0 %v2205_v21  ;;  %v2178_v18 = vmul.f32 %v4008_v5, %v2128_v11  ;;  %v2132_v21 = vrot.slane %v2068_v2, %v4621_v38  ;;  %v2265_v30 = vsel %vm496_vm1, %v2177_v24, 0.0 }
 0x588   :  { %v2180_v35 = vmul.f32 %v4010_v29, %v2132_v21  ;;  %v2179_v13 = vmul.f32 %v4009_v33, %v2132_v21 }
 0x589   :  { %2251 = vadd.xlane.f32.xlu1 %v2250_v34  ;;  %v2268_v34 = vsel %vm496_vm1, %v2178_v18, 0.0 }
 0x58a   :  { %2248 = vadd.xlane.f32.xlu0 %v2247_v31  ;;  %v2274_v31 = vsel %vm496_vm1, %v2180_v35, 0.0  ;;  %v2271_v36 = vsel %vm496_vm1, %v2179_v13, 0.0 }
 0x58d   :  { %2215 = vadd.xlane.f32.xlu1 %v2214_v42 }
 0x58e   :  { %2212 = vadd.xlane.f32.xlu0 %v2211_v44 }
 0x591   :  { %2257 = vadd.xlane.f32.xlu1 %v2256_v53  ;;  %v4352_v53 = vpack.c.bf16 %v4022_v55, %v4021_v25 }
 0x592   :  { %2254 = vadd.xlane.f32.xlu0 %v2253_v60 }
 0x595   :  { %2221 = vadd.xlane.f32.xlu1 %v2220_v58 }
 0x596   :  { %2218 = vadd.xlane.f32.xlu0 %v2217_v6 }
 0x599   :  { %2263 = vadd.xlane.f32.xlu1 %v2262_v8 }
 0x59a   :  { %2260 = vadd.xlane.f32.xlu0 %v2259_v4 }
 0x59d   :  { %2227 = vadd.xlane.f32.xlu1 %v2226_v16 }
 0x59e   :  { %2224 = vadd.xlane.f32.xlu0 %v2223_v14 }
 0x5a1   :  { %2269 = vadd.xlane.f32.xlu1 %v2268_v34 }
 0x5a2   :  { %2266 = vadd.xlane.f32.xlu0 %v2265_v30 }
 0x5a5   :  { %2275 = vadd.xlane.f32.xlu1 %v2274_v31 }
 0x5a6   :  { %2272 = vadd.xlane.f32.xlu0 %v2271_v36 }
 0x5f2   :  { %v1742_v41 = vpop.xlane.xlu1 %1741 }
 0x5f3   :  { %4400 = vrcp.f32 %v1742_v41  ;;  %v1739_v39 = vpop.xlane.xlu0 %1738 }
 0x5f4   :  { %4402 = vrcp.f32 %v1739_v39 }
 0x5f6   :  { %v2186_v56 = vpop.xlane.xlu1 %2185 }
 0x5f7   :  { %v2183_v47 = vpop.xlane.xlu0 %2182  ;;  %v2316_v33 = vrot.slane %v2186_v56, %v4601_v19 }
 0x5f8   :  { %v2312_v34 = vrot.slane %v2183_v47, %v4599_v17 }
 0x5fa   :  { %v2192_v59 = vpop.xlane.xlu1 %2191 }
 0x5fb   :  { %v2189_v60 = vpop.xlane.xlu0 %2188  ;;  %v2325_v35 = vrot.slane %v2192_v59, %v4601_v19 }
 0x5fc   :  { %v2321_v30 = vrot.slane %v2189_v60, %v4599_v17 }
 0x5fd   :  { %v4401_v42 = vpop.eup %4400 }
 0x5fe   :  { %v4403_v51 = vpop.eup %4402  ;;  %v1746_v44 = vmul.f32 %v4401_v42, %v5312_v54  ;;  %v4443_v54 = vld [vmem:[%s5938_s0] sm:$0xff]  ;;  %v2198_v61 = vpop.xlane.xlu1 %2197 }
 0x5ff   :  { %v1745_v37 = vmul.f32 %v4403_v51, %v5317_v45  ;;  %v2195_v62 = vpop.xlane.xlu0 %2194  ;;  %v2334_v39 = vrot.slane %v2198_v61, %v4601_v19 }
 0x600   :  { %v2330_v42 = vrot.slane %v2195_v62, %v4599_v17 }
 0x601   :  { %4208 = vmatprep.mubr.msk.f32.mxu1 %vm889_vm12, %v1745_v37  ;;  %v2317_v37 = vsel %vm636_vm3, %v2316_v33, %v2312_v34 }
 0x602   :  { %4209 = vmatmul.mubr.msk.f32.vlgmr.msra.gmra.mrb[6].mxu1 %vm889_vm12, %v1746_v44  ;;  %v2234_v50 = vpop.xlane.xlu1 %2233  ;;  %v2326_v44 = vsel %vm636_vm3, %v2325_v35, %v2321_v30  ;;  %v2335_v55 = vsel %vm636_vm3, %v2334_v39, %v2330_v42 }
 0x603   :  { %4343 = vmatpush3.bf16.xpose.msk.msra.mxu1 %vm4616_vm2, %v5282_v27  ;;  %4226 = vmatprep.mubr.msk.f32.mxu1 %vm496_vm1, %v1959_v46  ;;  %v4020_v27 = vld [vmem:[%s5944_s6 + $0x68] sm:$0xff]  ;;  %v2231_v58 = vpop.xlane.xlu0 %2230  ;;  %v2388_v21 = vrot.slane %v2234_v50, %v4601_v19 }
 0x604   :  { %v4348_v45 = vpack.c.bf16 %v4020_v27, %v4019_v26  ;;  %v2384_v14 = vrot.slane %v2231_v58, %v4599_v17 }
 0x606   :  { %4349 = vmatprep.subr.bf16.mxu1 %v4348_v45  ;;  %v2240_v3 = vpop.xlane.xlu1 %2239  ;;  %v2389_v51 = vsel %vm636_vm3, %v2388_v21, %v2384_v14 }
 0x607   :  { %v2237_v57 = vpop.xlane.xlu0 %2236  ;;  %v2397_v24 = vrot.slane %v2240_v3, %v4601_v19 }
 0x608   :  { %v2393_v29 = vrot.slane %v2237_v57, %v4599_v17 }
 0x60a   :  { %4227 = vmatmul.mubr.msk.f32.vlgmr.msra.gmra.mrb[8].mxu1 %vm496_vm1, %v1960_v48  ;;  %v2204_v1 = vpop.xlane.xlu1 %2203  ;;  %v2398_v52 = vsel %vm636_vm3, %v2397_v24, %v2393_v29 }
 0x60b   :  { %4244 = vmatprep.mubr.msk.f32.mxu1 %vm66_vm0, %v4443_v54  ;;  %4351 = vmatpush3.bf16.msra.mxu1 %v4348_v45  ;;  %v2201_v6 = vpop.xlane.xlu0 %2200  ;;  %v2460_v54 = vsel %vm773_vm4, %v2398_v52, %v2389_v51  ;;  %v2343_v26 = vrot.slane %v2204_v1, %v4601_v19  ;;  %v2453_v45 = vsel %vm773_vm4, %v2326_v44, %v2317_v37 }
 0x60c   :  { %4353 = vmatprep.subr.bf16.mxu1 %v4352_v53  ;;  %v2339_v27 = vrot.slane %v2201_v6, %v4599_v17  ;;  %v2454_v58 = vsel %vm775_vm5, %v2335_v55, %v2453_v45 }
 0x60e   :  { %v2246_v40 = vpop.xlane.xlu1 %2245  ;;  %v2344_v3 = vsel %vm636_vm3, %v2343_v26, %v2339_v27 }
 0x60f   :  { %4355 = vmatpush3.bf16.msra.mxu1 %v4352_v53  ;;  %v2243_v7 = vpop.xlane.xlu0 %2242  ;;  %v2406_v13 = vrot.slane %v2246_v40, %v4601_v19 }
 0x610   :  { %v2402_v31 = vrot.slane %v2243_v7, %v4599_v17 }
 0x612   :  { %4245 = vmatmul.mubr.msk.f32.vlgmr.msra.gmra.mrb[10].mxu1 %vm66_vm0, %v5186_v20  ;;  %v2210_v9 = vpop.xlane.xlu1 %2209  ;;  %v2407_v25 = vsel %vm636_vm3, %v2406_v13, %v2402_v31 }
 0x613   :  { %v2207_v8 = vpop.xlane.xlu0 %2206  ;;  %v2461_v60 = vsel %vm775_vm5, %v2407_v25, %v2460_v54  ;;  %v2352_v61 = vrot.slane %v2210_v9, %v4601_v19 }
 0x614   :  { %v2348_v62 = vrot.slane %v2207_v8, %v4599_v17  ;;  %v2455_v8 = vsel %vm777_vm6, %v2344_v3, %v2454_v58 }
 0x616   :  { %v2252_v10 = vpop.xlane.xlu1 %2251 }
 0x617   :  { %v2249_v11 = vpop.xlane.xlu0 %2248  ;;  %v2415_v46 = vrot.slane %v2252_v10, %v4601_v19  ;;  %v2353_v10 = vsel %vm636_vm3, %v2352_v61, %v2348_v62 }
 0x618   :  { %v2411_v48 = vrot.slane %v2249_v11, %v4599_v17  ;;  %v2456_v14 = vsel %vm779_vm7, %v2353_v10, %v2455_v8 }
 0x61a   :  { %v5500_v2 = vpop.xlane.xlu1 %2215  ;;  %v2416_v50 = vsel %vm636_vm3, %v2415_v46, %v2411_v48 }
 0x61b   :  { %v2213_v20 = vpop.xlane.xlu0 %2212  ;;  %v2462_v6 = vsel %vm777_vm6, %v2416_v50, %v2461_v60  ;;  %v2361_v40 = vrot.slane %v5500_v2, %v4601_v19  ;;  %v4062_v50 = vld [vmem:[%s5947_s9 + $0x3] ss:$0 sm:$0xff] }
 0x61c   :  { %v2357_v7 = vrot.slane %v2213_v20, %v4599_v17 }
 0x61e   :  { %v2258_v4 = vpop.xlane.xlu1 %2257  ;;  %v2362_v24 = vsel %vm636_vm3, %v2361_v40, %v2357_v7 }
 0x61f   :  { %v2255_v12 = vpop.xlane.xlu0 %2254  ;;  %v2424_v53 = vrot.slane %v2258_v4, %v4601_v19  ;;  %v2457_v39 = vsel %vm781_vm8, %v2362_v24, %v2456_v14 }
 0x620   :  { %v2420_v56 = vrot.slane %v2255_v12, %v4599_v17 }
 0x622   :  { %v5502_v5 = vpop.xlane.xlu1 %2221  ;;  %v2425_v9 = vsel %vm636_vm3, %v2424_v53, %v2420_v56  ;;  %v4024_v56 = vld [vmem:[%s5945_s7 + $0x3] ss:$0 sm:$0xff]  ;;  %s3897_s7 = sshll.u32 %s4476_s30, 4  ;;  %s3898_s7 = int_to_ptr.vmem [resolvable:$true] %s3897_s7 }
 0x623   :  { %v5504_v15 = vpop.xlane.xlu0 %2218  ;;  %v2370_v21 = vrot.slane %v5502_v5, %v4601_v19  ;;  %p4449_p1 = scmp.lt.s32.totalorder %s3898_s7, %s3898_s7 }
 0x624   :  { %v2366_v2 = vrot.slane %v5504_v15, %v4599_v17 }
 0x626   :  { %v2264_v16 = vpop.xlane.xlu1 %2263  ;;  %v2371_v31 = vsel %vm636_vm3, %v2370_v21, %v2366_v2 }
 0x627   :  { %v2261_v18 = vpop.xlane.xlu0 %2260  ;;  %v2433_v57 = vrot.slane %v2264_v16, %v4601_v19  ;;  %v2458_v37 = vsel %vm783_vm9, %v2371_v31, %v2457_v39 }
 0x628   :  { %v2429_v1 = vrot.slane %v2261_v18, %v4599_v17  ;;  %v2463_v18 = vsel %vm779_vm7, %v2425_v9, %v2462_v6 }
 0x62a   :  { %v2228_v36 = vpop.xlane.xlu1 %2227  ;;  %v2434_v20 = vsel %vm636_vm3, %v2433_v57, %v2429_v1 }
 0x62b   :  { %v2225_v41 = vpop.xlane.xlu0 %2224  ;;  %v2379_v30 = vrot.slane %v2228_v36, %v4601_v19  ;;  %v2464_v13 = vsel %vm781_vm8, %v2434_v20, %v2463_v18  ;;  %v4029_v18 = vld [vmem:[%s5939_s1 + $0x300] sm:$0xff] }
 0x62c   :  { %v2375_v5 = vrot.slane %v2225_v41, %v4599_v17 }
 0x62e   :  { %v2270_v47 = vpop.xlane.xlu1 %2269  ;;  %v2380_v52 = vsel %vm636_vm3, %v2379_v30, %v2375_v5 }
 0x62f   :  { %v2267_v59 = vpop.xlane.xlu0 %2266  ;;  %v2442_v11 = vrot.slane %v2270_v47, %v4601_v19  ;;  %v2459_v46 = vsel %vm785_vm10, %v2380_v52, %v2458_v37 }
 0x630   :  { %v2438_v4 = vrot.slane %v2267_v59, %v4599_v17 }
 0x632   :  { %v2276_v12 = vpop.xlane.xlu1 %2275  ;;  %v2443_v15 = vsel %vm636_vm3, %v2442_v11, %v2438_v4 }
 0x633   :  { %v2273_v16 = vpop.xlane.xlu0 %2272  ;;  %v2451_v33 = vrot.slane %v2276_v12, %v4601_v19  ;;  %v2465_v51 = vsel %vm783_vm9, %v2443_v15, %v2464_v13  ;;  %v4031_v15 = vld [vmem:[%s5939_s1 + $0x310] sm:$0xff] }
 0x634   :  { %v2447_v34 = vrot.slane %v2273_v16, %v4599_v17  ;;  %v4030_v16 = vld [vmem:[%s5939_s1 + $0x308] sm:$0xff] }
 0x636   :  { %v2452_v42 = vsel %vm636_vm3, %v2451_v33, %v2447_v34  ;;  %v4032_v34 = vld [vmem:[%s5939_s1 + $0x318] sm:$0xff] }
 0x637   :  { %v2466_v36 = vsel %vm785_vm10, %v2452_v42, %v2465_v51 }
 0x6d5   :  { %v5557_v29 = vpop.f32.mrb[6].mxu1 }
 0x6d6   :  { %v5561_v35 = vpop.f32.mrb[7].mxu1 }
 0x6dd   :  { %v4228_v44 = vpop.f32.mrb[8].mxu1 }
 0x6de   :  { %v2553_v41 = vadd.f32 %v4228_v44, %v2466_v36  ;;  %v2547_v48 = vpop.f32.mrb[9].mxu1  ;;  %v4034_v44 = vld [vmem:[%s5939_s1 + $0x328] sm:$0xff] }
 0x6df   :  { %v2548_v54 = vadd.f32 %v2547_v48, %v2459_v46 }
 0x6e0   :  { %v2557_v26 = vmul.f32 0.35355338, %v2553_v41  ;;  %v4033_v41 = vld [vmem:[%s5939_s1 + $0x320] sm:$0xff] }
 0x6e1   :  { %v2556_v27 = vmul.f32 0.35355338, %v2548_v54 }
 0x6e2   :  { %v2559_v25 = vsel %vm886_vm11, %v2557_v26, -1e+15 }
 0x6e3   :  { %v2563_v45 = vsel %vm889_vm12, %v2559_v25, -inf  ;;  %v2558_v55 = vsel %vm885_vm13, %v2556_v27, -1e+15 }
 0x6e4   :  { %2564 = vmax.xlane.f32.xlu1 %v2563_v45  ;;  %v2560_v53 = vsel %vm889_vm12, %v2558_v55, -inf  ;;  %v4046_v45 = vld [vmem:[%s5939_s1 + $0x388] sm:$0xff] }
 0x6e5   :  { %2561 = vmax.xlane.f32.xlu0 %v2560_v53  ;;  %v4246_v47 = vpop.f32.mrb[10].mxu1 }
 0x6e6   :  { %v2742_v59 = vpop.f32.mrb[11].mxu1  ;;  %v5584_v60 = vadd.f32 %v4246_v47, %v4024_v56 }
 0x6e7   :  { %v5586_v61 = vadd.f32 %v4024_v56, %v2742_v59 }
 0x6e8   :  { %v5604_v11 = vadd.f32 %v4062_v50, %v5584_v60 }
 0x6e9   :  { %v5590_v62 = vpack.c.bf16 %v5584_v60, %v5586_v61  ;;  %v2802_v58 = vadd.f32 %v4062_v50, %v5586_v61 }
 0x6ea   :  { %v2862_v21 = vrot.slane %v5604_v11, %v4612_v28 }
 0x6eb   :  { %4363 = vmatprep.subr.bf16.mxu1 %v5590_v62  ;;  %4358 = vmatprep.subr.msk.bf16.mxu0 %vm4616_vm2, %v5590_v62  ;;  %v2813_v40 = vrot.slane %v2802_v58, %v4612_v28  ;;  %v2806_v53 = vcombine.high %v2802_v58, %v2802_v58 }
 0x6ec   :  { %4365 = vmatpush3.bf16.msra.mxu1 %v5590_v62  ;;  %v2870_v31 = vcombine.high %v2862_v21, %v2862_v21  ;;  %v2878_v52 = vrot.slane %v2862_v21, %v4612_v28 }
 0x6ed   :  { %v2821_v8 = vcombine.high %v2813_v40, %v2813_v40  ;;  %v2829_v10 = vrot.slane %v2813_v40, %v4612_v28  ;;  %v2820_v58 = vrot.slane %v2806_v53, %v4612_v28 }
 0x6ee   :  { %v2939_v54 = vrot.slane %v2878_v52, %v4621_v38  ;;  %v2892_v26 = vrot.slane %v2870_v31, %v4612_v28 }
 0x6ef   :  { %v2907_v4 = vrot.slane %v2829_v10, %v4621_v38  ;;  %v2843_v12 = vrot.slane %v2821_v8, %v4612_v28  ;;  %v2851_v14 = vcombine.high %v2829_v10, %v2829_v10  ;;  %v2900_v8 = vcombine.high %v2878_v52, %v2878_v52 }
 0x6f0   :  { %v3001_v47 = vmul.f32 %v4046_v45, %v2939_v54  ;;  %v2943_v59 = vrot.slane %v2892_v26, %v4621_v38  ;;  %v4051_v45 = vld [vmem:[%s5939_s1 + $0x3b0] sm:$0xff] }
 0x6f1   :  { %v2985_v2 = vmul.f32 %v4030_v16, %v2907_v4  ;;  %v2911_v20 = vrot.slane %v2843_v12, %v4621_v38  ;;  %v2984_v33 = vmul.f32 %v4029_v18, %v2907_v4  ;;  %v2915_v51 = vrot.slane %v2851_v14, %v4621_v38  ;;  %v4035_v16 = vld [vmem:[%s5939_s1 + $0x330] sm:$0xff] }
 0x6f2   :  { %v2853_v50 = vcombine.high %v2843_v12, %v2843_v12  ;;  %v3067_v40 = vsel %vm496_vm1, %v3001_v47, 0.0  ;;  %v4036_v12 = vld [vmem:[%s5939_s1 + $0x338] sm:$0xff] }
 0x6f3   :  { %v3019_v39 = vsel %vm496_vm1, %v2985_v2, 0.0  ;;  %v2987_v42 = vmul.f32 %v4032_v34, %v2911_v20  ;;  %v3016_v37 = vsel %vm496_vm1, %v2984_v33, 0.0  ;;  %v2986_v36 = vmul.f32 %v4031_v15, %v2911_v20  ;;  %v4050_v34 = vld [vmem:[%s5939_s1 + $0x3a8] sm:$0xff] }
 0x6f4   :  { %v2989_v48 = vmul.f32 %v4034_v44, %v2915_v51  ;;  %v2947_v2 = vrot.slane %v2900_v8, %v4621_v38  ;;  %v2836_v20 = vrot.slane %v2820_v58, %v4612_v28  ;;  %v2902_v15 = vcombine.high %v2892_v26, %v2892_v26  ;;  %v4037_v44 = vld [vmem:[%s5939_s1 + $0x340] sm:$0xff] }
 0x6f5   :  { %v3025_v46 = vsel %vm496_vm1, %v2987_v42, 0.0  ;;  %v3022_v27 = vsel %vm496_vm1, %v2986_v36, 0.0  ;;  %v2822_v36 = vcombine.high %v2820_v58, %v2820_v58 }
 0x6f6   :  { %v3031_v56 = vsel %vm496_vm1, %v2989_v48, 0.0  ;;  %v2923_v42 = vrot.slane %v2836_v20, %v4621_v38 }
 0x6f7   :  { %v2850_v26 = vrot.slane %v2822_v36, %v4612_v28 }
 0x771   :  { %v2565_v3 = vpop.xlane.xlu1 %2564 }
 0x772   :  { %v2567_v57 = vsub.f32 %v2559_v25, %v2565_v3  ;;  %v2562_v1 = vpop.xlane.xlu0 %2561  ;;  %v2988_v25 = vmul.f32 %v4033_v41, %v2915_v51 }
 0x773   :  { %v2566_v6 = vsub.f32 %v2558_v55, %v2562_v1  ;;  %v4045_v55 = vld [vmem:[%s5939_s1 + $0x380] sm:$0xff]  ;;  %v4048_v1 = vld [vmem:[%s5939_s1 + $0x398] sm:$0xff] }
 0x774   :  { %v2570_v7 = vmul.f32 1.442695, %v2567_v57  ;;  %v3028_v3 = vsel %vm496_vm1, %v2988_v25, 0.0  ;;  %v3000_v57 = vmul.f32 %v4045_v55, %v2939_v54  ;;  %v4052_v54 = vld [vmem:[%s5939_s1 + $0x3b8] sm:$0xff]  ;;  %v2992_v25 = vmul.f32 %v4037_v44, %v2923_v42 }
 0x775   :  { %v2568_v9 = vmul.f32 1.442695, %v2566_v6  ;;  %v4047_v6 = vld [vmem:[%s5939_s1 + $0x390] sm:$0xff] }
 0x776   :  { %4404 = vpow2.f32 %v2570_v7  ;;  %v3003_v7 = vmul.f32 %v4048_v1, %v2943_v59  ;;  %v3064_v10 = vsel %vm496_vm1, %v3000_v57, 0.0  ;;  %v3002_v4 = vmul.f32 %v4047_v6, %v2943_v59  ;;  %v4039_v57 = vld [vmem:[%s5939_s1 + $0x350] sm:$0xff] }
 0x777   :  { %4406 = vpow2.f32 %v2568_v9  ;;  %v2919_v9 = vrot.slane %v2853_v50, %v4621_v38  ;;  %v3040_v59 = vsel %vm496_vm1, %v2992_v25, 0.0 }
 0x778   :  { %v3073_v18 = vsel %vm496_vm1, %v3003_v7, 0.0  ;;  %v3070_v14 = vsel %vm496_vm1, %v3002_v4, 0.0  ;;  %v4053_v4 = vld [vmem:[%s5939_s1 + $0x3c0] sm:$0xff] }
 0x779   :  { %v2991_v21 = vmul.f32 %v4036_v12, %v2919_v9  ;;  %v2990_v33 = vmul.f32 %v4035_v16, %v2919_v9 }
 0x77b   :  { %v3037_v31 = vsel %vm496_vm1, %v2991_v21, 0.0  ;;  %v3034_v51 = vsel %vm496_vm1, %v2990_v33, 0.0  ;;  %v4041_v33 = vld [vmem:[%s5939_s1 + $0x360] sm:$0xff] }
 0x780   :  { %v5617_v24 = vpop.eup %4404 }
 0x781   :  { %v5622_v30 = vpop.eup %4406  ;;  %v2575_v5 = vsel %vm889_vm12, %v5617_v24, 0.0 }
 0x782   :  { %2576 = vadd.xlane.f32.xlu1 %v2575_v5  ;;  %v2572_v13 = vsel %vm889_vm12, %v5622_v30, 0.0  ;;  %v4049_v5 = vld [vmem:[%s5939_s1 + $0x3a0] sm:$0xff] }
 0x783   :  { %2573 = vadd.xlane.f32.xlu0 %v2572_v13  ;;  %v2855_v13 = vcombine.high %v5604_v11, %v5604_v11  ;;  %v3004_v52 = vmul.f32 %v4049_v5, %v2947_v2  ;;  %v2951_v11 = vrot.slane %v2902_v15, %v4621_v38 }
 0x785   :  { %v2869_v41 = vrot.slane %v2855_v13, %v4612_v28  ;;  %v3007_v55 = vmul.f32 %v4052_v54, %v2951_v11  ;;  %v3006_v50 = vmul.f32 %v4051_v45, %v2951_v11  ;;  %v2854_v13 = vcombine.high %v2850_v26, %v2850_v26 }
 0x786   :  { %3020 = vadd.xlane.f32.xlu1 %v3019_v39  ;;  %v3005_v39 = vmul.f32 %v4050_v34, %v2947_v2 }
 0x787   :  { %3017 = vadd.xlane.f32.xlu0 %v3016_v37  ;;  %v4038_v37 = vld [vmem:[%s5939_s1 + $0x348] sm:$0xff]  ;;  %v2885_v47 = vrot.slane %v2869_v41, %v4612_v28  ;;  %v3085_v1 = vsel %vm496_vm1, %v3007_v55, 0.0  ;;  %v2871_v7 = vcombine.high %v2869_v41, %v2869_v41  ;;  %v3082_v9 = vsel %vm496_vm1, %v3006_v50, 0.0  ;;  %v4044_v41 = vld [vmem:[%s5939_s1 + $0x378] sm:$0xff] }
 0x788   :  { %v2993_v48 = vmul.f32 %v4038_v37, %v2923_v42  ;;  %v4055_v42 = vld [vmem:[%s5939_s1 + $0x3d0] sm:$0xff]  ;;  %v2935_v37 = vrot.slane %v2854_v13, %v4621_v38  ;;  %v4058_v55 = vld [vmem:[%s5939_s1 + $0x3e8] sm:$0xff] }
 0x789   :  { %v2955_v58 = vrot.slane %v2885_v47, %v4621_v38  ;;  %v2899_v21 = vrot.slane %v2871_v7, %v4612_v28  ;;  %v2901_v36 = vcombine.high %v2885_v47, %v2885_v47 }
 0x78a   :  { %3026 = vadd.xlane.f32.xlu1 %v3025_v46  ;;  %v3079_v46 = vsel %vm496_vm1, %v3005_v39, 0.0  ;;  %v3043_v53 = vsel %vm496_vm1, %v2993_v48, 0.0  ;;  %v4056_v39 = vld [vmem:[%s5939_s1 + $0x3d8] sm:$0xff]  ;;  %v2999_v54 = vmul.f32 %v4044_v41, %v2935_v37 }
 0x78b   :  { %3023 = vadd.xlane.f32.xlu0 %v3022_v27  ;;  %v3076_v27 = vsel %vm496_vm1, %v3004_v52, 0.0  ;;  %v2959_v15 = vrot.slane %v2899_v21, %v4621_v38 }
 0x78d   :  { %v3011_v52 = vmul.f32 %v4056_v39, %v2959_v15  ;;  %v3010_v11 = vmul.f32 %v4055_v42, %v2959_v15 }
 0x78e   :  { %3032 = vadd.xlane.f32.xlu1 %v3031_v56  ;;  %v2927_v56 = vrot.slane %v2850_v26, %v4621_v38  ;;  %v2963_v26 = vrot.slane %v2901_v36, %v4621_v38 }
 0x78f   :  { %3029 = vadd.xlane.f32.xlu0 %v3028_v3  ;;  %v4040_v3 = vld [vmem:[%s5939_s1 + $0x358] sm:$0xff]  ;;  %v3097_v48 = vsel %vm496_vm1, %v3011_v52, 0.0  ;;  %v3094_v25 = vsel %vm496_vm1, %v3010_v11, 0.0 }
 0x790   :  { %v2995_v6 = vmul.f32 %v4040_v3, %v2927_v56  ;;  %v2994_v8 = vmul.f32 %v4039_v57, %v2927_v56  ;;  %v3061_v56 = vsel %vm496_vm1, %v2999_v54, 0.0  ;;  %v3013_v47 = vmul.f32 %v4058_v55, %v2963_v26  ;;  %v4060_v57 = vld [vmem:[%s5939_s1 + $0x3f8] sm:$0xff] }
 0x792   :  { %3068 = vadd.xlane.f32.xlu1 %v3067_v40  ;;  %v2852_v40 = vcombine.high %v2836_v20, %v2836_v20  ;;  %v3049_v12 = vsel %vm496_vm1, %v2995_v6, 0.0  ;;  %v3046_v2 = vsel %vm496_vm1, %v2994_v8, 0.0  ;;  %v3008_v20 = vmul.f32 %v4053_v4, %v2955_v58 }
 0x793   :  { %3065 = vadd.xlane.f32.xlu0 %v3064_v10  ;;  %v4054_v10 = vld [vmem:[%s5939_s1 + $0x3c8] sm:$0xff]  ;;  %v3103_v6 = vsel %vm496_vm1, %v3013_v47, 0.0 }
 0x794   :  { %v3009_v16 = vmul.f32 %v4054_v10, %v2955_v58  ;;  %v3088_v28 = vsel %vm496_vm1, %v3008_v20, 0.0 }
 0x796   :  { %3074 = vadd.xlane.f32.xlu1 %v3073_v18  ;;  %v2931_v18 = vrot.slane %v2852_v40, %v4621_v38  ;;  %v3091_v34 = vsel %vm496_vm1, %v3009_v16, 0.0 }
 0x797   :  { %3071 = vadd.xlane.f32.xlu0 %v3070_v14  ;;  %v4042_v14 = vld [vmem:[%s5939_s1 + $0x368] sm:$0xff] }
 0x798   :  { %v2997_v5 = vmul.f32 %v4042_v14, %v2931_v18 }
 0x79a   :  { %3038 = vadd.xlane.f32.xlu1 %v3037_v31  ;;  %v2996_v31 = vmul.f32 %v4041_v33, %v2931_v18  ;;  %v4061_v18 = vld [vmem:[%s5946_s8 + $0x3] ss:$0 sm:$0xff]  ;;  %s4469_s8 = smov 8  }
 0x79b   :  { %3035 = vadd.xlane.f32.xlu0 %v3034_v51  ;;  %v3055_v51 = vsel %vm496_vm1, %v2997_v5, 0.0  ;;  %v2794_v20 = vadd.f32 %v4061_v18, %v5586_v61  ;;  %v2795_v14 = vadd.f32 %v4061_v18, %v5584_v60 }
 0x79c   :  { %v3052_v44 = vsel %vm496_vm1, %v2996_v31, 0.0 }
 0x79e   :  { %3080 = vadd.xlane.f32.xlu1 %v3079_v46  ;;  %v4043_v46 = vld [vmem:[%s5939_s1 + $0x370] sm:$0xff] }
 0x79f   :  { %3077 = vadd.xlane.f32.xlu0 %v3076_v27  ;;  %v2903_v27 = vcombine.high %v2899_v21, %v2899_v21  ;;  %v2998_v45 = vmul.f32 %v4043_v46, %v2935_v37 }
 0x7a1   :  { %v3058_v50 = vsel %vm496_vm1, %v2998_v45, 0.0 }
 0x7a2   :  { %3044 = vadd.xlane.f32.xlu1 %v3043_v53  ;;  %v4057_v53 = vld [vmem:[%s5939_s1 + $0x3e0] sm:$0xff] }
 0x7a3   :  { %3041 = vadd.xlane.f32.xlu0 %v3040_v59  ;;  %v2967_v59 = vrot.slane %v2903_v27, %v4621_v38  ;;  %v3012_v3 = vmul.f32 %v4057_v53, %v2963_v26 }
 0x7a5   :  { %v3015_v58 = vmul.f32 %v4060_v57, %v2967_v59  ;;  %v3100_v40 = vsel %vm496_vm1, %v3012_v3, 0.0 }
 0x7a6   :  { %3086 = vadd.xlane.f32.xlu1 %v3085_v1  ;;  %v4059_v1 = vld [vmem:[%s5939_s1 + $0x3f0] sm:$0xff] }
 0x7a7   :  { %3083 = vadd.xlane.f32.xlu0 %v3082_v9  ;;  %v3014_v7 = vmul.f32 %v4059_v1, %v2967_v59  ;;  %v3109_v9 = vsel %vm496_vm1, %v3015_v58, 0.0 }
 0x7a9   :  { %v3106_v8 = vsel %vm496_vm1, %v3014_v7, 0.0 }
 0x7aa   :  { %3050 = vadd.xlane.f32.xlu1 %v3049_v12 }
 0x7ab   :  { %3047 = vadd.xlane.f32.xlu0 %v3046_v2 }
 0x7ae   :  { %3092 = vadd.xlane.f32.xlu1 %v3091_v34 }
 0x7af   :  { %3089 = vadd.xlane.f32.xlu0 %v3088_v28 }
 0x7b2   :  { %3056 = vadd.xlane.f32.xlu1 %v3055_v51 }
 0x7b3   :  { %3053 = vadd.xlane.f32.xlu0 %v3052_v44 }
 0x7b6   :  { %3098 = vadd.xlane.f32.xlu1 %v3097_v48 }
 0x7b7   :  { %3095 = vadd.xlane.f32.xlu0 %v3094_v25 }
 0x7ba   :  { %3062 = vadd.xlane.f32.xlu1 %v3061_v56 }
 0x7bb   :  { %3059 = vadd.xlane.f32.xlu0 %v3058_v50 }
 0x7be   :  { %3104 = vadd.xlane.f32.xlu1 %v3103_v6 }
 0x7bf   :  { %3101 = vadd.xlane.f32.xlu0 %v3100_v40 }
 0x7c2   :  { %3110 = vadd.xlane.f32.xlu1 %v3109_v9 }
 0x7c3   :  { %3107 = vadd.xlane.f32.xlu0 %v3106_v8 }
 0x80f   :  { %v2577_v10 = vpop.xlane.xlu1 %2576 }
 0x810   :  { %4408 = vrcp.f32 %v2577_v10  ;;  %v2574_v4 = vpop.xlane.xlu0 %2573 }
 0x811   :  { %4410 = vrcp.f32 %v2574_v4 }
 0x813   :  { %v3021_v33 = vpop.xlane.xlu1 %3020 }
 0x814   :  { %v3151_v53 = vrot.slane %v3021_v33, %v4601_v19 }
 0x817   :  { %v3027_v34 = vpop.xlane.xlu1 %3026 }
 0x818   :  { %v3160_v47 = vrot.slane %v3027_v34, %v4601_v19 }
 0x81a   :  { %v4409_v12 = vpop.eup %4408 }
 0x81b   :  { %v4411_v16 = vpop.eup %4410  ;;  %v2581_v2 = vmul.f32 %v4409_v12, %v5617_v24  ;;  %v3033_v5 = vpop.xlane.xlu1 %3032 }
 0x81c   :  { %v2580_v21 = vmul.f32 %v4411_v16, %v5622_v30  ;;  %v3018_v30 = vpop.xlane.xlu0 %3017  ;;  %v3169_v6 = vrot.slane %v3033_v5, %v4601_v19 }
 0x81d   :  { %v3147_v56 = vrot.slane %v3018_v30, %v4599_v17 }
 0x81e   :  { %4233 = vmatprep.mubr.msk.f32.mxu0 %vm889_vm12, %v2580_v21 }
 0x81f   :  { %4234 = vmatmul.mubr.msk.f32.vlgmr.msra.gmra.mrb[8].mxu0 %vm889_vm12, %v2581_v2  ;;  %v3069_v15 = vpop.xlane.xlu1 %3068  ;;  %v3152_v9 = vsel %vm636_vm3, %v3151_v53, %v3147_v56 }
 0x820   :  { %4361 = vmatpush3.bf16.xpose.msk.msra.mxu0 %vm4616_vm2, %v5590_v62  ;;  %4251 = vmatprep.mubr.msk.f32.mxu0 %vm496_vm1, %v2794_v20  ;;  %v3024_v24 = vpop.xlane.xlu0 %3023  ;;  %v3223_v27 = vrot.slane %v3069_v15, %v4601_v19 }
 0x821   :  { %v3156_v59 = vrot.slane %v3024_v24, %v4599_v17 }
 0x823   :  { %v3075_v28 = vpop.xlane.xlu1 %3074  ;;  %v3161_v8 = vsel %vm636_vm3, %v3160_v47, %v3156_v59 }
 0x824   :  { %v3030_v61 = vpop.xlane.xlu0 %3029  ;;  %v3232_v45 = vrot.slane %v3075_v28, %v4601_v19  ;;  %v3288_v2 = vsel %vm773_vm4, %v3161_v8, %v3152_v9 }
 0x825   :  { %v3165_v58 = vrot.slane %v3030_v61, %v4599_v17 }
 0x827   :  { %4252 = vmatmul.mubr.msk.f32.vlgmr.msra.gmra.mrb[10].mxu0 %vm496_vm1, %v2795_v14  ;;  %v3039_v39 = vpop.xlane.xlu1 %3038  ;;  %v3170_v20 = vsel %vm636_vm3, %v3169_v6, %v3165_v58 }
 0x828   :  { %v3066_v13 = vpop.xlane.xlu0 %3065  ;;  %v3178_v16 = vrot.slane %v3039_v39, %v4601_v19 }
 0x829   :  { %v3219_v25 = vrot.slane %v3066_v13, %v4599_v17  ;;  %v3289_v13 = vsel %vm775_vm5, %v3170_v20, %v3288_v2 }
 0x82b   :  { %v3081_v32 = vpop.xlane.xlu1 %3080  ;;  %v3224_v40 = vsel %vm636_vm3, %v3223_v27, %v3219_v25 }
 0x82c   :  { %v3072_v31 = vpop.xlane.xlu0 %3071  ;;  %v3241_v50 = vrot.slane %v3081_v32, %v4601_v19 }
 0x82d   :  { %v3228_v55 = vrot.slane %v3072_v31, %v4599_v17 }
 0x82f   :  { %v3045_v51 = vpop.xlane.xlu1 %3044  ;;  %v3233_v7 = vsel %vm636_vm3, %v3232_v45, %v3228_v55 }
 0x830   :  { %v3036_v42 = vpop.xlane.xlu0 %3035  ;;  %v3295_v12 = vsel %vm773_vm4, %v3233_v7, %v3224_v40  ;;  %v3187_v5 = vrot.slane %v3045_v51, %v4601_v19 }
 0x831   :  { %v3174_v18 = vrot.slane %v3036_v42, %v4599_v17 }
 0x833   :  { %v3087_v37 = vpop.xlane.xlu1 %3086  ;;  %v3179_v28 = vsel %vm636_vm3, %v3178_v16, %v3174_v18 }
 0x834   :  { %v3078_v62 = vpop.xlane.xlu0 %3077  ;;  %v3250_v10 = vrot.slane %v3087_v37, %v4601_v19 }
 0x835   :  { %v3237_v3 = vrot.slane %v3078_v62, %v4599_v17 }
 0x837   :  { %v5785_v36 = vpop.xlane.xlu1 %3050  ;;  %v3242_v21 = vsel %vm636_vm3, %v3241_v50, %v3237_v3 }
 0x838   :  { %v3042_v52 = vpop.xlane.xlu0 %3041  ;;  %v3296_v24 = vsel %vm775_vm5, %v3242_v21, %v3295_v12  ;;  %v3196_v32 = vrot.slane %v5785_v36, %v4601_v19  ;;  %vm3719_vm5 = vcmask 123904  }
 0x839   :  { %v3183_v61 = vrot.slane %v3042_v52, %v4599_v17  ;;  %v3290_v52 = vsel %vm777_vm6, %v3179_v28, %v3289_v13 }
 0x83b   :  { %v3093_v11 = vpop.xlane.xlu1 %3092  ;;  %v3188_v37 = vsel %vm636_vm3, %v3187_v5, %v3183_v61 }
 0x83c   :  { %v3084_v60 = vpop.xlane.xlu0 %3083  ;;  %v3259_v14 = vrot.slane %v3093_v11, %v4601_v19  ;;  %v3291_v25 = vsel %vm779_vm7, %v3188_v37, %v3290_v52  ;;  %v3905_v52 = vld [vmem:[%s5943_s5] ss:$0 sm:$0xff] }
 0x83d   :  { %v3246_v4 = vrot.slane %v3084_v60, %v4599_v17 }
 0x83f   :  { %v5787_v46 = vpop.xlane.xlu1 %3056  ;;  %v3251_v15 = vsel %vm636_vm3, %v3250_v10, %v3246_v4 }
 0x840   :  { %v3048_v44 = vpop.xlane.xlu0 %3047  ;;  %v3297_v42 = vsel %vm777_vm6, %v3251_v15, %v3296_v24  ;;  %v3205_v27 = vrot.slane %v5787_v46, %v4601_v19  ;;  %vm3889_vm6 = vcmask 33792  }
 0x841   :  { %v3192_v62 = vrot.slane %v3048_v44, %v4599_v17 }
 0x843   :  { %v3099_v54 = vpop.xlane.xlu1 %3098  ;;  %v3197_v45 = vsel %vm636_vm3, %v3196_v32, %v3192_v62 }
 0x844   :  { %v3090_v41 = vpop.xlane.xlu0 %3089  ;;  %v3268_v31 = vrot.slane %v3099_v54, %v4601_v19  ;;  %v3292_v6 = vsel %vm781_vm8, %v3197_v45, %v3291_v25 }
 0x845   :  { %v3255_v33 = vrot.slane %v3090_v41, %v4599_v17 }
 0x847   :  { %v3063_v57 = vpop.xlane.xlu1 %3062  ;;  %v3260_v51 = vsel %vm636_vm3, %v3259_v14, %v3255_v33 }
 0x848   :  { %v5789_v48 = vpop.xlane.xlu0 %3053  ;;  %v3214_v59 = vrot.slane %v3063_v57, %v4601_v19 }
 0x849   :  { %v3201_v36 = vrot.slane %v5789_v48, %v4599_v17 }
 0x84b   :  { %v3105_v30 = vpop.xlane.xlu1 %3104  ;;  %v3206_v3 = vsel %vm636_vm3, %v3205_v27, %v3201_v36  ;;  %v140_v27 = vadd.f32 %v3905_v52, %v4821_v0 }
 0x84c   :  { %v3096_v26 = vpop.xlane.xlu0 %3095  ;;  %v3277_v60 = vrot.slane %v3105_v30, %v4601_v19  ;;  %v3293_v9 = vsel %vm783_vm9, %v3206_v3, %v3292_v6 }
 0x84d   :  { %v3264_v39 = vrot.slane %v3096_v26, %v4599_v17  ;;  %v3298_v26 = vsel %vm779_vm7, %v3260_v51, %v3297_v42 }
 0x84f   :  { %v3111_v41 = vpop.xlane.xlu1 %3110  ;;  %v3269_v44 = vsel %vm636_vm3, %v3268_v31, %v3264_v39 }
 0x850   :  { %v3060_v1 = vpop.xlane.xlu0 %3059  ;;  %v3286_v53 = vrot.slane %v3111_v41, %v4601_v19  ;;  %v3299_v48 = vsel %vm781_vm8, %v3269_v44, %v3298_v26 }
 0x851   :  { %v3210_v50 = vrot.slane %v3060_v1, %v4599_v17 }
 0x853   :  { %v3215_v7 = vsel %vm636_vm3, %v3214_v59, %v3210_v50 }
 0x854   :  { %v3102_v34 = vpop.xlane.xlu0 %3101  ;;  %v3294_v1 = vsel %vm785_vm10, %v3215_v7, %v3293_v9 }
 0x855   :  { %v3273_v11 = vrot.slane %v3102_v34, %v4599_v17 }
 0x857   :  { %v3278_v46 = vsel %vm636_vm3, %v3277_v60, %v3273_v11  ;;  %v145_v11 = vadd.f32 %v4819_v63, %v3905_v52 }
 0x858   :  { %v3108_v54 = vpop.xlane.xlu0 %3107  ;;  %v3300_v40 = vsel %vm783_vm9, %v3278_v46, %v3299_v48 }
 0x859   :  { %v3282_v56 = vrot.slane %v3108_v54, %v4599_v17 }
 0x85b   :  { %v3287_v58 = vsel %vm636_vm3, %v3286_v53, %v3282_v56  ;;  %vm4368_vm3 = vmpackc.low %vm66_vm0, %vm66_vm0 }
 0x85c   :  { %v3301_v19 = vsel %vm785_vm10, %v3287_v58, %v3300_v40  ;;  %v4472_v58 = vmov 0.0|0.0   ;;  %v4474_v40 = vmov 0.0  }
 0x85d   :  { %4370 = vmatprep.subr.bf16.mxu1 %v4472_v58  ;;  %4366 = vmatprep.subr.bf16.mxu0 %v4472_v58 }
 0x85e   :  { %4265 = vmatprep.mubr.msk.f32.mxu0 %vm4473_vm15, %v4474_v40 }
 0x8f2   :  { %v4235_v55 = vpop.f32.mrb[8].mxu0 }
 0x8f3   :  { %v2654_v47 = vpop.f32.mrb[9].mxu0 }
 0x8fa   :  { %v4253_v57 = vpop.f32.mrb[10].mxu0 }
 0x8fb   :  { %v3388_v17 = vadd.f32 %v4253_v57, %v3301_v19  ;;  %v3382_v8 = vpop.f32.mrb[11].mxu0 }
 0x8fc   :  { %v3383_v10 = vadd.f32 %v3382_v8, %v3294_v1 }
 0x8fd   :  { %v3392_v4 = vmul.f32 0.35355338, %v3388_v17 }
 0x8fe   :  { %v3391_v12 = vmul.f32 0.35355338, %v3383_v10  ;;  %v4069_v10 = vld [vmem:[%s5948_s10] ss:$0 sm:$0xff] }
 0x8ff   :  { %v3394_v16 = vsel %vm886_vm11, %v3392_v4, -1e+15 }
 0x900   :  { %v3398_v18 = vsel %vm889_vm12, %v3394_v16, -inf  ;;  %v3393_v21 = vsel %vm885_vm13, %v3391_v12, -1e+15  ;;  %v4070_v12 = vld [vmem:[%s5949_s11] ss:$0 sm:$0xff] }
 0x901   :  { %3399 = vmax.xlane.f32.xlu1 %v3398_v18  ;;  %v3395_v2 = vsel %vm889_vm12, %v3393_v21, -inf }
 0x902   :  { %3396 = vmax.xlane.f32.xlu0 %v3395_v2 }
 0x98e   :  { %v3400_v20 = vpop.xlane.xlu1 %3399 }
 0x98f   :  { %v3402_v14 = vsub.f32 %v3394_v16, %v3400_v20  ;;  %v3397_v33 = vpop.xlane.xlu0 %3396 }
 0x990   :  { %v3401_v30 = vsub.f32 %v3393_v21, %v3397_v33 }
 0x991   :  { %v3405_v34 = vmul.f32 1.442695, %v3402_v14 }
 0x992   :  { %v3403_v24 = vmul.f32 1.442695, %v3401_v30 }
 0x993   :  { %4412 = vpow2.f32 %v3405_v34 }
 0x994   :  { %4414 = vpow2.f32 %v3403_v24 }
 0x99d   :  { %v4413_v5 = vpop.eup %4412 }
 0x99e   :  { %v4415_v43 = vpop.eup %4414  ;;  %v3410_v61 = vsel %vm889_vm12, %v4413_v5, 0.0 }
 0x99f   :  { %3411 = vadd.xlane.f32.xlu1 %v3410_v61  ;;  %v3407_v49 = vsel %vm889_vm12, %v4415_v43, 0.0 }
 0x9a0   :  { %3408 = vadd.xlane.f32.xlu0 %v3407_v49 }
 0x9b0   :  { %3502 = vrot.lane.b32.xlu1 %v5557_v29, %s4469_s8 }
 0x9b4   :  { %3508 = vrot.lane.b32.xlu1 %v2654_v47, %s4470_s2 }
 0x9b6   :  { %3500 = vrot.lane.b32.xlu0 %v5561_v35, %s4469_s8 }
 0x9b8   :  { %3510 = vrot.lane.b32.xlu1 %v4235_v55, %s4470_s2 }
 0xa2c   :  { %v3412_v15 = vpop.xlane.xlu1 %3411 }
 0xa2d   :  { %4416 = vrcp.f32 %v3412_v15  ;;  %v3409_v13 = vpop.xlane.xlu0 %3408 }
 0xa2e   :  { %4418 = vrcp.f32 %v3409_v13 }
 0xa30   :  { %v3503_v62 = vpop.permute.xlu1 %3502 }
 0xa31   :  { %v3501_v37 = vpop.permute.xlu0 %3500  ;;  %v3523_v60 = vsel %vm496_vm1, %v4959_v22, %v3503_v62 }
 0xa32   :  { %v3522_v41 = vsel %vm496_vm1, %v4961_v23, %v3501_v37 }
 0xa34   :  { %v3509_v35 = vpop.permute.xlu1 %3508 }
 0xa35   :  { %v3524_v36 = vsel %vm889_vm12, %v3522_v41, %v3509_v35 }
 0xa37   :  { %v4417_v28 = vpop.eup %4416 }
 0xa38   :  { %v4419_v31 = vpop.eup %4418  ;;  %v3416_v42 = vmul.f32 %v4417_v28, %v4413_v5  ;;  %v3511_v51 = vpop.permute.xlu1 %3510 }
 0xa39   :  { %v3415_v39 = vmul.f32 %v4419_v31, %v4415_v43  ;;  %v3525_v54 = vsel %vm889_vm12, %v3523_v60, %v3511_v51 }
 0xa3b   :  { %4258 = vmatprep.mubr.msk.f32.mxu1 %vm889_vm12, %v3415_v39 }
 0xa3c   :  { %4259 = vmatmul.mubr.msk.f32.vlgmr.msra.gmra.mrb[12].mxu1 %vm889_vm12, %v3416_v42 }
 0xa3d   :  { %4272 = vmatprep.mubr.msk.f32.mxu1 %vm4473_vm15, %v4474_v40 }
 0xb0f   :  { %v4260_v32 = vpop.f32.mrb[12].mxu1 }
 0xb10   :  { %3518 = vrot.lane.b32.xlu1 %v4260_v32, %s4471_s17  ;;  %v3489_v29 = vpop.f32.mrb[13].mxu1 }
 0xb11   :  { %3516 = vrot.lane.b32.xlu0 %v3489_v29, %s4471_s17 }
 0xb82   :  { %v3519_v26 = vpop.permute.xlu1 %3518 }
 0xb83   :  { %v3528_v44 = vsel %vm3526_vm14, %v3525_v54, %v3519_v26  ;;  %v3517_v25 = vpop.permute.xlu0 %3516 }
 0xb84   :  { %v3530_v45 = vadd.f32 %v3528_v44, %v145_v11  ;;  %v3527_v55 = vsel %vm3526_vm14, %v3524_v36, %v3517_v25 }
 0xb85   :  { %v3529_v53 = vadd.f32 %v3527_v55, %v140_v27 }
 0xb86   :  { %v3534_v56 = vsel %vm66_vm0, %v3530_v45, 0.0 }
 0xb87   :  { %3535 = vadd.xlane.f32.xlu1 %v3534_v56  ;;  %v3531_v63 = vsel %vm66_vm0, %v3529_v53, 0.0 }
 0xb88   :  { %3532 = vadd.xlane.f32.xlu0 %v3531_v63 }
 0xc14   :  { %v3536_v22 = vpop.xlane.xlu1 %3535 }
 0xc15   :  { %v3539_v23 = vmul.f32 0.03125, %v3536_v22  ;;  %v3533_v47 = vpop.xlane.xlu0 %3532 }
 0xc16   :  { %v3538_v59 = vmul.f32 0.03125, %v3533_v47 }
 0xc17   :  { %v3541_v50 = vsub.f32 %v3530_v45, %v3539_v23 }
 0xc18   :  { %v3540_v46 = vsub.f32 %v3529_v53, %v3538_v59  ;;  %v4475_v59 = vmov -1.0  }
 0xc19   :  { %v3543_v3 = vmul.f32 %v3541_v50, %v3541_v50 }
 0xc1a   :  { %v3542_v0 = vmul.f32 %v3540_v46, %v3540_v46 }
 0xc1b   :  { %v3547_v6 = vsel %vm66_vm0, %v3543_v3, 0.0 }
 0xc1c   :  { %v3544_v48 = vsel %vm66_vm0, %v3542_v0, 0.0 }
 0xc1d   :  { %3545 = vadd.xlane.f32.xlu0 %v3544_v48 }
 0xc21   :  { %3548 = vadd.xlane.f32.xlu0 %v3547_v6 }
 0xcaa   :  { %v3546_v7 = vpop.xlane.xlu0 %3545 }
 0xcab   :  { %v3550_v9 = vmul.f32 0.03125, %v3546_v7 }
 0xcad   :  { %v3552_v19 = vadd.f32 1e-05, %v3550_v9 }
 0xcae   :  { %v3549_v57 = vpop.xlane.xlu0 %3548 }
 0xcaf   :  { %4420 = vrsqrt.f32 %v3552_v19  ;;  %v3551_v17 = vmul.f32 0.03125, %v3549_v57 }
 0xcb1   :  { %v3553_v1 = vadd.f32 1e-05, %v3551_v17 }
 0xcb3   :  { %4422 = vrsqrt.f32 %v3553_v1 }
 0xcb9   :  { %v4421_v8 = vpop.eup %4420 }
 0xcba   :  { %v3556_v4 = vmul.f32 %v4421_v8, %v3540_v46 }
 0xcbc   :  { %v3565_v16 = vmul.f32 %v4069_v10, %v3556_v4 }
 0xcbd   :  { %v4423_v18 = vpop.eup %4422 }
 0xcbe   :  { %v3557_v21 = vmul.f32 %v4423_v18, %v3541_v50  ;;  %v3574_v2 = vadd.f32 %v4070_v12, %v3565_v16  ;;  %v3632_v16 = vld [vmem:[%s5950_s12] sm:$0x1] }
 0xcbf   :  { %v3712_v18 = vld [vmem:[%s5941_s3] sm:$0x3] }
 0xcc0   :  { %v3566_v20 = vmul.f32 %v4069_v10, %v3557_v21  ;;  %v3578_v14 = vmul.f32 0.70710677, %v3574_v2  ;;  %v3576_v6 = vmul.f32 0.5, %v3574_v2  ;;  %vm3713_vm4 = vcmp.gt.f32.partialorder %v3712_v18, 0.0 }
 0xcc2   :  { %v3575_v33 = vadd.f32 %v4070_v12, %v3566_v20  ;;  %v3584_v30 = vand.u32 2147483647, %v3578_v14  ;;  %vm3580_vm1 = vcmp.ge.f32.partialorder %v3578_v14, 0.0 }
 0xcc3   :  { %v3582_v50 = vsel %vm3580_vm1, 1.0, %v4475_v59 }
 0xcc4   :  { %v3579_v34 = vmul.f32 0.70710677, %v3575_v33  ;;  %v3586_v24 = vmul.f32 0.3275911, %v3584_v30  ;;  %v3612_v15 = vsub.f32 0.0, %v3584_v30  ;;  %v3577_v57 = vmul.f32 0.5, %v3575_v33 }
 0xcc6   :  { %v3585_v5 = vand.u32 2147483647, %v3579_v34  ;;  %v3588_v43 = vadd.f32 1.0, %v3586_v24  ;;  %v3614_v31 = vmul.f32 %v3612_v15, %v3584_v30  ;;  %vm3581_vm2 = vcmp.ge.f32.partialorder %v3579_v34, 0.0 }
 0xcc7   :  { %v3583_v7 = vsel %vm3581_vm2, 1.0, %v4475_v59 }
 0xcc8   :  { %v3587_v61 = vmul.f32 0.3275911, %v3585_v5  ;;  %4424 = vrcp.f32 %v3588_v43  ;;  %v3613_v28 = vsub.f32 0.0, %v3585_v5  ;;  %v3616_v62 = vmul.f32 1.442695, %v3614_v31 }
 0xcca   :  { %v3589_v49 = vadd.f32 1.0, %v3587_v61  ;;  %v3615_v29 = vmul.f32 %v3613_v28, %v3585_v5  ;;  %v3807_v28 = vld [vmem:[%s5951_s13 + $0x10] sm:$0xff] }
 0xccc   :  { %4426 = vrcp.f32 %v3589_v49  ;;  %v3618_v60 = vmul.f32 1.442695, %v3615_v29 }
 0xccd   :  { %4428 = vpow2.f32 %v3616_v62  ;;  %v4075_v62 = vld [vmem:[%s5952_s14] ss:$0 sm:$0xff] }
 0xcce   :  { %4430 = vpow2.f32 %v3618_v60 }
 0xcd2   :  { %v4425_v13 = vpop.eup %4424 }
 0xcd3   :  { %v3594_v39 = vmul.f32 1.0614054, %v4425_v13 }
 0xcd5   :  { %v3596_v42 = vadd.f32 -1.4531521, %v3594_v39  ;;  %v3808_v39 = vld [vmem:[%s5951_s13 + $0x18] sm:$0xff] }
 0xcd6   :  { %v4427_v32 = vpop.eup %4426 }
 0xcd7   :  { %v3595_v35 = vmul.f32 1.0614054, %v4427_v32  ;;  %v3598_v51 = vmul.f32 %v4425_v13, %v3596_v42  ;;  %v4429_v53 = vpop.eup %4428  ;;  %v4377_v42 = vpack.c.bf16 %v3808_v39, %v3807_v28 }
 0xcd8   :  { %v4431_v47 = vpop.eup %4430 }
 0xcd9   :  { %v3597_v52 = vadd.f32 -1.4531521, %v3595_v35  ;;  %v3600_v37 = vadd.f32 1.4214138, %v3598_v51 }
 0xcdb   :  { %v3599_v11 = vmul.f32 %v4427_v32, %v3597_v52  ;;  %v3602_v41 = vmul.f32 %v4425_v13, %v3600_v37 }
 0xcdd   :  { %v3601_v54 = vadd.f32 1.4214138, %v3599_v11  ;;  %v3604_v26 = vadd.f32 -0.28449672, %v3602_v41 }
 0xcdf   :  { %v3603_v27 = vmul.f32 %v4427_v32, %v3601_v54  ;;  %v3606_v36 = vmul.f32 %v4425_v13, %v3604_v26 }
 0xce1   :  { %v3605_v44 = vadd.f32 -0.28449672, %v3603_v27  ;;  %v3608_v25 = vadd.f32 0.2548296, %v3606_v36 }
 0xce3   :  { %v3607_v45 = vmul.f32 %v4427_v32, %v3605_v44  ;;  %v3610_v55 = vmul.f32 %v4425_v13, %v3608_v25  ;;  %v3806_v13 = vld [vmem:[%s5951_s13 + $0x8] sm:$0xff] }
 0xce5   :  { %v3609_v56 = vadd.f32 0.2548296, %v3607_v45  ;;  %v3620_v63 = vmul.f32 %v4429_v53, %v3610_v55 }
 0xce7   :  { %v3611_v22 = vmul.f32 %v4427_v32, %v3609_v56  ;;  %v3622_v23 = vsub.f32 1.0, %v3620_v63 }
 0xce9   :  { %v3621_v46 = vmul.f32 %v4431_v47, %v3611_v22  ;;  %v3624_v0 = vmul.f32 %v3622_v23, %v3582_v50 }
 0xceb   :  { %v3623_v48 = vsub.f32 1.0, %v3621_v46  ;;  %v3626_v3 = vadd.f32 1.0, %v3624_v0 }
 0xced   :  { %v3625_v9 = vmul.f32 %v3623_v48, %v3583_v7  ;;  %v3628_v19 = vmul.f32 %v3626_v3, %v3576_v6 }
 0xcef   :  { %v3627_v17 = vadd.f32 1.0, %v3625_v9  ;;  %4432 = vtanh.f32 %v3628_v19 }
 0xcf1   :  { %v3629_v1 = vmul.f32 %v3627_v17, %v3577_v57 }
 0xcf3   :  { %4434 = vtanh.f32 %v3629_v1  ;;  %v4371_v8 = vpack.c.bf16 %v3629_v1, %v3628_v19 }
 0xcf5   :  { %4372 = vmatpush3.bf16.msra.mxu1 %v4371_v8 }
 0xcf6   :  { %4373 = vmatprep.subr.bf16.mxu1 %v4472_v58 }
 0xcf9   :  { %v4433_v10 = vpop.eup %4432 }
 0xcfd   :  { %v4435_v4 = vpop.eup %4434 }
 0xcfe   :  { %v4367_v12 = vpack.c.bf16 %v4435_v4, %v4433_v10 }
 0xd00   :  { %4369 = vmatpush3.bf16.xpose.msk.msra.mxu0 %vm4368_vm3, %v4367_v12 }
 0xd07   :  { %4266 = vmatmul.mubr.msk.f32.vlgmr.msra.gmra.mrb[12].mxu0 %vm66_vm0, %v3632_v16 }
 0xdda   :  { %v3708_v21 = vpop.f32.mrb[12].mxu0 }
 0xddb   :  { %v3717_v2 = vrot.slane %v3708_v21, %v4621_v38  ;;  %v4267_v20 = vpop.f32.mrb[13].mxu0  ;;  %v3805_v38 = vld [vmem:[%s5951_s13] sm:$0xff]  ;;  %s4444_s13 = scalar_lea.vmem %s3898_s7, 32 }
 0xddc   :  { %v4374_v31 = vpack.c.bf16 %v3806_v13, %v3805_v38  ;;  %p4445_p0 = scmp.ne.s32.totalorder %s3898_s7, %s4444_s13  ;;  %p4450_p2 = scmp.lt.s32.totalorder %s4444_s13, %s4444_s13 }
 0xddd   :  { %v3718_v14 = vsel %vm3713_vm4, %v3717_v2, -inf }
 0xdde   :  { %v3720_v33 = vsel %vm3719_vm5, %v3718_v14, -inf  ;;  %p4451_p3 = por %p4450_p2, %p4449_p1 }
 0xddf   :  { %3721 = vmax.xlane.f32.xlu0 %v3720_v33 }
 0xde0   :  { %p4452_p4 = pnand %p4451_p3, %p4445_p0 }
 0xe6c   :  { %v3722_v30 = vpop.xlane.xlu0 %3721 }
 0xe6d   :  { %v3723_v34 = vsub.f32 %v3718_v14, %v3722_v30 }
 0xe6f   :  { %v3724_v24 = vmul.f32 1.442695, %v3723_v34 }
 0xe71   :  { %4436 = vpow2.f32 %v3724_v24 }
 0xe7b   :  { %v4437_v5 = vpop.eup %4436 }
 0xe7c   :  { %v3726_v43 = vsel %vm3719_vm5, %v4437_v5, 0.0 }
 0xe7d   :  { %3727 = vadd.xlane.f32.xlu1 %v3726_v43 }
 0xf0a   :  { %v3728_v61 = vpop.xlane.xlu1 %3727 }
 0xf0b   :  { %4438 = vrcp.f32 %v3728_v61 }
 0xf15   :  { %v4439_v49 = vpop.eup %4438 }
 0xf16   :  { %v3730_v15 = vmul.f32 %v4439_v49, %v4437_v5 }
 0xf18   :  { %4273 = vmatmul.mubr.msk.f32.vlgmr.msra.gmra.mrb[14].mxu1 %vm889_vm12, %v3730_v15 }
 0xf19   :  { %4283 = vmatprep.mubr.msk.f32.mxu1 %vm4473_vm15, %v4474_v40  ;;  %4375 = vmatpush3.bf16.msra.mxu1 %v4374_v31 }
 0xf1a   :  { %4376 = vmatprep.subr.bf16.mxu1 %v4472_v58 }
 0xf1d   :  { %4378 = vmatpush3.bf16.msra.mxu1 %v4377_v42 }
 0xfeb   :  { %v3800_v40 = vpop.f32.mrb[14].mxu1 }
 0xfec   :  { %4440 = vtanh.f32 %v3800_v40  ;;  %v4274_v32 = vpop.f32.mrb[15].mxu1 }
 0xff6   :  { %v4441_v29 = vpop.eup %4440 }
 0xff7   :  { %4284 = vmatmul.mubr.msk.f32.vlgmr.msra.gmra.mrb[16].mxu1 %vm66_vm0, %v4441_v29 }
0x10ca   :  { %v3885_v35 = vpop.f32.mrb[16].mxu1 }
0x10cb   :  { %v3886_v51 = vadd.f32 %v4075_v62, %v3885_v35  ;;  %v4285_v52 = vpop.f32.mrb[17].mxu1 }
0x10cd   :  { %3890 = vst.msk [vmem:[#allocation2] sm:$0x3] %vm3889_vm6, %v3886_v51 }
0x10ce   :  { %4455 = shalt.err (!%p4452_p4)
}
0x10cf   :  { %s4456_s16 = scalar_lea.hbm %s5953_s15, 32 }
0x10d0   :  { %p4457_p5 = scmp.ne.s32.totalorder %s5953_s15, %s4456_s16  ;;  %p4460_p6 = scmp.lt.u32.totalorder %s4456_s16, %s5953_s15 }
0x10d2   :  { %p4462_p7 = pnand %p4460_p6, %p4457_p5 }
0x10d4   :  { %4465 = shalt.err (!%p4462_p7)
}
0x10d5   :  { %3900 = dma.vmem_to_hbm [thread:$0]  %s3898_s7, 32, %s5953_s15, [#allocation3]  }
0x10d6   :  { %4466 = dma.done.wait [#allocation3], 32  }
0x10d7   :  { %4467 = vsyncadd [#allocation3], 4294967264 }
0x10d8   :  { %3904 = vsyncpa [#allocation3], 1 }

</bundles_post_ra>
